<compile_context>
chip_gen: v7x
topology: tpu7x:2x2x1
jax: 0.10.0
libtpu: 0.0.40
codegen_flags: <defaults>
</compile_context>

<pallas_src>
import functools

import jax
import jax.numpy as jnp
from jax import lax
from jax.experimental import pallas as pl
from jax.experimental.pallas import tpu as pltpu


# ----------------------------- small helpers --------------------------------


def _round_up(x, m):
    return ((x + m - 1) // m) * m


def _sublane(dtype):
    return 16 if jnp.dtype(dtype) == jnp.dtype(jnp.bfloat16) else 8


def _vmem_config():
    """Generation-aware (tile_budget, vmem_limit_bytes, two_cores_likely)."""
    phys = 64 * 1024 * 1024
    try:
        info = pltpu.get_tpu_info()
        phys = int(getattr(info, "vmem_capacity_bytes", phys)) or phys
    except Exception:
        pass
    tile_budget = max(8 << 20, min(int(phys * 0.60), 96 << 20))
    vmem_limit = max(16 << 20, min(int(phys * 0.85), 128 << 20))
    # 64 MiB per-core VMEM => v7x-class chip with 2 TensorCores: prefer an even
    # number (>=2) of batch grid steps so both cores stay busy.
    two_cores = phys <= 80 * 1024 * 1024
    return tile_budget, vmem_limit, two_cores


def _choose_tiles(T, B, Kp, Hp, Op, cdt, sub, tile_budget, two_cores):
    """Pick (Bt, Bp, Tc): large sublane-aligned batch tile, divisor-of-T chunk."""
    itemsize = jnp.dtype(cdt).itemsize
    G4 = 4 * Hp
    Kw = max(Kp, Hp)  # worst-case layer input width

    def vmem_need(Tc, Bt):
        v = 2 * Tc * Bt * Kw * itemsize            # input block (double-buffered)
        v += 2 * Kw * G4 * itemsize                # W_ih
        v += 2 * Hp * G4 * itemsize                # W_hh
        v += 2 * G4 * 4                            # bias (f32)
        v += Tc * Bt * G4 * 4                      # gate scratch (f32)
        v += 2 * Bt * Hp * 4                       # h, c scratch (f32)
        v += 2 * Tc * Bt * Hp * itemsize           # hidden-seq output (mid layers)
        v += 2 * Hp * Op * itemsize + 2 * Op * 4   # fused FC weights + bias
        v += 2 * Bt * Op * 4                       # FC output (f32)
        return v

    Bp0 = _round_up(max(B, 1), sub)
    nb = 2 if (two_cores and Bp0 >= 2 * sub) else 1
    MAX_BT = 512
    nb = max(nb, -(-Bp0 // MAX_BT))
    if two_cores and nb > 1 and nb % 2:
        nb += 1                                    # keep the two cores balanced
    Bt = _round_up(-(-Bp0 // nb), sub)

    # Largest divisor of T whose chunk fits the budget; shrink Bt only if even
    # Tc=1 does not fit (never below one sublane group).
    while True:
        Tc = 0
        for cand in range(T, 0, -1):
            if T % cand == 0 and vmem_need(cand, Bt) <= tile_budget:
                Tc = cand
                break
        if Tc or Bt <= sub:
            Tc = max(Tc, 1)
            break
        Bt = max(sub, _round_up(Bt // 2, sub))

    Bp = _round_up(Bp0, Bt)
    return Bt, Bp, Tc


# ------------------------------- kernels -------------------------------------


def _lstm_chunk(x_ref, wih_ref, b_ref, whh_ref, out_ref, h_sc, c_sc, gin_sc):
    """Fused input projection + serial recurrence for one (time-chunk, batch-tile).

    x_ref:   (Tc, Bt, K)   layer input chunk (time-major)
    wih_ref: (K, 4Hp)      W_ih^T, gate order (i, f, o, g)
    b_ref:   (1, 4Hp)      b_ih + b_hh (f32)
    whh_ref: (Hp, 4Hp)     W_hh^T
    out_ref: (Tc, Bt, Hp)  hidden sequence output, or None (last layer)
    h_sc/c_sc: (Bt, Hp)    f32 state carried across time chunks (VMEM scratch)
    gin_sc:  (Tc, Bt, 4Hp) f32 gate scratch
    Returns the chunk-final hidden state (Bt, Hp) f32.
    """
    Tc, Bt, K = x_ref.shape
    G4 = wih_ref.shape[1]
    Hp = whh_ref.shape[0]
    w_dtype = whh_ref.dtype

    # Whole-chunk input projection as one large MXU matmul; bias folded here and
    # the result kept in f32 (gates never pass through a low-precision store).
    x2d = x_ref[...].reshape(Tc * Bt, K)
    gin_sc[...] = (
        jnp.dot(x2d, wih_ref[...], preferred_element_type=jnp.float32)
        + b_ref[...]
    ).reshape(Tc, Bt, G4)

    def step(t, carry):
        h, c = carry
        gates = gin_sc[t] + jnp.dot(
            h.astype(w_dtype), whh_ref[...], preferred_element_type=jnp.float32)
        # gate order (i, f, o, g): one contiguous lane-aligned sigmoid pass + tanh.
        ifo = jax.nn.sigmoid(gates[:, : 3 * Hp])
        g_new = jnp.tanh(gates[:, 3 * Hp:])
        c_new = ifo[:, Hp: 2 * Hp] * c + ifo[:, :Hp] * g_new
        h_new = ifo[:, 2 * Hp:] * jnp.tanh(c_new)
        if out_ref is not None:
            out_ref[t] = h_new.astype(out_ref.dtype)
        return h_new, c_new

    # TODO(synk): sweep unroll per (Bt, Hp); large Bt can spill at high unroll.
    unroll = True if Tc <= 8 else 2
    h_f, c_f = lax.fori_loop(0, Tc, step, (h_sc[...], c_sc[...]), unroll=unroll)
    h_sc[...] = h_f
    c_sc[...] = c_f
    return h_f


def lstm_layer_kernel(x_ref, wih_ref, b_ref, whh_ref, out_ref, h_sc, c_sc, gin_sc):
    @pl.when(pl.program_id(1) == 0)
    def _():
        h_sc[...] = jnp.zeros_like(h_sc)
        c_sc[...] = jnp.zeros_like(c_sc)

    _lstm_chunk(x_ref, wih_ref, b_ref, whh_ref, out_ref, h_sc, c_sc, gin_sc)


def lstm_layer_fc_kernel(x_ref, wih_ref, b_ref, whh_ref, fcw_ref, fcb_ref,
                         out_ref, h_sc, c_sc, gin_sc):
    """Last LSTM layer: recurrence (no sequence output) + fused final Linear."""
    @pl.when(pl.program_id(1) == 0)
    def _():
        h_sc[...] = jnp.zeros_like(h_sc)
        c_sc[...] = jnp.zeros_like(c_sc)

    h_f = _lstm_chunk(x_ref, wih_ref, b_ref, whh_ref, None, h_sc, c_sc, gin_sc)

    @pl.when(pl.program_id(1) == pl.num_programs(1) - 1)
    def _():
        out_ref[...] = (
            jnp.dot(h_f.astype(fcw_ref.dtype), fcw_ref[...],
                    preferred_element_type=jnp.float32)
            + fcb_ref[...]
        ).astype(out_ref.dtype)


# ------------------------------- wrappers -------------------------------------


def run_lstm_layer(seq, layer, fc_w_t, fc_b, *, Bt, Tc, vmem_limit):
    """One LSTM layer. seq: (T, Bp, K) time-major. Returns (T, Bp, Hp) hidden
    sequence, or (Bp, Op) f32 when fc_w_t/fc_b are given (last layer, fused FC)."""
    T, Bp, Kin = seq.shape
    Hp = layer["whh_t"].shape[0]
    G4 = 4 * Hp
    grid = (Bp // Bt, T // Tc)

    in_specs = [
        pl.BlockSpec((Tc, Bt, Kin), lambda b, t: (t, b, 0)),
        pl.BlockSpec((Kin, G4), lambda b, t: (0, 0)),
        pl.BlockSpec((1, G4), lambda b, t: (0, 0)),
        pl.BlockSpec((Hp, G4), lambda b, t: (0, 0)),
    ]
    scratch = [
        pltpu.VMEM((Bt, Hp), jnp.float32),       # h
        pltpu.VMEM((Bt, Hp), jnp.float32),       # c
        pltpu.VMEM((Tc, Bt, G4), jnp.float32),   # gates
    ]
    cp = pltpu.CompilerParams(
        dimension_semantics=("parallel", "arbitrary"),
        vmem_limit_bytes=vmem_limit)

    if fc_w_t is None:
        return pl.pallas_call(
            lstm_layer_kernel,
            out_shape=jax.ShapeDtypeStruct((T, Bp, Hp), seq.dtype),
            grid_spec=pltpu.PrefetchScalarGridSpec(
                num_scalar_prefetch=0, grid=grid,
                in_specs=in_specs,
                out_specs=pl.BlockSpec((Tc, Bt, Hp), lambda b, t: (t, b, 0)),
                scratch_shapes=scratch),
            compiler_params=cp,
        )(seq, layer["wih_t"], layer["bias"], layer["whh_t"])

    Op = fc_w_t.shape[1]
    in_specs = in_specs + [
        pl.BlockSpec((Hp, Op), lambda b, t: (0, 0)),
        pl.BlockSpec((1, Op), lambda b, t: (0, 0)),
    ]
    return pl.pallas_call(
        lstm_layer_fc_kernel,
        out_shape=jax.ShapeDtypeStruct((Bp, Op), jnp.float32),
        grid_spec=pltpu.PrefetchScalarGridSpec(
            num_scalar_prefetch=0, grid=grid,
            in_specs=in_specs,
            out_specs=pl.BlockSpec((Bt, Op), lambda b, t: (b, 0)),
            scratch_shapes=scratch),
        compiler_params=cp,
    )(seq, layer["wih_t"], layer["bias"], layer["whh_t"], fc_w_t, fc_b)


@functools.partial(jax.jit, static_argnames=("out_size",))
def stock_lstm_forward(x, params, *, out_size):
    """x: (B, T, input_size), batch_first like the PyTorch module. Returns (B, O) f32."""
    layers = params["lstm"]
    cdt = layers[0]["wih_t"].dtype
    B, T, K = x.shape
    Kp = layers[0]["wih_t"].shape[0]
    Hp = layers[0]["whh_t"].shape[0]
    Op = params["fc_w_t"].shape[1]
    sub = _sublane(cdt)

    tile_budget, vmem_limit, two_cores = _vmem_config()
    Bt, Bp, Tc = _choose_tiles(T, B, Kp, Hp, Op, cdt, sub, tile_budget, two_cores)

    xp = jnp.pad(x, ((0, Bp - B), (0, 0), (0, Kp - K)))
    seq = jnp.transpose(xp, (1, 0, 2)).astype(cdt)        # (T, Bp, Kp) time-major

    n = len(layers)
    out = None
    for li, layer in enumerate(layers):
        # TODO(synk): inter-layer dropout (training mode) intentionally omitted.
        if li < n - 1:
            seq = run_lstm_layer(seq, layer, None, None,
                                 Bt=Bt, Tc=Tc, vmem_limit=vmem_limit)
        else:
            out = run_lstm_layer(seq, layer, params["fc_w_t"], params["fc_b"],
                                 Bt=Bt, Tc=Tc, vmem_limit=vmem_limit)
    return out[:B, :out_size]


# --------------------------- parameter handling -------------------------------


def init_params(key, input_size, hidden_size, num_layers, output_size):
    """Raw PyTorch-layout params: U(-1/sqrt(H), 1/sqrt(H)), gate order (i,f,g,o)."""
    k = 1.0 / jnp.sqrt(jnp.float32(hidden_size))
    layers = []
    for l in range(num_layers):
        in_sz = input_size if l == 0 else hidden_size
        key, k1, k2, k3, k4 = jax.random.split(key, 5)
        layers.append({
            "w_ih": jax.random.uniform(k1, (4 * hidden_size, in_sz), jnp.float32, -k, k),
            "w_hh": jax.random.uniform(k2, (4 * hidden_size, hidden_size), jnp.float32, -k, k),
            "b_ih": jax.random.uniform(k3, (4 * hidden_size,), jnp.float32, -k, k),
            "b_hh": jax.random.uniform(k4, (4 * hidden_size,), jnp.float32, -k, k),
        })
    key, k5, k6 = jax.random.split(key, 3)
    fc_w = jax.random.uniform(k5, (output_size, hidden_size), jnp.float32, -k, k)
    fc_b = jax.random.uniform(k6, (output_size,), jnp.float32, -k, k)
    return {"lstm": layers, "fc_w": fc_w, "fc_b": fc_b}


def _reorder_pad_gates(w, H, Hp):
    """PyTorch gate order (i,f,g,o) on axis 0 -> kernel order (i,f,o,g), each gate
    block zero-padded from H to Hp rows (padded lanes provably stay at h=c=0)."""
    gi, gf, gg, go = jnp.split(w, 4, axis=0)
    pad = [(0, Hp - H)] + [(0, 0)] * (w.ndim - 1)
    return jnp.concatenate([jnp.pad(p, pad) for p in (gi, gf, go, gg)], axis=0)


def _pad_last(a, new):
    pad = [(0, 0)] * (a.ndim - 1) + [(0, new - a.shape[-1])]
    return jnp.pad(a, pad)


def prepare_params(raw, hidden_size, compute_dtype):
    """Pad H / layer-0 K / O to 128-lane multiples, reorder gates, transpose,
    cast MXU inputs to the compute dtype (biases stay f32)."""
    H = hidden_size
    Hp = _round_up(H, 128)
    layers = []
    for li, lp in enumerate(raw["lstm"]):
        K = lp["w_ih"].shape[1]
        Kp = Hp if li > 0 else _round_up(K, 128)       # lane-dense layer-0 features
        wih = _pad_last(_reorder_pad_gates(lp["w_ih"], H, Hp), Kp)   # (4Hp, Kp)
        whh = _pad_last(_reorder_pad_gates(lp["w_hh"], H, Hp), Hp)   # (4Hp, Hp)
        b = _reorder_pad_gates((lp["b_ih"] + lp["b_hh"])[:, None], H, Hp)[:, 0]
        layers.append({
            "wih_t": wih.T.astype(compute_dtype),                    # (Kp, 4Hp)
            "whh_t": whh.T.astype(compute_dtype),                    # (Hp, 4Hp)
            "bias": b[None, :].astype(jnp.float32),                  # (1, 4Hp)
        })
    O = raw["fc_w"].shape[0]
    Op = _round_up(O, 128)                                           # lane-dense FC store
    fc_w = jnp.pad(raw["fc_w"], ((0, Op - O), (0, Hp - H)))          # (Op, Hp)
    fc_b = jnp.pad(raw["fc_b"], (0, Op - O))
    return {"lstm": layers,
            "fc_w_t": fc_w.T.astype(compute_dtype),                  # (Hp, Op)
            "fc_b": fc_b[None, :].astype(jnp.float32)}               # (1, Op)


# ---------------------- pure-JAX reference (check) ----------------------------


def reference_forward(x, raw, hidden_size):
    B = x.shape[0]
    H = hidden_size
    seq = jnp.transpose(x, (1, 0, 2))
    for lp in raw["lstm"]:
        wih_t, whh_t = lp["w_ih"].T, lp["w_hh"].T
        b = (lp["b_ih"] + lp["b_hh"])[None, :]
        h = jnp.zeros((B, H), jnp.float32)
        c = jnp.zeros((B, H), jnp.float32)
        outs = []
        for t in range(seq.shape[0]):
            g = seq[t] @ wih_t + h @ whh_t + b
            i = jax.nn.sigmoid(g[:, 0 * H:1 * H])
            f = jax.nn.sigmoid(g[:, 1 * H:2 * H])
            gg = jnp.tanh(g[:, 2 * H:3 * H])
            o = jax.nn.sigmoid(g[:, 3 * H:4 * H])
            c = f * c + i * gg
            h = o * jnp.tanh(c)
            outs.append(h)
        seq = jnp.stack(outs, axis=0)
    return seq[-1] @ raw["fc_w"].T + raw["fc_b"][None, :]


# ---------------------------------- main ---------------------------------------

if __name__ == "__main__":
    batch, seq_len = 2, 8
    input_size, hidden_size, num_layers, output_size = 4, 32, 2, 1

    key = jax.random.PRNGKey(0)
    key, kx, kp = jax.random.split(key, 3)
    x = jax.random.normal(kx, (batch, seq_len, input_size), jnp.float32)
    raw = init_params(kp, input_size, hidden_size, num_layers, output_size)

    with jax.default_matmul_precision("highest"):
        ref = reference_forward(x, raw, hidden_size)

    # f32 path
    p32 = prepare_params(raw, hidden_size, jnp.float32)
    out32 = jax.block_until_ready(stock_lstm_forward(x, p32, out_size=output_size))
    assert out32.shape == (batch, output_size), out32.shape
    assert jnp.allclose(out32, ref, atol=2e-2, rtol=2e-2), (out32, ref)

    # bf16 MXU-input path (gates, cell state, accumulation all stay f32).
    pbf = prepare_params(raw, hidden_size, jnp.bfloat16)
    outbf = jax.block_until_ready(stock_lstm_forward(x, pbf, out_size=output_size))
    assert outbf.shape == (batch, output_size), outbf.shape
    assert jnp.allclose(outbf, ref, atol=6e-2, rtol=6e-2), (outbf, ref)

    print("KERNEL_OK")
</pallas_src>

<mosaic_0001>
module attributes {stable_mosaic.version = 11 : i64} {
  func.func @lstm_layer_kernel(%arg0: i32, %arg1: i32, %arg2: memref<8x8x128xf32, #tpu.memory_space<vmem>>, %arg3: memref<128x512xf32, #tpu.memory_space<vmem>>, %arg4: memref<1x512xf32, #tpu.memory_space<vmem>>, %arg5: memref<128x512xf32, #tpu.memory_space<vmem>>, %arg6: memref<8x8x128xf32, #tpu.memory_space<vmem>>, %arg7: memref<8x128xf32, #tpu.memory_space<vmem>>, %arg8: memref<8x128xf32, #tpu.memory_space<vmem>>, %arg9: memref<8x8x512xf32, #tpu.memory_space<vmem>>) attributes {dimension_semantics = [#tpu.dimension_semantics<parallel>, #tpu.dimension_semantics<arbitrary>], iteration_bounds = array<i64: 1, 1>, scalar_prefetch = 0 : i64, scratch_operands = 3 : i64, tpu.core_type = #tpu.core_type<tc>, window_params = [{transform_indices = @transform_0, window_bounds = array<i64: 8, 8, 128>}, {pipeline_mode = #tpu.pipeline_mode<synchronous>, transform_indices = @transform_1, window_bounds = array<i64: 128, 512>}, {pipeline_mode = #tpu.pipeline_mode<synchronous>, transform_indices = @transform_2, window_bounds = array<i64: 1, 512>}, {pipeline_mode = #tpu.pipeline_mode<synchronous>, transform_indices = @transform_3, window_bounds = array<i64: 128, 512>}, {transform_indices = @transform_4, window_bounds = array<i64: 8, 8, 128>}]} {
    %c0_i32 = arith.constant 0 : i32
    %0 = arith.cmpi eq, %arg1, %c0_i32 : i32
    %1 = arith.extui %0 : i1 to i32
    %c0_i32_0 = arith.constant 0 : i32
    %2 = arith.cmpi ne, %1, %c0_i32_0 : i32
    scf.if %2 {
      %cst_83 = arith.constant 0.000000e+00 : f32
      %224 = vector.broadcast %cst_83 : f32 to vector<8x128xf32>
      %c0_84 = arith.constant 0 : index
      %c0_85 = arith.constant 0 : index
      %225 = vector.load %arg7[%c0_84, %c0_85] : memref<8x128xf32, #tpu.memory_space<vmem>>, vector<8x128xf32>
      tpu.vector_store %arg7[%c0_84, %c0_85], %224 {strides = array<i32>} : memref<8x128xf32, #tpu.memory_space<vmem>>, vector<8x128xf32>,
      %cst_86 = arith.constant 0.000000e+00 : f32
      %226 = vector.broadcast %cst_86 : f32 to vector<8x128xf32>
      %c0_87 = arith.constant 0 : index
      %c0_88 = arith.constant 0 : index
      %227 = vector.load %arg8[%c0_87, %c0_88] : memref<8x128xf32, #tpu.memory_space<vmem>>, vector<8x128xf32>
      tpu.vector_store %arg8[%c0_87, %c0_88], %226 {strides = array<i32>} : memref<8x128xf32, #tpu.memory_space<vmem>>, vector<8x128xf32>,
    } else {
    }
    %c0 = arith.constant 0 : index
    %c0_1 = arith.constant 0 : index
    %c0_2 = arith.constant 0 : index
    %3 = vector.load %arg2[%c0, %c0_1, %c0_2] : memref<8x8x128xf32, #tpu.memory_space<vmem>>, vector<8x8x128xf32>
    %4 = vector.shape_cast %3 : vector<8x8x128xf32> to vector<64x128xf32>
    %c0_3 = arith.constant 0 : index
    %c0_4 = arith.constant 0 : index
    %5 = vector.load %arg3[%c0_3, %c0_4] : memref<128x512xf32, #tpu.memory_space<vmem>>, vector<128x512xf32>
    %cst = arith.constant dense<0.000000e+00> : vector<64x512xf32>
    %6 = tpu.matmul %4, %5, %cst {dimension_numbers = #tpu.dot_dimension_numbers<[1], [0], [0], [1], [0, 0, 1, 1], [], []>} : vector<64x128xf32>, vector<128x512xf32>, vector<64x512xf32> -> vector<64x512xf32>
    %c0_5 = arith.constant 0 : index
    %c0_6 = arith.constant 0 : index
    %7 = vector.load %arg4[%c0_5, %c0_6] : memref<1x512xf32, #tpu.memory_space<vmem>>, vector<1x512xf32>
    %8 = vector.broadcast %7 : vector<1x512xf32> to vector<64x512xf32>
    %9 = arith.addf %6, %8 : vector<64x512xf32>
    %10 = vector.shape_cast %9 : vector<64x512xf32> to vector<8x8x512xf32>
    %c0_7 = arith.constant 0 : index
    %c0_8 = arith.constant 0 : index
    %c0_9 = arith.constant 0 : index
    %11 = vector.load %arg9[%c0_7, %c0_8, %c0_9] : memref<8x8x512xf32, #tpu.memory_space<vmem>>, vector<8x8x512xf32>
    tpu.vector_store %arg9[%c0_7, %c0_8, %c0_9], %10 {strides = array<i32>} : memref<8x8x512xf32, #tpu.memory_space<vmem>>, vector<8x8x512xf32>,
    %c0_10 = arith.constant 0 : index
    %c0_11 = arith.constant 0 : index
    %12 = vector.load %arg7[%c0_10, %c0_11] : memref<8x128xf32, #tpu.memory_space<vmem>>, vector<8x128xf32>
    %c0_12 = arith.constant 0 : index
    %c0_13 = arith.constant 0 : index
    %13 = vector.load %arg8[%c0_12, %c0_13] : memref<8x128xf32, #tpu.memory_space<vmem>>, vector<8x128xf32>
    %c0_i32_14 = arith.constant 0 : i32
    %14 = arith.index_cast %c0_i32_14 : i32 to index
    %c0_15 = arith.constant 0 : index
    %c0_16 = arith.constant 0 : index
    %15 = vector.load %arg9[%14, %c0_15, %c0_16] : memref<8x8x512xf32, #tpu.memory_space<vmem>>, vector<1x8x512xf32>
    %16 = vector.shape_cast %15 : vector<1x8x512xf32> to vector<8x512xf32>
    %c0_17 = arith.constant 0 : index
    %c0_18 = arith.constant 0 : index
    %17 = vector.load %arg5[%c0_17, %c0_18] : memref<128x512xf32, #tpu.memory_space<vmem>>, vector<128x512xf32>
    %cst_19 = arith.constant dense<0.000000e+00> : vector<8x512xf32>
    %18 = tpu.matmul %12, %17, %cst_19 {dimension_numbers = #tpu.dot_dimension_numbers<[1], [0], [0], [1], [0, 0, 1, 1], [], []>} : vector<8x128xf32>, vector<128x512xf32>, vector<8x512xf32> -> vector<8x512xf32>
    %19 = arith.addf %16, %18 : vector<8x512xf32>
    %20 = vector.extract_strided_slice %19 {offsets = [0, 0], sizes = [8, 384], strides = [1, 1]} : vector<8x512xf32> to vector<8x384xf32>
    %21 = arith.negf %20 : vector<8x384xf32>
    %22 = math.exp %21 : vector<8x384xf32>
    %cst_20 = arith.constant 1.000000e+00 : f32
    %23 = vector.broadcast %cst_20 : f32 to vector<8x384xf32>
    %24 = arith.addf %23, %22 : vector<8x384xf32>
    %25 = arith.divf %23, %24 : vector<8x384xf32>
    %26 = vector.extract_strided_slice %19 {offsets = [0, 384], sizes = [8, 128], strides = [1, 1]} : vector<8x512xf32> to vector<8x128xf32>
    %27 = math.tanh %26 : vector<8x128xf32>
    %28 = vector.extract_strided_slice %25 {offsets = [0, 128], sizes = [8, 128], strides = [1, 1]} : vector<8x384xf32> to vector<8x128xf32>
    %29 = arith.mulf %28, %13 : vector<8x128xf32>
    %30 = vector.extract_strided_slice %25 {offsets = [0, 0], sizes = [8, 128], strides = [1, 1]} : vector<8x384xf32> to vector<8x128xf32>
    %31 = arith.mulf %30, %27 : vector<8x128xf32>
    %32 = arith.addf %29, %31 : vector<8x128xf32>
    %33 = vector.extract_strided_slice %25 {offsets = [0, 256], sizes = [8, 128], strides = [1, 1]} : vector<8x384xf32> to vector<8x128xf32>
    %34 = math.tanh %32 : vector<8x128xf32>
    %35 = arith.mulf %33, %34 : vector<8x128xf32>
    %36 = arith.index_cast %c0_i32_14 : i32 to index
    %c0_21 = arith.constant 0 : index
    %c0_22 = arith.constant 0 : index
    %37 = vector.load %arg6[%36, %c0_21, %c0_22] : memref<8x8x128xf32, #tpu.memory_space<vmem>>, vector<1x8x128xf32>
    %38 = vector.shape_cast %37 : vector<1x8x128xf32> to vector<8x128xf32>
    %39 = vector.shape_cast %35 : vector<8x128xf32> to vector<1x8x128xf32>
    tpu.vector_store %arg6[%36, %c0_21, %c0_22], %39 {strides = array<i32>} : memref<8x8x128xf32, #tpu.memory_space<vmem>>, vector<1x8x128xf32>,
    %c1_i32 = arith.constant 1 : i32
    %40 = arith.index_cast %c1_i32 : i32 to index
    %c0_23 = arith.constant 0 : index
    %c0_24 = arith.constant 0 : index
    %41 = vector.load %arg9[%40, %c0_23, %c0_24] : memref<8x8x512xf32, #tpu.memory_space<vmem>>, vector<1x8x512xf32>
    %42 = vector.shape_cast %41 : vector<1x8x512xf32> to vector<8x512xf32>
    %c0_25 = arith.constant 0 : index
    %c0_26 = arith.constant 0 : index
    %43 = vector.load %arg5[%c0_25, %c0_26] : memref<128x512xf32, #tpu.memory_space<vmem>>, vector<128x512xf32>
    %cst_27 = arith.constant dense<0.000000e+00> : vector<8x512xf32>
    %44 = tpu.matmul %35, %43, %cst_27 {dimension_numbers = #tpu.dot_dimension_numbers<[1], [0], [0], [1], [0, 0, 1, 1], [], []>} : vector<8x128xf32>, vector<128x512xf32>, vector<8x512xf32> -> vector<8x512xf32>
    %45 = arith.addf %42, %44 : vector<8x512xf32>
    %46 = vector.extract_strided_slice %45 {offsets = [0, 0], sizes = [8, 384], strides = [1, 1]} : vector<8x512xf32> to vector<8x384xf32>
    %47 = arith.negf %46 : vector<8x384xf32>
    %48 = math.exp %47 : vector<8x384xf32>
    %cst_28 = arith.constant 1.000000e+00 : f32
    %49 = vector.broadcast %cst_28 : f32 to vector<8x384xf32>
    %50 = arith.addf %49, %48 : vector<8x384xf32>
    %51 = arith.divf %49, %50 : vector<8x384xf32>
    %52 = vector.extract_strided_slice %45 {offsets = [0, 384], sizes = [8, 128], strides = [1, 1]} : vector<8x512xf32> to vector<8x128xf32>
    %53 = math.tanh %52 : vector<8x128xf32>
    %54 = vector.extract_strided_slice %51 {offsets = [0, 128], sizes = [8, 128], strides = [1, 1]} : vector<8x384xf32> to vector<8x128xf32>
    %55 = arith.mulf %54, %32 : vector<8x128xf32>
    %56 = vector.extract_strided_slice %51 {offsets = [0, 0], sizes = [8, 128], strides = [1, 1]} : vector<8x384xf32> to vector<8x128xf32>
    %57 = arith.mulf %56, %53 : vector<8x128xf32>
    %58 = arith.addf %55, %57 : vector<8x128xf32>
    %59 = vector.extract_strided_slice %51 {offsets = [0, 256], sizes = [8, 128], strides = [1, 1]} : vector<8x384xf32> to vector<8x128xf32>
    %60 = math.tanh %58 : vector<8x128xf32>
    %61 = arith.mulf %59, %60 : vector<8x128xf32>
    %62 = arith.index_cast %c1_i32 : i32 to index
    %c0_29 = arith.constant 0 : index
    %c0_30 = arith.constant 0 : index
    %63 = vector.load %arg6[%62, %c0_29, %c0_30] : memref<8x8x128xf32, #tpu.memory_space<vmem>>, vector<1x8x128xf32>
    %64 = vector.shape_cast %63 : vector<1x8x128xf32> to vector<8x128xf32>
    %65 = vector.shape_cast %61 : vector<8x128xf32> to vector<1x8x128xf32>
    tpu.vector_store %arg6[%62, %c0_29, %c0_30], %65 {strides = array<i32>} : memref<8x8x128xf32, #tpu.memory_space<vmem>>, vector<1x8x128xf32>,
    %c2_i32 = arith.constant 2 : i32
    %66 = arith.index_cast %c2_i32 : i32 to index
    %c0_31 = arith.constant 0 : index
    %c0_32 = arith.constant 0 : index
    %67 = vector.load %arg9[%66, %c0_31, %c0_32] : memref<8x8x512xf32, #tpu.memory_space<vmem>>, vector<1x8x512xf32>
    %68 = vector.shape_cast %67 : vector<1x8x512xf32> to vector<8x512xf32>
    %c0_33 = arith.constant 0 : index
    %c0_34 = arith.constant 0 : index
    %69 = vector.load %arg5[%c0_33, %c0_34] : memref<128x512xf32, #tpu.memory_space<vmem>>, vector<128x512xf32>
    %cst_35 = arith.constant dense<0.000000e+00> : vector<8x512xf32>
    %70 = tpu.matmul %61, %69, %cst_35 {dimension_numbers = #tpu.dot_dimension_numbers<[1], [0], [0], [1], [0, 0, 1, 1], [], []>} : vector<8x128xf32>, vector<128x512xf32>, vector<8x512xf32> -> vector<8x512xf32>
    %71 = arith.addf %68, %70 : vector<8x512xf32>
    %72 = vector.extract_strided_slice %71 {offsets = [0, 0], sizes = [8, 384], strides = [1, 1]} : vector<8x512xf32> to vector<8x384xf32>
    %73 = arith.negf %72 : vector<8x384xf32>
    %74 = math.exp %73 : vector<8x384xf32>
    %cst_36 = arith.constant 1.000000e+00 : f32
    %75 = vector.broadcast %cst_36 : f32 to vector<8x384xf32>
    %76 = arith.addf %75, %74 : vector<8x384xf32>
    %77 = arith.divf %75, %76 : vector<8x384xf32>
    %78 = vector.extract_strided_slice %71 {offsets = [0, 384], sizes = [8, 128], strides = [1, 1]} : vector<8x512xf32> to vector<8x128xf32>
    %79 = math.tanh %78 : vector<8x128xf32>
    %80 = vector.extract_strided_slice %77 {offsets = [0, 128], sizes = [8, 128], strides = [1, 1]} : vector<8x384xf32> to vector<8x128xf32>
    %81 = arith.mulf %80, %58 : vector<8x128xf32>
    %82 = vector.extract_strided_slice %77 {offsets = [0, 0], sizes = [8, 128], strides = [1, 1]} : vector<8x384xf32> to vector<8x128xf32>
    %83 = arith.mulf %82, %79 : vector<8x128xf32>
    %84 = arith.addf %81, %83 : vector<8x128xf32>
    %85 = vector.extract_strided_slice %77 {offsets = [0, 256], sizes = [8, 128], strides = [1, 1]} : vector<8x384xf32> to vector<8x128xf32>
    %86 = math.tanh %84 : vector<8x128xf32>
    %87 = arith.mulf %85, %86 : vector<8x128xf32>
    %88 = arith.index_cast %c2_i32 : i32 to index
    %c0_37 = arith.constant 0 : index
    %c0_38 = arith.constant 0 : index
    %89 = vector.load %arg6[%88, %c0_37, %c0_38] : memref<8x8x128xf32, #tpu.memory_space<vmem>>, vector<1x8x128xf32>
    %90 = vector.shape_cast %89 : vector<1x8x128xf32> to vector<8x128xf32>
    %91 = vector.shape_cast %87 : vector<8x128xf32> to vector<1x8x128xf32>
    tpu.vector_store %arg6[%88, %c0_37, %c0_38], %91 {strides = array<i32>} : memref<8x8x128xf32, #tpu.memory_space<vmem>>, vector<1x8x128xf32>,
    %c3_i32 = arith.constant 3 : i32
    %92 = arith.index_cast %c3_i32 : i32 to index
    %c0_39 = arith.constant 0 : index
    %c0_40 = arith.constant 0 : index
    %93 = vector.load %arg9[%92, %c0_39, %c0_40] : memref<8x8x512xf32, #tpu.memory_space<vmem>>, vector<1x8x512xf32>
    %94 = vector.shape_cast %93 : vector<1x8x512xf32> to vector<8x512xf32>
    %c0_41 = arith.constant 0 : index
    %c0_42 = arith.constant 0 : index
    %95 = vector.load %arg5[%c0_41, %c0_42] : memref<128x512xf32, #tpu.memory_space<vmem>>, vector<128x512xf32>
    %cst_43 = arith.constant dense<0.000000e+00> : vector<8x512xf32>
    %96 = tpu.matmul %87, %95, %cst_43 {dimension_numbers = #tpu.dot_dimension_numbers<[1], [0], [0], [1], [0, 0, 1, 1], [], []>} : vector<8x128xf32>, vector<128x512xf32>, vector<8x512xf32> -> vector<8x512xf32>
    %97 = arith.addf %94, %96 : vector<8x512xf32>
    %98 = vector.extract_strided_slice %97 {offsets = [0, 0], sizes = [8, 384], strides = [1, 1]} : vector<8x512xf32> to vector<8x384xf32>
    %99 = arith.negf %98 : vector<8x384xf32>
    %100 = math.exp %99 : vector<8x384xf32>
    %cst_44 = arith.constant 1.000000e+00 : f32
    %101 = vector.broadcast %cst_44 : f32 to vector<8x384xf32>
    %102 = arith.addf %101, %100 : vector<8x384xf32>
    %103 = arith.divf %101, %102 : vector<8x384xf32>
    %104 = vector.extract_strided_slice %97 {offsets = [0, 384], sizes = [8, 128], strides = [1, 1]} : vector<8x512xf32> to vector<8x128xf32>
    %105 = math.tanh %104 : vector<8x128xf32>
    %106 = vector.extract_strided_slice %103 {offsets = [0, 128], sizes = [8, 128], strides = [1, 1]} : vector<8x384xf32> to vector<8x128xf32>
    %107 = arith.mulf %106, %84 : vector<8x128xf32>
    %108 = vector.extract_strided_slice %103 {offsets = [0, 0], sizes = [8, 128], strides = [1, 1]} : vector<8x384xf32> to vector<8x128xf32>
    %109 = arith.mulf %108, %105 : vector<8x128xf32>
    %110 = arith.addf %107, %109 : vector<8x128xf32>
    %111 = vector.extract_strided_slice %103 {offsets = [0, 256], sizes = [8, 128], strides = [1, 1]} : vector<8x384xf32> to vector<8x128xf32>
    %112 = math.tanh %110 : vector<8x128xf32>
    %113 = arith.mulf %111, %112 : vector<8x128xf32>
    %114 = arith.index_cast %c3_i32 : i32 to index
    %c0_45 = arith.constant 0 : index
    %c0_46 = arith.constant 0 : index
    %115 = vector.load %arg6[%114, %c0_45, %c0_46] : memref<8x8x128xf32, #tpu.memory_space<vmem>>, vector<1x8x128xf32>
    %116 = vector.shape_cast %115 : vector<1x8x128xf32> to vector<8x128xf32>
    %117 = vector.shape_cast %113 : vector<8x128xf32> to vector<1x8x128xf32>
    tpu.vector_store %arg6[%114, %c0_45, %c0_46], %117 {strides = array<i32>} : memref<8x8x128xf32, #tpu.memory_space<vmem>>, vector<1x8x128xf32>,
    %c4_i32 = arith.constant 4 : i32
    %118 = arith.index_cast %c4_i32 : i32 to index
    %c0_47 = arith.constant 0 : index
    %c0_48 = arith.constant 0 : index
    %119 = vector.load %arg9[%118, %c0_47, %c0_48] : memref<8x8x512xf32, #tpu.memory_space<vmem>>, vector<1x8x512xf32>
    %120 = vector.shape_cast %119 : vector<1x8x512xf32> to vector<8x512xf32>
    %c0_49 = arith.constant 0 : index
    %c0_50 = arith.constant 0 : index
    %121 = vector.load %arg5[%c0_49, %c0_50] : memref<128x512xf32, #tpu.memory_space<vmem>>, vector<128x512xf32>
    %cst_51 = arith.constant dense<0.000000e+00> : vector<8x512xf32>
    %122 = tpu.matmul %113, %121, %cst_51 {dimension_numbers = #tpu.dot_dimension_numbers<[1], [0], [0], [1], [0, 0, 1, 1], [], []>} : vector<8x128xf32>, vector<128x512xf32>, vector<8x512xf32> -> vector<8x512xf32>
    %123 = arith.addf %120, %122 : vector<8x512xf32>
    %124 = vector.extract_strided_slice %123 {offsets = [0, 0], sizes = [8, 384], strides = [1, 1]} : vector<8x512xf32> to vector<8x384xf32>
    %125 = arith.negf %124 : vector<8x384xf32>
    %126 = math.exp %125 : vector<8x384xf32>
    %cst_52 = arith.constant 1.000000e+00 : f32
    %127 = vector.broadcast %cst_52 : f32 to vector<8x384xf32>
    %128 = arith.addf %127, %126 : vector<8x384xf32>
    %129 = arith.divf %127, %128 : vector<8x384xf32>
    %130 = vector.extract_strided_slice %123 {offsets = [0, 384], sizes = [8, 128], strides = [1, 1]} : vector<8x512xf32> to vector<8x128xf32>
    %131 = math.tanh %130 : vector<8x128xf32>
    %132 = vector.extract_strided_slice %129 {offsets = [0, 128], sizes = [8, 128], strides = [1, 1]} : vector<8x384xf32> to vector<8x128xf32>
    %133 = arith.mulf %132, %110 : vector<8x128xf32>
    %134 = vector.extract_strided_slice %129 {offsets = [0, 0], sizes = [8, 128], strides = [1, 1]} : vector<8x384xf32> to vector<8x128xf32>
    %135 = arith.mulf %134, %131 : vector<8x128xf32>
    %136 = arith.addf %133, %135 : vector<8x128xf32>
    %137 = vector.extract_strided_slice %129 {offsets = [0, 256], sizes = [8, 128], strides = [1, 1]} : vector<8x384xf32> to vector<8x128xf32>
    %138 = math.tanh %136 : vector<8x128xf32>
    %139 = arith.mulf %137, %138 : vector<8x128xf32>
    %140 = arith.index_cast %c4_i32 : i32 to index
    %c0_53 = arith.constant 0 : index
    %c0_54 = arith.constant 0 : index
    %141 = vector.load %arg6[%140, %c0_53, %c0_54] : memref<8x8x128xf32, #tpu.memory_space<vmem>>, vector<1x8x128xf32>
    %142 = vector.shape_cast %141 : vector<1x8x128xf32> to vector<8x128xf32>
    %143 = vector.shape_cast %139 : vector<8x128xf32> to vector<1x8x128xf32>
    tpu.vector_store %arg6[%140, %c0_53, %c0_54], %143 {strides = array<i32>} : memref<8x8x128xf32, #tpu.memory_space<vmem>>, vector<1x8x128xf32>,
    %c5_i32 = arith.constant 5 : i32
    %144 = arith.index_cast %c5_i32 : i32 to index
    %c0_55 = arith.constant 0 : index
    %c0_56 = arith.constant 0 : index
    %145 = vector.load %arg9[%144, %c0_55, %c0_56] : memref<8x8x512xf32, #tpu.memory_space<vmem>>, vector<1x8x512xf32>
    %146 = vector.shape_cast %145 : vector<1x8x512xf32> to vector<8x512xf32>
    %c0_57 = arith.constant 0 : index
    %c0_58 = arith.constant 0 : index
    %147 = vector.load %arg5[%c0_57, %c0_58] : memref<128x512xf32, #tpu.memory_space<vmem>>, vector<128x512xf32>
    %cst_59 = arith.constant dense<0.000000e+00> : vector<8x512xf32>
    %148 = tpu.matmul %139, %147, %cst_59 {dimension_numbers = #tpu.dot_dimension_numbers<[1], [0], [0], [1], [0, 0, 1, 1], [], []>} : vector<8x128xf32>, vector<128x512xf32>, vector<8x512xf32> -> vector<8x512xf32>
    %149 = arith.addf %146, %148 : vector<8x512xf32>
    %150 = vector.extract_strided_slice %149 {offsets = [0, 0], sizes = [8, 384], strides = [1, 1]} : vector<8x512xf32> to vector<8x384xf32>
    %151 = arith.negf %150 : vector<8x384xf32>
    %152 = math.exp %151 : vector<8x384xf32>
    %cst_60 = arith.constant 1.000000e+00 : f32
    %153 = vector.broadcast %cst_60 : f32 to vector<8x384xf32>
    %154 = arith.addf %153, %152 : vector<8x384xf32>
    %155 = arith.divf %153, %154 : vector<8x384xf32>
    %156 = vector.extract_strided_slice %149 {offsets = [0, 384], sizes = [8, 128], strides = [1, 1]} : vector<8x512xf32> to vector<8x128xf32>
    %157 = math.tanh %156 : vector<8x128xf32>
    %158 = vector.extract_strided_slice %155 {offsets = [0, 128], sizes = [8, 128], strides = [1, 1]} : vector<8x384xf32> to vector<8x128xf32>
    %159 = arith.mulf %158, %136 : vector<8x128xf32>
    %160 = vector.extract_strided_slice %155 {offsets = [0, 0], sizes = [8, 128], strides = [1, 1]} : vector<8x384xf32> to vector<8x128xf32>
    %161 = arith.mulf %160, %157 : vector<8x128xf32>
    %162 = arith.addf %159, %161 : vector<8x128xf32>
    %163 = vector.extract_strided_slice %155 {offsets = [0, 256], sizes = [8, 128], strides = [1, 1]} : vector<8x384xf32> to vector<8x128xf32>
    %164 = math.tanh %162 : vector<8x128xf32>
    %165 = arith.mulf %163, %164 : vector<8x128xf32>
    %166 = arith.index_cast %c5_i32 : i32 to index
    %c0_61 = arith.constant 0 : index
    %c0_62 = arith.constant 0 : index
    %167 = vector.load %arg6[%166, %c0_61, %c0_62] : memref<8x8x128xf32, #tpu.memory_space<vmem>>, vector<1x8x128xf32>
    %168 = vector.shape_cast %167 : vector<1x8x128xf32> to vector<8x128xf32>
    %169 = vector.shape_cast %165 : vector<8x128xf32> to vector<1x8x128xf32>
    tpu.vector_store %arg6[%166, %c0_61, %c0_62], %169 {strides = array<i32>} : memref<8x8x128xf32, #tpu.memory_space<vmem>>, vector<1x8x128xf32>,
    %c6_i32 = arith.constant 6 : i32
    %170 = arith.index_cast %c6_i32 : i32 to index
    %c0_63 = arith.constant 0 : index
    %c0_64 = arith.constant 0 : index
    %171 = vector.load %arg9[%170, %c0_63, %c0_64] : memref<8x8x512xf32, #tpu.memory_space<vmem>>, vector<1x8x512xf32>
    %172 = vector.shape_cast %171 : vector<1x8x512xf32> to vector<8x512xf32>
    %c0_65 = arith.constant 0 : index
    %c0_66 = arith.constant 0 : index
    %173 = vector.load %arg5[%c0_65, %c0_66] : memref<128x512xf32, #tpu.memory_space<vmem>>, vector<128x512xf32>
    %cst_67 = arith.constant dense<0.000000e+00> : vector<8x512xf32>
    %174 = tpu.matmul %165, %173, %cst_67 {dimension_numbers = #tpu.dot_dimension_numbers<[1], [0], [0], [1], [0, 0, 1, 1], [], []>} : vector<8x128xf32>, vector<128x512xf32>, vector<8x512xf32> -> vector<8x512xf32>
    %175 = arith.addf %172, %174 : vector<8x512xf32>
    %176 = vector.extract_strided_slice %175 {offsets = [0, 0], sizes = [8, 384], strides = [1, 1]} : vector<8x512xf32> to vector<8x384xf32>
    %177 = arith.negf %176 : vector<8x384xf32>
    %178 = math.exp %177 : vector<8x384xf32>
    %cst_68 = arith.constant 1.000000e+00 : f32
    %179 = vector.broadcast %cst_68 : f32 to vector<8x384xf32>
    %180 = arith.addf %179, %178 : vector<8x384xf32>
    %181 = arith.divf %179, %180 : vector<8x384xf32>
    %182 = vector.extract_strided_slice %175 {offsets = [0, 384], sizes = [8, 128], strides = [1, 1]} : vector<8x512xf32> to vector<8x128xf32>
    %183 = math.tanh %182 : vector<8x128xf32>
    %184 = vector.extract_strided_slice %181 {offsets = [0, 128], sizes = [8, 128], strides = [1, 1]} : vector<8x384xf32> to vector<8x128xf32>
    %185 = arith.mulf %184, %162 : vector<8x128xf32>
    %186 = vector.extract_strided_slice %181 {offsets = [0, 0], sizes = [8, 128], strides = [1, 1]} : vector<8x384xf32> to vector<8x128xf32>
    %187 = arith.mulf %186, %183 : vector<8x128xf32>
    %188 = arith.addf %185, %187 : vector<8x128xf32>
    %189 = vector.extract_strided_slice %181 {offsets = [0, 256], sizes = [8, 128], strides = [1, 1]} : vector<8x384xf32> to vector<8x128xf32>
    %190 = math.tanh %188 : vector<8x128xf32>
    %191 = arith.mulf %189, %190 : vector<8x128xf32>
    %192 = arith.index_cast %c6_i32 : i32 to index
    %c0_69 = arith.constant 0 : index
    %c0_70 = arith.constant 0 : index
    %193 = vector.load %arg6[%192, %c0_69, %c0_70] : memref<8x8x128xf32, #tpu.memory_space<vmem>>, vector<1x8x128xf32>
    %194 = vector.shape_cast %193 : vector<1x8x128xf32> to vector<8x128xf32>
    %195 = vector.shape_cast %191 : vector<8x128xf32> to vector<1x8x128xf32>
    tpu.vector_store %arg6[%192, %c0_69, %c0_70], %195 {strides = array<i32>} : memref<8x8x128xf32, #tpu.memory_space<vmem>>, vector<1x8x128xf32>,
    %c7_i32 = arith.constant 7 : i32
    %196 = arith.index_cast %c7_i32 : i32 to index
    %c0_71 = arith.constant 0 : index
    %c0_72 = arith.constant 0 : index
    %197 = vector.load %arg9[%196, %c0_71, %c0_72] : memref<8x8x512xf32, #tpu.memory_space<vmem>>, vector<1x8x512xf32>
    %198 = vector.shape_cast %197 : vector<1x8x512xf32> to vector<8x512xf32>
    %c0_73 = arith.constant 0 : index
    %c0_74 = arith.constant 0 : index
    %199 = vector.load %arg5[%c0_73, %c0_74] : memref<128x512xf32, #tpu.memory_space<vmem>>, vector<128x512xf32>
    %cst_75 = arith.constant dense<0.000000e+00> : vector<8x512xf32>
    %200 = tpu.matmul %191, %199, %cst_75 {dimension_numbers = #tpu.dot_dimension_numbers<[1], [0], [0], [1], [0, 0, 1, 1], [], []>} : vector<8x128xf32>, vector<128x512xf32>, vector<8x512xf32> -> vector<8x512xf32>
    %201 = arith.addf %198, %200 : vector<8x512xf32>
    %202 = vector.extract_strided_slice %201 {offsets = [0, 0], sizes = [8, 384], strides = [1, 1]} : vector<8x512xf32> to vector<8x384xf32>
    %203 = arith.negf %202 : vector<8x384xf32>
    %204 = math.exp %203 : vector<8x384xf32>
    %cst_76 = arith.constant 1.000000e+00 : f32
    %205 = vector.broadcast %cst_76 : f32 to vector<8x384xf32>
    %206 = arith.addf %205, %204 : vector<8x384xf32>
    %207 = arith.divf %205, %206 : vector<8x384xf32>
    %208 = vector.extract_strided_slice %201 {offsets = [0, 384], sizes = [8, 128], strides = [1, 1]} : vector<8x512xf32> to vector<8x128xf32>
    %209 = math.tanh %208 : vector<8x128xf32>
    %210 = vector.extract_strided_slice %207 {offsets = [0, 128], sizes = [8, 128], strides = [1, 1]} : vector<8x384xf32> to vector<8x128xf32>
    %211 = arith.mulf %210, %188 : vector<8x128xf32>
    %212 = vector.extract_strided_slice %207 {offsets = [0, 0], sizes = [8, 128], strides = [1, 1]} : vector<8x384xf32> to vector<8x128xf32>
    %213 = arith.mulf %212, %209 : vector<8x128xf32>
    %214 = arith.addf %211, %213 : vector<8x128xf32>
    %215 = vector.extract_strided_slice %207 {offsets = [0, 256], sizes = [8, 128], strides = [1, 1]} : vector<8x384xf32> to vector<8x128xf32>
    %216 = math.tanh %214 : vector<8x128xf32>
    %217 = arith.mulf %215, %216 : vector<8x128xf32>
    %218 = arith.index_cast %c7_i32 : i32 to index
    %c0_77 = arith.constant 0 : index
    %c0_78 = arith.constant 0 : index
    %219 = vector.load %arg6[%218, %c0_77, %c0_78] : memref<8x8x128xf32, #tpu.memory_space<vmem>>, vector<1x8x128xf32>
    %220 = vector.shape_cast %219 : vector<1x8x128xf32> to vector<8x128xf32>
    %221 = vector.shape_cast %217 : vector<8x128xf32> to vector<1x8x128xf32>
    tpu.vector_store %arg6[%218, %c0_77, %c0_78], %221 {strides = array<i32>} : memref<8x8x128xf32, #tpu.memory_space<vmem>>, vector<1x8x128xf32>,
    %c8_i32 = arith.constant 8 : i32
    %c0_79 = arith.constant 0 : index
    %c0_80 = arith.constant 0 : index
    %222 = vector.load %arg7[%c0_79, %c0_80] : memref<8x128xf32, #tpu.memory_space<vmem>>, vector<8x128xf32>
    tpu.vector_store %arg7[%c0_79, %c0_80], %217 {strides = array<i32>} : memref<8x128xf32, #tpu.memory_space<vmem>>, vector<8x128xf32>,
    %c0_81 = arith.constant 0 : index
    %c0_82 = arith.constant 0 : index
    %223 = vector.load %arg8[%c0_81, %c0_82] : memref<8x128xf32, #tpu.memory_space<vmem>>, vector<8x128xf32>
    tpu.vector_store %arg8[%c0_81, %c0_82], %214 {strides = array<i32>} : memref<8x128xf32, #tpu.memory_space<vmem>>, vector<8x128xf32>,
    return
  }
  func.func @transform_0(%arg0: i32, %arg1: i32) -> (i32, i32, i32) {
    %c0_i32 = arith.constant 0 : i32
    %c0_i32_0 = arith.constant 0 : i32
    return %arg1, %arg0, %c0_i32 : i32, i32, i32
  }
  func.func @transform_1(%arg0: i32, %arg1: i32) -> (i32, i32) {
    %c0_i32 = arith.constant 0 : i32
    %c0_i32_0 = arith.constant 0 : i32
    %c0_i32_1 = arith.constant 0 : i32
    return %c0_i32, %c0_i32_0 : i32, i32
  }
  func.func @transform_2(%arg0: i32, %arg1: i32) -> (i32, i32) {
    %c0_i32 = arith.constant 0 : i32
    %c0_i32_0 = arith.constant 0 : i32
    %c0_i32_1 = arith.constant 0 : i32
    return %c0_i32, %c0_i32_0 : i32, i32
  }
  func.func @transform_3(%arg0: i32, %arg1: i32) -> (i32, i32) {
    %c0_i32 = arith.constant 0 : i32
    %c0_i32_0 = arith.constant 0 : i32
    %c0_i32_1 = arith.constant 0 : i32
    return %c0_i32, %c0_i32_0 : i32, i32
  }
  func.func @transform_4(%arg0: i32, %arg1: i32) -> (i32, i32, i32) {
    %c0_i32 = arith.constant 0 : i32
    %c0_i32_0 = arith.constant 0 : i32
    return %arg1, %arg0, %c0_i32 : i32, i32, i32
  }
}

module attributes {stable_mosaic.version = 11 : i64} {
  func.func @lstm_layer_fc_kernel(%arg0: i32, %arg1: i32, %arg2: memref<8x8x128xf32, #tpu.memory_space<vmem>>, %arg3: memref<128x512xf32, #tpu.memory_space<vmem>>, %arg4: memref<1x512xf32, #tpu.memory_space<vmem>>, %arg5: memref<128x512xf32, #tpu.memory_space<vmem>>, %arg6: memref<128x128xf32, #tpu.memory_space<vmem>>, %arg7: memref<1x128xf32, #tpu.memory_space<vmem>>, %arg8: memref<8x128xf32, #tpu.memory_space<vmem>>, %arg9: memref<8x128xf32, #tpu.memory_space<vmem>>, %arg10: memref<8x128xf32, #tpu.memory_space<vmem>>, %arg11: memref<8x8x512xf32, #tpu.memory_space<vmem>>) attributes {dimension_semantics = [#tpu.dimension_semantics<parallel>, #tpu.dimension_semantics<arbitrary>], iteration_bounds = array<i64: 1, 1>, scalar_prefetch = 0 : i64, scratch_operands = 3 : i64, tpu.core_type = #tpu.core_type<tc>, window_params = [{transform_indices = @transform_0, window_bounds = array<i64: 8, 8, 128>}, {pipeline_mode = #tpu.pipeline_mode<synchronous>, transform_indices = @transform_1, window_bounds = array<i64: 128, 512>}, {pipeline_mode = #tpu.pipeline_mode<synchronous>, transform_indices = @transform_2, window_bounds = array<i64: 1, 512>}, {pipeline_mode = #tpu.pipeline_mode<synchronous>, transform_indices = @transform_3, window_bounds = array<i64: 128, 512>}, {pipeline_mode = #tpu.pipeline_mode<synchronous>, transform_indices = @transform_4, window_bounds = array<i64: 128, 128>}, {pipeline_mode = #tpu.pipeline_mode<synchronous>, transform_indices = @transform_5, window_bounds = array<i64: 1, 128>}, {transform_indices = @transform_6, window_bounds = array<i64: 8, 128>}]} {
    %c0_i32 = arith.constant 0 : i32
    %0 = arith.cmpi eq, %arg1, %c0_i32 : i32
    %1 = arith.extui %0 : i1 to i32
    %c0_i32_0 = arith.constant 0 : i32
    %2 = arith.cmpi ne, %1, %c0_i32_0 : i32
    scf.if %2 {
      %cst_69 = arith.constant 0.000000e+00 : f32
      %195 = vector.broadcast %cst_69 : f32 to vector<8x128xf32>
      %c0_70 = arith.constant 0 : index
      %c0_71 = arith.constant 0 : index
      %196 = vector.load %arg9[%c0_70, %c0_71] : memref<8x128xf32, #tpu.memory_space<vmem>>, vector<8x128xf32>
      tpu.vector_store %arg9[%c0_70, %c0_71], %195 {strides = array<i32>} : memref<8x128xf32, #tpu.memory_space<vmem>>, vector<8x128xf32>,
      %cst_72 = arith.constant 0.000000e+00 : f32
      %197 = vector.broadcast %cst_72 : f32 to vector<8x128xf32>
      %c0_73 = arith.constant 0 : index
      %c0_74 = arith.constant 0 : index
      %198 = vector.load %arg10[%c0_73, %c0_74] : memref<8x128xf32, #tpu.memory_space<vmem>>, vector<8x128xf32>
      tpu.vector_store %arg10[%c0_73, %c0_74], %197 {strides = array<i32>} : memref<8x128xf32, #tpu.memory_space<vmem>>, vector<8x128xf32>,
    } else {
    }
    %c0 = arith.constant 0 : index
    %c0_1 = arith.constant 0 : index
    %c0_2 = arith.constant 0 : index
    %3 = vector.load %arg2[%c0, %c0_1, %c0_2] : memref<8x8x128xf32, #tpu.memory_space<vmem>>, vector<8x8x128xf32>
    %4 = vector.shape_cast %3 : vector<8x8x128xf32> to vector<64x128xf32>
    %c0_3 = arith.constant 0 : index
    %c0_4 = arith.constant 0 : index
    %5 = vector.load %arg3[%c0_3, %c0_4] : memref<128x512xf32, #tpu.memory_space<vmem>>, vector<128x512xf32>
    %cst = arith.constant dense<0.000000e+00> : vector<64x512xf32>
    %6 = tpu.matmul %4, %5, %cst {dimension_numbers = #tpu.dot_dimension_numbers<[1], [0], [0], [1], [0, 0, 1, 1], [], []>} : vector<64x128xf32>, vector<128x512xf32>, vector<64x512xf32> -> vector<64x512xf32>
    %c0_5 = arith.constant 0 : index
    %c0_6 = arith.constant 0 : index
    %7 = vector.load %arg4[%c0_5, %c0_6] : memref<1x512xf32, #tpu.memory_space<vmem>>, vector<1x512xf32>
    %8 = vector.broadcast %7 : vector<1x512xf32> to vector<64x512xf32>
    %9 = arith.addf %6, %8 : vector<64x512xf32>
    %10 = vector.shape_cast %9 : vector<64x512xf32> to vector<8x8x512xf32>
    %c0_7 = arith.constant 0 : index
    %c0_8 = arith.constant 0 : index
    %c0_9 = arith.constant 0 : index
    %11 = vector.load %arg11[%c0_7, %c0_8, %c0_9] : memref<8x8x512xf32, #tpu.memory_space<vmem>>, vector<8x8x512xf32>
    tpu.vector_store %arg11[%c0_7, %c0_8, %c0_9], %10 {strides = array<i32>} : memref<8x8x512xf32, #tpu.memory_space<vmem>>, vector<8x8x512xf32>,
    %c0_10 = arith.constant 0 : index
    %c0_11 = arith.constant 0 : index
    %12 = vector.load %arg9[%c0_10, %c0_11] : memref<8x128xf32, #tpu.memory_space<vmem>>, vector<8x128xf32>
    %c0_12 = arith.constant 0 : index
    %c0_13 = arith.constant 0 : index
    %13 = vector.load %arg10[%c0_12, %c0_13] : memref<8x128xf32, #tpu.memory_space<vmem>>, vector<8x128xf32>
    %c0_i32_14 = arith.constant 0 : i32
    %14 = arith.index_cast %c0_i32_14 : i32 to index
    %c0_15 = arith.constant 0 : index
    %c0_16 = arith.constant 0 : index
    %15 = vector.load %arg11[%14, %c0_15, %c0_16] : memref<8x8x512xf32, #tpu.memory_space<vmem>>, vector<1x8x512xf32>
    %16 = vector.shape_cast %15 : vector<1x8x512xf32> to vector<8x512xf32>
    %c0_17 = arith.constant 0 : index
    %c0_18 = arith.constant 0 : index
    %17 = vector.load %arg5[%c0_17, %c0_18] : memref<128x512xf32, #tpu.memory_space<vmem>>, vector<128x512xf32>
    %cst_19 = arith.constant dense<0.000000e+00> : vector<8x512xf32>
    %18 = tpu.matmul %12, %17, %cst_19 {dimension_numbers = #tpu.dot_dimension_numbers<[1], [0], [0], [1], [0, 0, 1, 1], [], []>} : vector<8x128xf32>, vector<128x512xf32>, vector<8x512xf32> -> vector<8x512xf32>
    %19 = arith.addf %16, %18 : vector<8x512xf32>
    %20 = vector.extract_strided_slice %19 {offsets = [0, 0], sizes = [8, 384], strides = [1, 1]} : vector<8x512xf32> to vector<8x384xf32>
    %21 = arith.negf %20 : vector<8x384xf32>
    %22 = math.exp %21 : vector<8x384xf32>
    %cst_20 = arith.constant 1.000000e+00 : f32
    %23 = vector.broadcast %cst_20 : f32 to vector<8x384xf32>
    %24 = arith.addf %23, %22 : vector<8x384xf32>
    %25 = arith.divf %23, %24 : vector<8x384xf32>
    %26 = vector.extract_strided_slice %19 {offsets = [0, 384], sizes = [8, 128], strides = [1, 1]} : vector<8x512xf32> to vector<8x128xf32>
    %27 = math.tanh %26 : vector<8x128xf32>
    %28 = vector.extract_strided_slice %25 {offsets = [0, 128], sizes = [8, 128], strides = [1, 1]} : vector<8x384xf32> to vector<8x128xf32>
    %29 = arith.mulf %28, %13 : vector<8x128xf32>
    %30 = vector.extract_strided_slice %25 {offsets = [0, 0], sizes = [8, 128], strides = [1, 1]} : vector<8x384xf32> to vector<8x128xf32>
    %31 = arith.mulf %30, %27 : vector<8x128xf32>
    %32 = arith.addf %29, %31 : vector<8x128xf32>
    %33 = vector.extract_strided_slice %25 {offsets = [0, 256], sizes = [8, 128], strides = [1, 1]} : vector<8x384xf32> to vector<8x128xf32>
    %34 = math.tanh %32 : vector<8x128xf32>
    %35 = arith.mulf %33, %34 : vector<8x128xf32>
    %c1_i32 = arith.constant 1 : i32
    %36 = arith.index_cast %c1_i32 : i32 to index
    %c0_21 = arith.constant 0 : index
    %c0_22 = arith.constant 0 : index
    %37 = vector.load %arg11[%36, %c0_21, %c0_22] : memref<8x8x512xf32, #tpu.memory_space<vmem>>, vector<1x8x512xf32>
    %38 = vector.shape_cast %37 : vector<1x8x512xf32> to vector<8x512xf32>
    %c0_23 = arith.constant 0 : index
    %c0_24 = arith.constant 0 : index
    %39 = vector.load %arg5[%c0_23, %c0_24] : memref<128x512xf32, #tpu.memory_space<vmem>>, vector<128x512xf32>
    %cst_25 = arith.constant dense<0.000000e+00> : vector<8x512xf32>
    %40 = tpu.matmul %35, %39, %cst_25 {dimension_numbers = #tpu.dot_dimension_numbers<[1], [0], [0], [1], [0, 0, 1, 1], [], []>} : vector<8x128xf32>, vector<128x512xf32>, vector<8x512xf32> -> vector<8x512xf32>
    %41 = arith.addf %38, %40 : vector<8x512xf32>
    %42 = vector.extract_strided_slice %41 {offsets = [0, 0], sizes = [8, 384], strides = [1, 1]} : vector<8x512xf32> to vector<8x384xf32>
    %43 = arith.negf %42 : vector<8x384xf32>
    %44 = math.exp %43 : vector<8x384xf32>
    %cst_26 = arith.constant 1.000000e+00 : f32
    %45 = vector.broadcast %cst_26 : f32 to vector<8x384xf32>
    %46 = arith.addf %45, %44 : vector<8x384xf32>
    %47 = arith.divf %45, %46 : vector<8x384xf32>
    %48 = vector.extract_strided_slice %41 {offsets = [0, 384], sizes = [8, 128], strides = [1, 1]} : vector<8x512xf32> to vector<8x128xf32>
    %49 = math.tanh %48 : vector<8x128xf32>
    %50 = vector.extract_strided_slice %47 {offsets = [0, 128], sizes = [8, 128], strides = [1, 1]} : vector<8x384xf32> to vector<8x128xf32>
    %51 = arith.mulf %50, %32 : vector<8x128xf32>
    %52 = vector.extract_strided_slice %47 {offsets = [0, 0], sizes = [8, 128], strides = [1, 1]} : vector<8x384xf32> to vector<8x128xf32>
    %53 = arith.mulf %52, %49 : vector<8x128xf32>
    %54 = arith.addf %51, %53 : vector<8x128xf32>
    %55 = vector.extract_strided_slice %47 {offsets = [0, 256], sizes = [8, 128], strides = [1, 1]} : vector<8x384xf32> to vector<8x128xf32>
    %56 = math.tanh %54 : vector<8x128xf32>
    %57 = arith.mulf %55, %56 : vector<8x128xf32>
    %c2_i32 = arith.constant 2 : i32
    %58 = arith.index_cast %c2_i32 : i32 to index
    %c0_27 = arith.constant 0 : index
    %c0_28 = arith.constant 0 : index
    %59 = vector.load %arg11[%58, %c0_27, %c0_28] : memref<8x8x512xf32, #tpu.memory_space<vmem>>, vector<1x8x512xf32>
    %60 = vector.shape_cast %59 : vector<1x8x512xf32> to vector<8x512xf32>
    %c0_29 = arith.constant 0 : index
    %c0_30 = arith.constant 0 : index
    %61 = vector.load %arg5[%c0_29, %c0_30] : memref<128x512xf32, #tpu.memory_space<vmem>>, vector<128x512xf32>
    %cst_31 = arith.constant dense<0.000000e+00> : vector<8x512xf32>
    %62 = tpu.matmul %57, %61, %cst_31 {dimension_numbers = #tpu.dot_dimension_numbers<[1], [0], [0], [1], [0, 0, 1, 1], [], []>} : vector<8x128xf32>, vector<128x512xf32>, vector<8x512xf32> -> vector<8x512xf32>
    %63 = arith.addf %60, %62 : vector<8x512xf32>
    %64 = vector.extract_strided_slice %63 {offsets = [0, 0], sizes = [8, 384], strides = [1, 1]} : vector<8x512xf32> to vector<8x384xf32>
    %65 = arith.negf %64 : vector<8x384xf32>
    %66 = math.exp %65 : vector<8x384xf32>
    %cst_32 = arith.constant 1.000000e+00 : f32
    %67 = vector.broadcast %cst_32 : f32 to vector<8x384xf32>
    %68 = arith.addf %67, %66 : vector<8x384xf32>
    %69 = arith.divf %67, %68 : vector<8x384xf32>
    %70 = vector.extract_strided_slice %63 {offsets = [0, 384], sizes = [8, 128], strides = [1, 1]} : vector<8x512xf32> to vector<8x128xf32>
    %71 = math.tanh %70 : vector<8x128xf32>
    %72 = vector.extract_strided_slice %69 {offsets = [0, 128], sizes = [8, 128], strides = [1, 1]} : vector<8x384xf32> to vector<8x128xf32>
    %73 = arith.mulf %72, %54 : vector<8x128xf32>
    %74 = vector.extract_strided_slice %69 {offsets = [0, 0], sizes = [8, 128], strides = [1, 1]} : vector<8x384xf32> to vector<8x128xf32>
    %75 = arith.mulf %74, %71 : vector<8x128xf32>
    %76 = arith.addf %73, %75 : vector<8x128xf32>
    %77 = vector.extract_strided_slice %69 {offsets = [0, 256], sizes = [8, 128], strides = [1, 1]} : vector<8x384xf32> to vector<8x128xf32>
    %78 = math.tanh %76 : vector<8x128xf32>
    %79 = arith.mulf %77, %78 : vector<8x128xf32>
    %c3_i32 = arith.constant 3 : i32
    %80 = arith.index_cast %c3_i32 : i32 to index
    %c0_33 = arith.constant 0 : index
    %c0_34 = arith.constant 0 : index
    %81 = vector.load %arg11[%80, %c0_33, %c0_34] : memref<8x8x512xf32, #tpu.memory_space<vmem>>, vector<1x8x512xf32>
    %82 = vector.shape_cast %81 : vector<1x8x512xf32> to vector<8x512xf32>
    %c0_35 = arith.constant 0 : index
    %c0_36 = arith.constant 0 : index
    %83 = vector.load %arg5[%c0_35, %c0_36] : memref<128x512xf32, #tpu.memory_space<vmem>>, vector<128x512xf32>
    %cst_37 = arith.constant dense<0.000000e+00> : vector<8x512xf32>
    %84 = tpu.matmul %79, %83, %cst_37 {dimension_numbers = #tpu.dot_dimension_numbers<[1], [0], [0], [1], [0, 0, 1, 1], [], []>} : vector<8x128xf32>, vector<128x512xf32>, vector<8x512xf32> -> vector<8x512xf32>
    %85 = arith.addf %82, %84 : vector<8x512xf32>
    %86 = vector.extract_strided_slice %85 {offsets = [0, 0], sizes = [8, 384], strides = [1, 1]} : vector<8x512xf32> to vector<8x384xf32>
    %87 = arith.negf %86 : vector<8x384xf32>
    %88 = math.exp %87 : vector<8x384xf32>
    %cst_38 = arith.constant 1.000000e+00 : f32
    %89 = vector.broadcast %cst_38 : f32 to vector<8x384xf32>
    %90 = arith.addf %89, %88 : vector<8x384xf32>
    %91 = arith.divf %89, %90 : vector<8x384xf32>
    %92 = vector.extract_strided_slice %85 {offsets = [0, 384], sizes = [8, 128], strides = [1, 1]} : vector<8x512xf32> to vector<8x128xf32>
    %93 = math.tanh %92 : vector<8x128xf32>
    %94 = vector.extract_strided_slice %91 {offsets = [0, 128], sizes = [8, 128], strides = [1, 1]} : vector<8x384xf32> to vector<8x128xf32>
    %95 = arith.mulf %94, %76 : vector<8x128xf32>
    %96 = vector.extract_strided_slice %91 {offsets = [0, 0], sizes = [8, 128], strides = [1, 1]} : vector<8x384xf32> to vector<8x128xf32>
    %97 = arith.mulf %96, %93 : vector<8x128xf32>
    %98 = arith.addf %95, %97 : vector<8x128xf32>
    %99 = vector.extract_strided_slice %91 {offsets = [0, 256], sizes = [8, 128], strides = [1, 1]} : vector<8x384xf32> to vector<8x128xf32>
    %100 = math.tanh %98 : vector<8x128xf32>
    %101 = arith.mulf %99, %100 : vector<8x128xf32>
    %c4_i32 = arith.constant 4 : i32
    %102 = arith.index_cast %c4_i32 : i32 to index
    %c0_39 = arith.constant 0 : index
    %c0_40 = arith.constant 0 : index
    %103 = vector.load %arg11[%102, %c0_39, %c0_40] : memref<8x8x512xf32, #tpu.memory_space<vmem>>, vector<1x8x512xf32>
    %104 = vector.shape_cast %103 : vector<1x8x512xf32> to vector<8x512xf32>
    %c0_41 = arith.constant 0 : index
    %c0_42 = arith.constant 0 : index
    %105 = vector.load %arg5[%c0_41, %c0_42] : memref<128x512xf32, #tpu.memory_space<vmem>>, vector<128x512xf32>
    %cst_43 = arith.constant dense<0.000000e+00> : vector<8x512xf32>
    %106 = tpu.matmul %101, %105, %cst_43 {dimension_numbers = #tpu.dot_dimension_numbers<[1], [0], [0], [1], [0, 0, 1, 1], [], []>} : vector<8x128xf32>, vector<128x512xf32>, vector<8x512xf32> -> vector<8x512xf32>
    %107 = arith.addf %104, %106 : vector<8x512xf32>
    %108 = vector.extract_strided_slice %107 {offsets = [0, 0], sizes = [8, 384], strides = [1, 1]} : vector<8x512xf32> to vector<8x384xf32>
    %109 = arith.negf %108 : vector<8x384xf32>
    %110 = math.exp %109 : vector<8x384xf32>
    %cst_44 = arith.constant 1.000000e+00 : f32
    %111 = vector.broadcast %cst_44 : f32 to vector<8x384xf32>
    %112 = arith.addf %111, %110 : vector<8x384xf32>
    %113 = arith.divf %111, %112 : vector<8x384xf32>
    %114 = vector.extract_strided_slice %107 {offsets = [0, 384], sizes = [8, 128], strides = [1, 1]} : vector<8x512xf32> to vector<8x128xf32>
    %115 = math.tanh %114 : vector<8x128xf32>
    %116 = vector.extract_strided_slice %113 {offsets = [0, 128], sizes = [8, 128], strides = [1, 1]} : vector<8x384xf32> to vector<8x128xf32>
    %117 = arith.mulf %116, %98 : vector<8x128xf32>
    %118 = vector.extract_strided_slice %113 {offsets = [0, 0], sizes = [8, 128], strides = [1, 1]} : vector<8x384xf32> to vector<8x128xf32>
    %119 = arith.mulf %118, %115 : vector<8x128xf32>
    %120 = arith.addf %117, %119 : vector<8x128xf32>
    %121 = vector.extract_strided_slice %113 {offsets = [0, 256], sizes = [8, 128], strides = [1, 1]} : vector<8x384xf32> to vector<8x128xf32>
    %122 = math.tanh %120 : vector<8x128xf32>
    %123 = arith.mulf %121, %122 : vector<8x128xf32>
    %c5_i32 = arith.constant 5 : i32
    %124 = arith.index_cast %c5_i32 : i32 to index
    %c0_45 = arith.constant 0 : index
    %c0_46 = arith.constant 0 : index
    %125 = vector.load %arg11[%124, %c0_45, %c0_46] : memref<8x8x512xf32, #tpu.memory_space<vmem>>, vector<1x8x512xf32>
    %126 = vector.shape_cast %125 : vector<1x8x512xf32> to vector<8x512xf32>
    %c0_47 = arith.constant 0 : index
    %c0_48 = arith.constant 0 : index
    %127 = vector.load %arg5[%c0_47, %c0_48] : memref<128x512xf32, #tpu.memory_space<vmem>>, vector<128x512xf32>
    %cst_49 = arith.constant dense<0.000000e+00> : vector<8x512xf32>
    %128 = tpu.matmul %123, %127, %cst_49 {dimension_numbers = #tpu.dot_dimension_numbers<[1], [0], [0], [1], [0, 0, 1, 1], [], []>} : vector<8x128xf32>, vector<128x512xf32>, vector<8x512xf32> -> vector<8x512xf32>
    %129 = arith.addf %126, %128 : vector<8x512xf32>
    %130 = vector.extract_strided_slice %129 {offsets = [0, 0], sizes = [8, 384], strides = [1, 1]} : vector<8x512xf32> to vector<8x384xf32>
    %131 = arith.negf %130 : vector<8x384xf32>
    %132 = math.exp %131 : vector<8x384xf32>
    %cst_50 = arith.constant 1.000000e+00 : f32
    %133 = vector.broadcast %cst_50 : f32 to vector<8x384xf32>
    %134 = arith.addf %133, %132 : vector<8x384xf32>
    %135 = arith.divf %133, %134 : vector<8x384xf32>
    %136 = vector.extract_strided_slice %129 {offsets = [0, 384], sizes = [8, 128], strides = [1, 1]} : vector<8x512xf32> to vector<8x128xf32>
    %137 = math.tanh %136 : vector<8x128xf32>
    %138 = vector.extract_strided_slice %135 {offsets = [0, 128], sizes = [8, 128], strides = [1, 1]} : vector<8x384xf32> to vector<8x128xf32>
    %139 = arith.mulf %138, %120 : vector<8x128xf32>
    %140 = vector.extract_strided_slice %135 {offsets = [0, 0], sizes = [8, 128], strides = [1, 1]} : vector<8x384xf32> to vector<8x128xf32>
    %141 = arith.mulf %140, %137 : vector<8x128xf32>
    %142 = arith.addf %139, %141 : vector<8x128xf32>
    %143 = vector.extract_strided_slice %135 {offsets = [0, 256], sizes = [8, 128], strides = [1, 1]} : vector<8x384xf32> to vector<8x128xf32>
    %144 = math.tanh %142 : vector<8x128xf32>
    %145 = arith.mulf %143, %144 : vector<8x128xf32>
    %c6_i32 = arith.constant 6 : i32
    %146 = arith.index_cast %c6_i32 : i32 to index
    %c0_51 = arith.constant 0 : index
    %c0_52 = arith.constant 0 : index
    %147 = vector.load %arg11[%146, %c0_51, %c0_52] : memref<8x8x512xf32, #tpu.memory_space<vmem>>, vector<1x8x512xf32>
    %148 = vector.shape_cast %147 : vector<1x8x512xf32> to vector<8x512xf32>
    %c0_53 = arith.constant 0 : index
    %c0_54 = arith.constant 0 : index
    %149 = vector.load %arg5[%c0_53, %c0_54] : memref<128x512xf32, #tpu.memory_space<vmem>>, vector<128x512xf32>
    %cst_55 = arith.constant dense<0.000000e+00> : vector<8x512xf32>
    %150 = tpu.matmul %145, %149, %cst_55 {dimension_numbers = #tpu.dot_dimension_numbers<[1], [0], [0], [1], [0, 0, 1, 1], [], []>} : vector<8x128xf32>, vector<128x512xf32>, vector<8x512xf32> -> vector<8x512xf32>
    %151 = arith.addf %148, %150 : vector<8x512xf32>
    %152 = vector.extract_strided_slice %151 {offsets = [0, 0], sizes = [8, 384], strides = [1, 1]} : vector<8x512xf32> to vector<8x384xf32>
    %153 = arith.negf %152 : vector<8x384xf32>
    %154 = math.exp %153 : vector<8x384xf32>
    %cst_56 = arith.constant 1.000000e+00 : f32
    %155 = vector.broadcast %cst_56 : f32 to vector<8x384xf32>
    %156 = arith.addf %155, %154 : vector<8x384xf32>
    %157 = arith.divf %155, %156 : vector<8x384xf32>
    %158 = vector.extract_strided_slice %151 {offsets = [0, 384], sizes = [8, 128], strides = [1, 1]} : vector<8x512xf32> to vector<8x128xf32>
    %159 = math.tanh %158 : vector<8x128xf32>
    %160 = vector.extract_strided_slice %157 {offsets = [0, 128], sizes = [8, 128], strides = [1, 1]} : vector<8x384xf32> to vector<8x128xf32>
    %161 = arith.mulf %160, %142 : vector<8x128xf32>
    %162 = vector.extract_strided_slice %157 {offsets = [0, 0], sizes = [8, 128], strides = [1, 1]} : vector<8x384xf32> to vector<8x128xf32>
    %163 = arith.mulf %162, %159 : vector<8x128xf32>
    %164 = arith.addf %161, %163 : vector<8x128xf32>
    %165 = vector.extract_strided_slice %157 {offsets = [0, 256], sizes = [8, 128], strides = [1, 1]} : vector<8x384xf32> to vector<8x128xf32>
    %166 = math.tanh %164 : vector<8x128xf32>
    %167 = arith.mulf %165, %166 : vector<8x128xf32>
    %c7_i32 = arith.constant 7 : i32
    %168 = arith.index_cast %c7_i32 : i32 to index
    %c0_57 = arith.constant 0 : index
    %c0_58 = arith.constant 0 : index
    %169 = vector.load %arg11[%168, %c0_57, %c0_58] : memref<8x8x512xf32, #tpu.memory_space<vmem>>, vector<1x8x512xf32>
    %170 = vector.shape_cast %169 : vector<1x8x512xf32> to vector<8x512xf32>
    %c0_59 = arith.constant 0 : index
    %c0_60 = arith.constant 0 : index
    %171 = vector.load %arg5[%c0_59, %c0_60] : memref<128x512xf32, #tpu.memory_space<vmem>>, vector<128x512xf32>
    %cst_61 = arith.constant dense<0.000000e+00> : vector<8x512xf32>
    %172 = tpu.matmul %167, %171, %cst_61 {dimension_numbers = #tpu.dot_dimension_numbers<[1], [0], [0], [1], [0, 0, 1, 1], [], []>} : vector<8x128xf32>, vector<128x512xf32>, vector<8x512xf32> -> vector<8x512xf32>
    %173 = arith.addf %170, %172 : vector<8x512xf32>
    %174 = vector.extract_strided_slice %173 {offsets = [0, 0], sizes = [8, 384], strides = [1, 1]} : vector<8x512xf32> to vector<8x384xf32>
    %175 = arith.negf %174 : vector<8x384xf32>
    %176 = math.exp %175 : vector<8x384xf32>
    %cst_62 = arith.constant 1.000000e+00 : f32
    %177 = vector.broadcast %cst_62 : f32 to vector<8x384xf32>
    %178 = arith.addf %177, %176 : vector<8x384xf32>
    %179 = arith.divf %177, %178 : vector<8x384xf32>
    %180 = vector.extract_strided_slice %173 {offsets = [0, 384], sizes = [8, 128], strides = [1, 1]} : vector<8x512xf32> to vector<8x128xf32>
    %181 = math.tanh %180 : vector<8x128xf32>
    %182 = vector.extract_strided_slice %179 {offsets = [0, 128], sizes = [8, 128], strides = [1, 1]} : vector<8x384xf32> to vector<8x128xf32>
    %183 = arith.mulf %182, %164 : vector<8x128xf32>
    %184 = vector.extract_strided_slice %179 {offsets = [0, 0], sizes = [8, 128], strides = [1, 1]} : vector<8x384xf32> to vector<8x128xf32>
    %185 = arith.mulf %184, %181 : vector<8x128xf32>
    %186 = arith.addf %183, %185 : vector<8x128xf32>
    %187 = vector.extract_strided_slice %179 {offsets = [0, 256], sizes = [8, 128], strides = [1, 1]} : vector<8x384xf32> to vector<8x128xf32>
    %188 = math.tanh %186 : vector<8x128xf32>
    %189 = arith.mulf %187, %188 : vector<8x128xf32>
    %c8_i32 = arith.constant 8 : i32
    %c0_63 = arith.constant 0 : index
    %c0_64 = arith.constant 0 : index
    %190 = vector.load %arg9[%c0_63, %c0_64] : memref<8x128xf32, #tpu.memory_space<vmem>>, vector<8x128xf32>
    tpu.vector_store %arg9[%c0_63, %c0_64], %189 {strides = array<i32>} : memref<8x128xf32, #tpu.memory_space<vmem>>, vector<8x128xf32>,
    %c0_65 = arith.constant 0 : index
    %c0_66 = arith.constant 0 : index
    %191 = vector.load %arg10[%c0_65, %c0_66] : memref<8x128xf32, #tpu.memory_space<vmem>>, vector<8x128xf32>
    tpu.vector_store %arg10[%c0_65, %c0_66], %186 {strides = array<i32>} : memref<8x128xf32, #tpu.memory_space<vmem>>, vector<8x128xf32>,
    %c0_i32_67 = arith.constant 0 : i32
    %192 = arith.cmpi eq, %arg1, %c0_i32_67 : i32
    %193 = arith.extui %192 : i1 to i32
    %c0_i32_68 = arith.constant 0 : i32
    %194 = arith.cmpi ne, %193, %c0_i32_68 : i32
    scf.if %194 {
      %c0_69 = arith.constant 0 : index
      %c0_70 = arith.constant 0 : index
      %195 = vector.load %arg6[%c0_69, %c0_70] : memref<128x128xf32, #tpu.memory_space<vmem>>, vector<128x128xf32>
      %cst_71 = arith.constant dense<0.000000e+00> : vector<8x128xf32>
      %196 = tpu.matmul %189, %195, %cst_71 {dimension_numbers = #tpu.dot_dimension_numbers<[1], [0], [0], [1], [0, 0, 1, 1], [], []>} : vector<8x128xf32>, vector<128x128xf32>, vector<8x128xf32> -> vector<8x128xf32>
      %c0_72 = arith.constant 0 : index
      %c0_73 = arith.constant 0 : index
      %197 = vector.load %arg7[%c0_72, %c0_73] : memref<1x128xf32, #tpu.memory_space<vmem>>, vector<1x128xf32>
      %198 = vector.broadcast %197 : vector<1x128xf32> to vector<8x128xf32>
      %199 = arith.addf %196, %198 : vector<8x128xf32>
      %c0_74 = arith.constant 0 : index
      %c0_75 = arith.constant 0 : index
      %200 = vector.load %arg8[%c0_74, %c0_75] : memref<8x128xf32, #tpu.memory_space<vmem>>, vector<8x128xf32>
      tpu.vector_store %arg8[%c0_74, %c0_75], %199 {strides = array<i32>} : memref<8x128xf32, #tpu.memory_space<vmem>>, vector<8x128xf32>,
    } else {
    }
    return
  }
  func.func @transform_0(%arg0: i32, %arg1: i32) -> (i32, i32, i32) {
    %c0_i32 = arith.constant 0 : i32
    %c0_i32_0 = arith.constant 0 : i32
    return %arg1, %arg0, %c0_i32 : i32, i32, i32
  }
  func.func @transform_1(%arg0: i32, %arg1: i32) -> (i32, i32) {
    %c0_i32 = arith.constant 0 : i32
    %c0_i32_0 = arith.constant 0 : i32
    %c0_i32_1 = arith.constant 0 : i32
    return %c0_i32, %c0_i32_0 : i32, i32
  }
  func.func @transform_2(%arg0: i32, %arg1: i32) -> (i32, i32) {
    %c0_i32 = arith.constant 0 : i32
    %c0_i32_0 = arith.constant 0 : i32
    %c0_i32_1 = arith.constant 0 : i32
    return %c0_i32, %c0_i32_0 : i32, i32
  }
  func.func @transform_3(%arg0: i32, %arg1: i32) -> (i32, i32) {
    %c0_i32 = arith.constant 0 : i32
    %c0_i32_0 = arith.constant 0 : i32
    %c0_i32_1 = arith.constant 0 : i32
    return %c0_i32, %c0_i32_0 : i32, i32
  }
  func.func @transform_4(%arg0: i32, %arg1: i32) -> (i32, i32) {
    %c0_i32 = arith.constant 0 : i32
    %c0_i32_0 = arith.constant 0 : i32
    %c0_i32_1 = arith.constant 0 : i32
    return %c0_i32, %c0_i32_0 : i32, i32
  }
  func.func @transform_5(%arg0: i32, %arg1: i32) -> (i32, i32) {
    %c0_i32 = arith.constant 0 : i32
    %c0_i32_0 = arith.constant 0 : i32
    %c0_i32_1 = arith.constant 0 : i32
    return %c0_i32, %c0_i32_0 : i32, i32
  }
  func.func @transform_6(%arg0: i32, %arg1: i32) -> (i32, i32) {
    %c0_i32 = arith.constant 0 : i32
    %c0_i32_0 = arith.constant 0 : i32
    return %arg0, %c0_i32 : i32, i32
  }
}

</mosaic_0001>

<bundles_post_ra>
// kernel: stock_lstm_forward.3
= control target key start
LH: loop header
LB: loop body
LE: loop exit
PB: predicated region body
PF: predicated region fallthrough
CT: control target
= control target key end

     0   :  { %v2821_v3 = vmov 0.0   ;;  %vm2823_vm0 = vmmov 0   ;;  %s3747_s1 = inlined_call_operand.vmem [shape: f32[128,512], index: 1, kind: input, shape index: {}]   ;;  %s3748_s3 = inlined_call_operand.vmem [shape: f32[128,512], index: 3, kind: input, shape index: {}]   ;;  %s3749_s0 = inlined_call_operand.vmem [shape: f32[8,8,128], index: 0, kind: input, shape index: {}]   ;;  %s3750_s2 = inlined_call_operand.vmem [shape: f32[1,512], index: 2, kind: input, shape index: {}]   ;;  %s3751_s4 = inlined_call_operand.vmem [shape: f32[128,128], index: 4, kind: input, shape index: {}]   ;;  %s3752_s5 = inlined_call_operand.vmem [shape: f32[1,128], index: 5, kind: input, shape index: {}]   ;;  %s3753_s6 = inlined_call_operand.vmem [shape: f32[8,128], index: 6, kind: output, shape index: {}]  }
   0x1   :  { %v38_v0 = vld [vmem:[%s3747_s1 + $0x8] sm:$0xff]  ;;  %v40_v2 = vld [vmem:[%s3747_s1 + $0x18] sm:$0xff]  ;;  %187 = vmatprep.mubr.f32.mxu0 %v2821_v3  ;;  %300 = vmatprep.mubr.f32.mxu1 %v2821_v3  ;;  %v37_v6 = vld [vmem:[%s3747_s1] sm:$0xff] }
   0x2   :  { %v42_v1 = vld [vmem:[%s3747_s1 + $0x28] sm:$0xff]  ;;  %v44_v5 = vld [vmem:[%s3747_s1 + $0x38] sm:$0xff]  ;;  %v41_v7 = vld [vmem:[%s3747_s1 + $0x20] sm:$0xff] }
   0x3   :  { %v2026_v4 = vpack.c.bf16 %v42_v1, %v38_v0  ;;  %v2058_v8 = vpack.c.bf16 %v44_v5, %v40_v2  ;;  %v2028_v9 = vpack.c.bf16 %v41_v7, %v37_v6  ;;  %v39_v10 = vld [vmem:[%s3747_s1 + $0x10] sm:$0xff]  ;;  %v46_v12 = vld [vmem:[%s3747_s1 + $0x48] sm:$0xff]  ;;  %v48_v15 = vld [vmem:[%s3747_s1 + $0x58] sm:$0xff] }
   0x4   :  { %v43_v11 = vld [vmem:[%s3747_s1 + $0x30] sm:$0xff]  ;;  %v50_v14 = vld [vmem:[%s3747_s1 + $0x68] sm:$0xff]  ;;  %v52_v16 = vld [vmem:[%s3747_s1 + $0x78] sm:$0xff] }
   0x5   :  { %2027 = vmatprep.subr.bf16.mxu0 %v2026_v4  ;;  %v2060_v13 = vpack.c.bf16 %v43_v11, %v39_v10  ;;  %2059 = vmatprep.subr.bf16.mxu1 %v2058_v8  ;;  %v2030_v17 = vpack.c.bf16 %v50_v14, %v46_v12  ;;  %v2062_v18 = vpack.c.bf16 %v52_v16, %v48_v15  ;;  %v45_v19 = vld [vmem:[%s3747_s1 + $0x40] sm:$0xff]  ;;  %v47_v21 = vld [vmem:[%s3747_s1 + $0x50] sm:$0xff]  ;;  %v54_v24 = vld [vmem:[%s3747_s1 + $0x88] sm:$0xff] }
   0x6   :  { %2029 = vmatpush1.bf16.msra.mxu0 %v2028_v9  ;;  %v49_v20 = vld [vmem:[%s3747_s1 + $0x60] sm:$0xff]  ;;  %v51_v23 = vld [vmem:[%s3747_s1 + $0x70] sm:$0xff]  ;;  %v58_v25 = vld [vmem:[%s3747_s1 + $0xa8] sm:$0xff] }
   0x7   :  { %2061 = vmatpush1.bf16.msra.mxu1 %v2060_v13  ;;  %v2032_v22 = vpack.c.bf16 %v49_v20, %v45_v19  ;;  %2031 = vmatprep.subr.bf16.mxu0 %v2030_v17  ;;  %v2064_v26 = vpack.c.bf16 %v51_v23, %v47_v21  ;;  %v2034_v27 = vpack.c.bf16 %v58_v25, %v54_v24  ;;  %v56_v28 = vld [vmem:[%s3747_s1 + $0x98] sm:$0xff]  ;;  %v53_v30 = vld [vmem:[%s3747_s1 + $0x80] sm:$0xff]  ;;  %v55_v33 = vld [vmem:[%s3747_s1 + $0x90] sm:$0xff] }
   0x8   :  { %2063 = vmatprep.subr.bf16.mxu1 %v2062_v18  ;;  %v60_v29 = vld [vmem:[%s3747_s1 + $0xb8] sm:$0xff]  ;;  %v57_v32 = vld [vmem:[%s3747_s1 + $0xa0] sm:$0xff]  ;;  %v59_v34 = vld [vmem:[%s3747_s1 + $0xb0] sm:$0xff] }
   0x9   :  { %v2066_v31 = vpack.c.bf16 %v60_v29, %v56_v28  ;;  %v2036_v35 = vpack.c.bf16 %v57_v32, %v53_v30  ;;  %v62_v36 = vld [vmem:[%s3747_s1 + $0xc8] sm:$0xff]  ;;  %v64_v38 = vld [vmem:[%s3747_s1 + $0xd8] sm:$0xff]  ;;  %v2068_v39 = vpack.c.bf16 %v59_v34, %v55_v33  ;;  %v61_v42 = vld [vmem:[%s3747_s1 + $0xc0] sm:$0xff] }
   0xa   :  { %2033 = vmatpush1.bf16.msra.mxu0 %v2032_v22  ;;  %v66_v37 = vld [vmem:[%s3747_s1 + $0xe8] sm:$0xff]  ;;  %v68_v41 = vld [vmem:[%s3747_s1 + $0xf8] sm:$0xff]  ;;  %v65_v43 = vld [vmem:[%s3747_s1 + $0xe0] sm:$0xff] }
   0xb   :  { %2065 = vmatpush1.bf16.msra.mxu1 %v2064_v26  ;;  %2035 = vmatprep.subr.bf16.mxu0 %v2034_v27  ;;  %v2038_v40 = vpack.c.bf16 %v66_v37, %v62_v36  ;;  %v2070_v44 = vpack.c.bf16 %v68_v41, %v64_v38  ;;  %v63_v45 = vld [vmem:[%s3747_s1 + $0xd0] sm:$0xff]  ;;  %v70_v47 = vld [vmem:[%s3747_s1 + $0x108] sm:$0xff]  ;;  %v72_v49 = vld [vmem:[%s3747_s1 + $0x118] sm:$0xff]  ;;  %v2040_v51 = vpack.c.bf16 %v65_v43, %v61_v42 }
   0xc   :  { %2067 = vmatprep.subr.bf16.mxu1 %v2066_v31  ;;  %v67_v46 = vld [vmem:[%s3747_s1 + $0xf0] sm:$0xff]  ;;  %v74_v48 = vld [vmem:[%s3747_s1 + $0x128] sm:$0xff]  ;;  %v76_v50 = vld [vmem:[%s3747_s1 + $0x138] sm:$0xff] }
   0xd   :  { %v2072_v52 = vpack.c.bf16 %v67_v46, %v63_v45  ;;  %v2042_v53 = vpack.c.bf16 %v74_v48, %v70_v47  ;;  %v69_v54 = vld [vmem:[%s3747_s1 + $0x100] sm:$0xff]  ;;  %v71_v56 = vld [vmem:[%s3747_s1 + $0x110] sm:$0xff]  ;;  %v2074_v57 = vpack.c.bf16 %v76_v50, %v72_v49  ;;  %v78_v59 = vld [vmem:[%s3747_s1 + $0x148] sm:$0xff] }
   0xe   :  { %2037 = vmatpush1.bf16.msra.mxu0 %v2036_v35  ;;  %v73_v55 = vld [vmem:[%s3747_s1 + $0x120] sm:$0xff]  ;;  %v75_v58 = vld [vmem:[%s3747_s1 + $0x130] sm:$0xff]  ;;  %v82_v60 = vld [vmem:[%s3747_s1 + $0x168] sm:$0xff] }
   0xf   :  { %2069 = vmatpush1.bf16.msra.mxu1 %v2068_v39  ;;  %2039 = vmatprep.subr.bf16.mxu0 %v2038_v40  ;;  %v80_v61 = vld [vmem:[%s3747_s1 + $0x158] sm:$0xff]  ;;  %v2044_v63 = vpack.c.bf16 %v73_v55, %v69_v54  ;;  %v2076_v0 = vpack.c.bf16 %v75_v58, %v71_v56  ;;  %v2046_v1 = vpack.c.bf16 %v82_v60, %v78_v59  ;;  %v77_v2 = vld [vmem:[%s3747_s1 + $0x140] sm:$0xff]  ;;  %v79_v5 = vld [vmem:[%s3747_s1 + $0x150] sm:$0xff] }
  0x10   :  { %2071 = vmatprep.subr.bf16.mxu1 %v2070_v44  ;;  %v84_v62 = vld [vmem:[%s3747_s1 + $0x178] sm:$0xff]  ;;  %v81_v4 = vld [vmem:[%s3747_s1 + $0x160] sm:$0xff]  ;;  %v83_v7 = vld [vmem:[%s3747_s1 + $0x170] sm:$0xff] }
  0x11   :  { %v2078_v6 = vpack.c.bf16 %v84_v62, %v80_v61  ;;  %v86_v8 = vld [vmem:[%s3747_s1 + $0x188] sm:$0xff]  ;;  %v88_v10 = vld [vmem:[%s3747_s1 + $0x198] sm:$0xff]  ;;  %v2048_v12 = vpack.c.bf16 %v81_v4, %v77_v2  ;;  %v2080_v13 = vpack.c.bf16 %v83_v7, %v79_v5  ;;  %v85_v15 = vld [vmem:[%s3747_s1 + $0x180] sm:$0xff] }
  0x12   :  { %2041 = vmatpush1.bf16.msra.mxu0 %v2040_v51  ;;  %v90_v9 = vld [vmem:[%s3747_s1 + $0x1a8] sm:$0xff]  ;;  %v92_v11 = vld [vmem:[%s3747_s1 + $0x1b8] sm:$0xff]  ;;  %v89_v16 = vld [vmem:[%s3747_s1 + $0x1a0] sm:$0xff] }
  0x13   :  { %2073 = vmatpush1.bf16.msra.mxu1 %v2072_v52  ;;  %2043 = vmatprep.subr.bf16.mxu0 %v2042_v53  ;;  %v2050_v14 = vpack.c.bf16 %v90_v9, %v86_v8  ;;  %v87_v17 = vld [vmem:[%s3747_s1 + $0x190] sm:$0xff]  ;;  %v2082_v18 = vpack.c.bf16 %v92_v11, %v88_v10  ;;  %v94_v20 = vld [vmem:[%s3747_s1 + $0x1c8] sm:$0xff]  ;;  %v96_v22 = vld [vmem:[%s3747_s1 + $0x1d8] sm:$0xff]  ;;  %v2052_v24 = vpack.c.bf16 %v89_v16, %v85_v15 }
  0x14   :  { %2075 = vmatprep.subr.bf16.mxu1 %v2074_v57  ;;  %v91_v19 = vld [vmem:[%s3747_s1 + $0x1b0] sm:$0xff]  ;;  %v98_v21 = vld [vmem:[%s3747_s1 + $0x1e8] sm:$0xff]  ;;  %v100_v23 = vld [vmem:[%s3747_s1 + $0x1f8] sm:$0xff] }
  0x15   :  { %v2084_v25 = vpack.c.bf16 %v91_v19, %v87_v17  ;;  %v2054_v26 = vpack.c.bf16 %v98_v21, %v94_v20  ;;  %v93_v27 = vld [vmem:[%s3747_s1 + $0x1c0] sm:$0xff]  ;;  %v95_v29 = vld [vmem:[%s3747_s1 + $0x1d0] sm:$0xff]  ;;  %v2086_v30 = vpack.c.bf16 %v100_v23, %v96_v22  ;;  %v388_v32 = vld [vmem:[%s3748_s3 + $0x8] sm:$0xff] }
  0x16   :  { %2045 = vmatpush1.bf16.msra.mxu0 %v2044_v63  ;;  %v97_v28 = vld [vmem:[%s3747_s1 + $0x1e0] sm:$0xff]  ;;  %v99_v31 = vld [vmem:[%s3747_s1 + $0x1f0] sm:$0xff]  ;;  %v392_v33 = vld [vmem:[%s3748_s3 + $0x28] sm:$0xff] }
  0x17   :  { %2077 = vmatpush1.bf16.msra.mxu1 %v2076_v0  ;;  %2047 = vmatprep.subr.bf16.mxu0 %v2046_v1  ;;  %v390_v34 = vld [vmem:[%s3748_s3 + $0x18] sm:$0xff]  ;;  %v2056_v36 = vpack.c.bf16 %v97_v28, %v93_v27  ;;  %v2088_v37 = vpack.c.bf16 %v99_v31, %v95_v29  ;;  %v3065_v38 = vpack.c.bf16 %v392_v33, %v388_v32  ;;  %v387_v39 = vld [vmem:[%s3748_s3] sm:$0xff]  ;;  %v389_v42 = vld [vmem:[%s3748_s3 + $0x10] sm:$0xff] }
  0x18   :  { %2079 = vmatprep.subr.bf16.mxu1 %v2078_v6  ;;  %v394_v35 = vld [vmem:[%s3748_s3 + $0x38] sm:$0xff]  ;;  %v391_v40 = vld [vmem:[%s3748_s3 + $0x20] sm:$0xff]  ;;  %v393_v43 = vld [vmem:[%s3748_s3 + $0x30] sm:$0xff] }
  0x19   :  { %v3073_v41 = vpack.c.bf16 %v394_v35, %v390_v34  ;;  %v396_v44 = vld [vmem:[%s3748_s3 + $0x48] sm:$0xff]  ;;  %v29_v46 = vld [vmem:[%s3749_s0] sm:$0xff]  ;;  %v3090_v47 = vpack.c.bf16 %v391_v40, %v387_v39  ;;  %v398_v48 = vld [vmem:[%s3748_s3 + $0x58] sm:$0xff]  ;;  %v3099_v50 = vpack.c.bf16 %v393_v43, %v389_v42 }
  0x1a   :  { %2049 = vmatpush1.bf16.msra.mxu0 %v2048_v12  ;;  %v400_v45 = vld [vmem:[%s3748_s3 + $0x68] sm:$0xff]  ;;  %v402_v49 = vld [vmem:[%s3748_s3 + $0x78] sm:$0xff]  ;;  %v395_v51 = vld [vmem:[%s3748_s3 + $0x40] sm:$0xff] }
  0x1b   :  { %2081 = vmatpush1.bf16.msra.mxu1 %v2080_v13  ;;  %2051 = vmatprep.subr.bf16.mxu0 %v2050_v14  ;;  %v399_v52 = vld [vmem:[%s3748_s3 + $0x60] sm:$0xff]  ;;  %v3108_v53 = vpack.c.bf16 %v400_v45, %v396_v44  ;;  %v397_v54 = vld [vmem:[%s3748_s3 + $0x50] sm:$0xff]  ;;  %v3116_v56 = vpack.c.bf16 %v402_v49, %v398_v48  ;;  %v404_v57 = vld [vmem:[%s3748_s3 + $0x88] sm:$0xff] }
  0x1c   :  { %2083 = vmatprep.subr.bf16.mxu1 %v2082_v18  ;;  %v401_v55 = vld [vmem:[%s3748_s3 + $0x70] sm:$0xff]  ;;  %v408_v58 = vld [vmem:[%s3748_s3 + $0xa8] sm:$0xff]  ;;  %v3128_v60 = vpack.c.bf16 %v399_v52, %v395_v51  ;;  %v406_v61 = vld [vmem:[%s3748_s3 + $0x98] sm:$0xff] }
  0x1d   :  { %v30_v59 = vld [vmem:[%s3749_s0 + $0x8] sm:$0xff]  ;;  %v410_v62 = vld [vmem:[%s3748_s3 + $0xb8] sm:$0xff]  ;;  %v3138_v63 = vpack.c.bf16 %v401_v55, %v397_v54  ;;  %v403_v0 = vld [vmem:[%s3748_s3 + $0x80] sm:$0xff]  ;;  %v3148_v2 = vpack.c.bf16 %v408_v58, %v404_v57 }
  0x1e   :  { %2053 = vmatpush1.bf16.msra.mxu0 %v2052_v24  ;;  %v407_v1 = vld [vmem:[%s3748_s3 + $0xa0] sm:$0xff]  ;;  %v405_v4 = vld [vmem:[%s3748_s3 + $0x90] sm:$0xff]  ;;  %v3157_v6 = vpack.c.bf16 %v410_v62, %v406_v61  ;;  %v412_v7 = vld [vmem:[%s3748_s3 + $0xc8] sm:$0xff] }
  0x1f   :  { %2085 = vmatpush1.bf16.msra.mxu1 %v2084_v25  ;;  %2055 = vmatprep.subr.bf16.mxu0 %v2054_v26  ;;  %v409_v5 = vld [vmem:[%s3748_s3 + $0xb0] sm:$0xff]  ;;  %v416_v8 = vld [vmem:[%s3748_s3 + $0xe8] sm:$0xff]  ;;  %v3169_v10 = vpack.c.bf16 %v407_v1, %v403_v0  ;;  %v414_v11 = vld [vmem:[%s3748_s3 + $0xd8] sm:$0xff] }
  0x20   :  { %2087 = vmatprep.subr.bf16.mxu1 %v2086_v30  ;;  %v31_v9 = vld [vmem:[%s3749_s0 + $0x10] sm:$0xff]  ;;  %v418_v12 = vld [vmem:[%s3748_s3 + $0xf8] sm:$0xff]  ;;  %v3179_v13 = vpack.c.bf16 %v409_v5, %v405_v4  ;;  %v411_v14 = vld [vmem:[%s3748_s3 + $0xc0] sm:$0xff]  ;;  %v3189_v16 = vpack.c.bf16 %v416_v8, %v412_v7 }
  0x21   :  { %v415_v15 = vld [vmem:[%s3748_s3 + $0xe0] sm:$0xff]  ;;  %v413_v17 = vld [vmem:[%s3748_s3 + $0xd0] sm:$0xff]  ;;  %v3198_v19 = vpack.c.bf16 %v418_v12, %v414_v11  ;;  %v420_v20 = vld [vmem:[%s3748_s3 + $0x108] sm:$0xff] }
  0x22   :  { %2057 = vmatpush1.bf16.msra.mxu0 %v2056_v36  ;;  %v417_v18 = vld [vmem:[%s3748_s3 + $0xf0] sm:$0xff]  ;;  %v424_v21 = vld [vmem:[%s3748_s3 + $0x128] sm:$0xff]  ;;  %v32_v22 = vld [vmem:[%s3749_s0 + $0x18] sm:$0xff]  ;;  %v3210_v23 = vpack.c.bf16 %v415_v15, %v411_v14 }
  0x23   :  { %2089 = vmatpush1.bf16.msra.mxu1 %v2088_v37  ;;  %2091 = vmatprep.subr.bf16.mxu0 %v3065_v38  ;;  %v422_v24 = vld [vmem:[%s3748_s3 + $0x118] sm:$0xff]  ;;  %v3220_v26 = vpack.c.bf16 %v417_v18, %v413_v17  ;;  %v419_v27 = vld [vmem:[%s3748_s3 + $0x100] sm:$0xff]  ;;  %v3230_v29 = vpack.c.bf16 %v424_v21, %v420_v20  ;;  %v421_v30 = vld [vmem:[%s3748_s3 + $0x110] sm:$0xff] }
  0x24   :  { %2123 = vmatprep.subr.bf16.mxu1 %v3073_v41  ;;  %v426_v25 = vld [vmem:[%s3748_s3 + $0x138] sm:$0xff]  ;;  %v423_v28 = vld [vmem:[%s3748_s3 + $0x120] sm:$0xff]  ;;  %v425_v31 = vld [vmem:[%s3748_s3 + $0x130] sm:$0xff] }
  0x25   :  { %188 = vmatmul.mubr.f32.vlgmr.msra.gmra.mrb[0].mxu0 %v29_v46  ;;  %v3239_v32 = vpack.c.bf16 %v426_v25, %v422_v24  ;;  %v428_v33 = vld [vmem:[%s3748_s3 + $0x148] sm:$0xff]  ;;  %v33_v35 = vld [vmem:[%s3749_s0 + $0x20] sm:$0xff]  ;;  %v3251_v36 = vpack.c.bf16 %v423_v28, %v419_v27  ;;  %v430_v37 = vld [vmem:[%s3748_s3 + $0x158] sm:$0xff]  ;;  %v3261_v40 = vpack.c.bf16 %v425_v31, %v421_v30  ;;  %v103_v28 = vlaneseq }
  0x26   :  { %301 = vmatmul.mubr.f32.vlgmr.msra.gmra.mrb[0].mxu1 %v29_v46  ;;  %2093 = vmatpush1.bf16.msra.mxu0 %v3090_v47  ;;  %v432_v34 = vld [vmem:[%s3748_s3 + $0x168] sm:$0xff]  ;;  %v434_v39 = vld [vmem:[%s3748_s3 + $0x178] sm:$0xff]  ;;  %v427_v42 = vld [vmem:[%s3748_s3 + $0x140] sm:$0xff] }
  0x27   :  { %2125 = vmatpush1.bf16.msra.mxu1 %v3099_v50  ;;  %193 = vmatprep.mubr.f32.mxu0 %v2821_v3  ;;  %v431_v43 = vld [vmem:[%s3748_s3 + $0x160] sm:$0xff]  ;;  %v3271_v44 = vpack.c.bf16 %v432_v34, %v428_v33  ;;  %v429_v45 = vld [vmem:[%s3748_s3 + $0x150] sm:$0xff]  ;;  %v3280_v48 = vpack.c.bf16 %v434_v39, %v430_v37  ;;  %v436_v49 = vld [vmem:[%s3748_s3 + $0x188] sm:$0xff]  ;;  %v104_v30 = vshrl.u32 %v103_v28, 7 }
  0x28   :  { %306 = vmatprep.mubr.f32.mxu1 %v2821_v3  ;;  %2095 = vmatprep.subr.bf16.mxu0 %v3108_v53  ;;  %v433_v46 = vld [vmem:[%s3748_s3 + $0x170] sm:$0xff]  ;;  %v440_v51 = vld [vmem:[%s3748_s3 + $0x1a8] sm:$0xff]  ;;  %v3292_v54 = vpack.c.bf16 %v431_v43, %v427_v42  ;;  %v438_v55 = vld [vmem:[%s3748_s3 + $0x198] sm:$0xff] }
  0x29   :  { %194 = vmatmul.mubr.f32.gmra.mrb[2].mxu0 %v30_v59  ;;  %2127 = vmatprep.subr.bf16.mxu1 %v3116_v56  ;;  %v34_v52 = vld [vmem:[%s3749_s0 + $0x28] sm:$0xff]  ;;  %v442_v57 = vld [vmem:[%s3748_s3 + $0x1b8] sm:$0xff]  ;;  %v3302_v58 = vpack.c.bf16 %v433_v46, %v429_v45  ;;  %v439_v61 = vld [vmem:[%s3748_s3 + $0x1a0] sm:$0xff]  ;;  %v3312_v62 = vpack.c.bf16 %v440_v51, %v436_v49  ;;  %v105_v31 = vsub.s32 0, %v104_v30  ;;  %v109_v34 = vsub.s32 1, %v104_v30 }
  0x2a   :  { %307 = vmatmul.mubr.f32.gmra.mrb[2].mxu1 %v30_v59  ;;  %2097 = vmatpush1.bf16.msra.mxu0 %v3128_v60  ;;  %v435_v59 = vld [vmem:[%s3748_s3 + $0x180] sm:$0xff]  ;;  %v437_v0 = vld [vmem:[%s3748_s3 + $0x190] sm:$0xff]  ;;  %v3321_v4 = vpack.c.bf16 %v442_v57, %v438_v55  ;;  %v444_v5 = vld [vmem:[%s3748_s3 + $0x1c8] sm:$0xff]  ;;  %v113_v42 = vsub.s32 2, %v104_v30 }
  0x2b   :  { %2129 = vmatpush1.bf16.msra.mxu1 %v3138_v63  ;;  %199 = vmatprep.mubr.f32.mxu0 %v2821_v3  ;;  %v441_v1 = vld [vmem:[%s3748_s3 + $0x1b0] sm:$0xff]  ;;  %v448_v7 = vld [vmem:[%s3748_s3 + $0x1e8] sm:$0xff]  ;;  %v446_v11 = vld [vmem:[%s3748_s3 + $0x1d8] sm:$0xff] }
  0x2c   :  { %312 = vmatprep.mubr.f32.mxu1 %v2821_v3  ;;  %2099 = vmatprep.subr.bf16.mxu0 %v3148_v2  ;;  %v35_v8 = vld [vmem:[%s3749_s0 + $0x30] sm:$0xff]  ;;  %v450_v12 = vld [vmem:[%s3748_s3 + $0x1f8] sm:$0xff]  ;;  %v3343_v14 = vpack.c.bf16 %v441_v1, %v437_v0  ;;  %v443_v15 = vld [vmem:[%s3748_s3 + $0x1c0] sm:$0xff]  ;;  %v3353_v18 = vpack.c.bf16 %v448_v7, %v444_v5 }
  0x2d   :  { %200 = vmatmul.mubr.f32.gmra.mrb[4].mxu0 %v31_v9  ;;  %2131 = vmatprep.subr.bf16.mxu1 %v3157_v6  ;;  %v447_v17 = vld [vmem:[%s3748_s3 + $0x1e0] sm:$0xff]  ;;  %v445_v20 = vld [vmem:[%s3748_s3 + $0x1d0] sm:$0xff]  ;;  %v36_v24 = vld [vmem:[%s3749_s0 + $0x38] sm:$0xff] }
  0x2e   :  { %313 = vmatmul.mubr.f32.gmra.mrb[4].mxu1 %v31_v9  ;;  %2101 = vmatpush1.bf16.msra.mxu0 %v3169_v10  ;;  %v3333_v9 = vpack.c.bf16 %v439_v61, %v435_v59  ;;  %v449_v21 = vld [vmem:[%s3748_s3 + $0x1f0] sm:$0xff]  ;;  %v3368_v25 = vpack.c.bf16 %v447_v17, %v443_v15  ;;  %v101_v33 = vld [vmem:[%s3750_s2] sm:$0xf]  ;;  %v117_v59 = vsub.s32 3, %v104_v30 }
  0x2f   :  { %2133 = vmatpush1.bf16.msra.mxu1 %v3179_v13  ;;  %205 = vmatprep.mubr.f32.mxu0 %v2821_v3  ;;  %v3372_v27 = vpack.c.bf16 %v449_v21, %v445_v20  ;;  %v3424_v37 = vrot.slane %v101_v33, %v109_v34  ;;  %v3428_v55 = vrot.slane %v101_v33, %v113_v42 }
  0x30   :  { %318 = vmatprep.mubr.f32.mxu1 %v2821_v3  ;;  %2103 = vmatprep.subr.bf16.mxu0 %v3189_v16  ;;  %v3431_v0 = vrot.slane %v101_v33, %v117_v59 }
  0x31   :  { %206 = vmatmul.mubr.f32.gmra.mrb[6].mxu0 %v32_v22  ;;  %2135 = vmatprep.subr.bf16.mxu1 %v3198_v19 }
  0x32   :  { %319 = vmatmul.mubr.f32.gmra.mrb[6].mxu1 %v32_v22  ;;  %2105 = vmatpush1.bf16.msra.mxu0 %v3210_v23  ;;  %v3362_v22 = vpack.c.bf16 %v450_v12, %v446_v11 }
  0x33   :  { %2137 = vmatpush1.bf16.msra.mxu1 %v3220_v26  ;;  %211 = vmatprep.mubr.f32.mxu0 %v2821_v3 }
  0x34   :  { %324 = vmatprep.mubr.f32.mxu1 %v2821_v3  ;;  %2107 = vmatprep.subr.bf16.mxu0 %v3230_v29 }
  0x35   :  { %212 = vmatmul.mubr.f32.gmra.mrb[8].mxu0 %v33_v35  ;;  %2139 = vmatprep.subr.bf16.mxu1 %v3239_v32 }
  0x36   :  { %325 = vmatmul.mubr.f32.gmra.mrb[8].mxu1 %v33_v35  ;;  %2109 = vmatpush1.bf16.msra.mxu0 %v3251_v36  ;;  %v3422_v35 = vrot.slane %v101_v33, %v105_v31 }
  0x37   :  { %2141 = vmatpush1.bf16.msra.mxu1 %v3261_v40  ;;  %217 = vmatprep.mubr.f32.mxu0 %v2821_v3 }
  0x38   :  { %330 = vmatprep.mubr.f32.mxu1 %v2821_v3  ;;  %2111 = vmatprep.subr.bf16.mxu0 %v3271_v44 }
  0x39   :  { %218 = vmatmul.mubr.f32.gmra.mrb[10].mxu0 %v34_v52  ;;  %2143 = vmatprep.subr.bf16.mxu1 %v3280_v48 }
  0x3a   :  { %331 = vmatmul.mubr.f32.gmra.mrb[10].mxu1 %v34_v52  ;;  %2113 = vmatpush1.bf16.msra.mxu0 %v3292_v54 }
  0x3b   :  { %2145 = vmatpush1.bf16.msra.mxu1 %v3302_v58  ;;  %223 = vmatprep.mubr.f32.mxu0 %v2821_v3 }
  0x3c   :  { %336 = vmatprep.mubr.f32.mxu1 %v2821_v3  ;;  %2115 = vmatprep.subr.bf16.mxu0 %v3312_v62 }
  0x3d   :  { %224 = vmatmul.mubr.f32.gmra.mrb[12].mxu0 %v35_v8  ;;  %2147 = vmatprep.subr.bf16.mxu1 %v3321_v4 }
  0x3e   :  { %337 = vmatmul.mubr.f32.gmra.mrb[12].mxu1 %v35_v8  ;;  %2117 = vmatpush1.bf16.msra.mxu0 %v3333_v9 }
  0x3f   :  { %2149 = vmatpush1.bf16.msra.mxu1 %v3343_v14  ;;  %229 = vmatprep.mubr.f32.mxu0 %v2821_v3 }
  0x40   :  { %342 = vmatprep.mubr.f32.mxu1 %v2821_v3  ;;  %2119 = vmatprep.subr.bf16.mxu0 %v3353_v18 }
  0x41   :  { %230 = vmatmul.mubr.f32.gmra.mrb[14].mxu0 %v36_v24  ;;  %2151 = vmatprep.subr.bf16.mxu1 %v3362_v22 }
  0x42   :  { %343 = vmatmul.mubr.f32.gmra.mrb[14].mxu1 %v36_v24  ;;  %2121 = vmatpush1.bf16.msra.mxu0 %v3368_v25 }
  0x43   :  { %2153 = vmatpush1.bf16.msra.mxu1 %v3372_v27  ;;  %515 = vmatprep.mubr.f32.mxu0 %v2821_v3 }
  0x44   :  { %586 = vmatprep.mubr.f32.mxu1 %v2821_v3  ;;  %2155 = vmatprep.subr.bf16.mxu0 %v3065_v38 }
  0x45   :  { %516 = vmatmul.mubr.f32.vlgmr.msra.gmra.mrb[0].mxu0 %v2821_v3  ;;  %2187 = vmatprep.subr.bf16.mxu1 %v3073_v41 }
  0x46   :  { %587 = vmatmul.mubr.f32.vlgmr.msra.gmra.mrb[0].mxu1 %v2821_v3  ;;  %2157 = vmatpush1.bf16.msra.mxu0 %v3090_v47 }
  0x47   :  { %2189 = vmatpush1.bf16.msra.mxu1 %v3099_v50  ;;  %2159 = vmatprep.subr.bf16.mxu0 %v3108_v53 }
  0x48   :  { %2191 = vmatprep.subr.bf16.mxu1 %v3116_v56  ;;  %690 = vmatprep.mubr.f32.mxu0 %v2821_v3 }
  0x49   :  { %761 = vmatprep.mubr.f32.mxu1 %v2821_v3 }
  0x4a   :  { %2161 = vmatpush1.bf16.msra.mxu0 %v3128_v60 }
  0x4b   :  { %2193 = vmatpush1.bf16.msra.mxu1 %v3138_v63  ;;  %2163 = vmatprep.subr.bf16.mxu0 %v3148_v2 }
  0x4c   :  { %2195 = vmatprep.subr.bf16.mxu1 %v3157_v6 }
  0x4e   :  { %2165 = vmatpush1.bf16.msra.mxu0 %v3169_v10 }
  0x4f   :  { %2197 = vmatpush1.bf16.msra.mxu1 %v3179_v13  ;;  %2167 = vmatprep.subr.bf16.mxu0 %v3189_v16 }
  0x50   :  { %2199 = vmatprep.subr.bf16.mxu1 %v3198_v19 }
  0x52   :  { %2169 = vmatpush1.bf16.msra.mxu0 %v3210_v23 }
  0x53   :  { %2201 = vmatpush1.bf16.msra.mxu1 %v3220_v26  ;;  %2171 = vmatprep.subr.bf16.mxu0 %v3230_v29 }
  0x54   :  { %2203 = vmatprep.subr.bf16.mxu1 %v3239_v32 }
  0x56   :  { %2173 = vmatpush1.bf16.msra.mxu0 %v3251_v36 }
  0x57   :  { %2205 = vmatpush1.bf16.msra.mxu1 %v3261_v40  ;;  %2175 = vmatprep.subr.bf16.mxu0 %v3271_v44 }
  0x58   :  { %2207 = vmatprep.subr.bf16.mxu1 %v3280_v48 }
  0x5a   :  { %2177 = vmatpush1.bf16.msra.mxu0 %v3292_v54 }
  0x5b   :  { %2209 = vmatpush1.bf16.msra.mxu1 %v3302_v58  ;;  %2179 = vmatprep.subr.bf16.mxu0 %v3312_v62 }
  0x5c   :  { %2211 = vmatprep.subr.bf16.mxu1 %v3321_v4 }
  0x5e   :  { %2181 = vmatpush1.bf16.msra.mxu0 %v3333_v9 }
  0x5f   :  { %2213 = vmatpush1.bf16.msra.mxu1 %v3343_v14  ;;  %2183 = vmatprep.subr.bf16.mxu0 %v3353_v18 }
  0x60   :  { %2215 = vmatprep.subr.bf16.mxu1 %v3362_v22 }
  0x62   :  { %2185 = vmatpush1.bf16.msra.mxu0 %v3368_v25 }
  0x63   :  { %2217 = vmatpush1.bf16.msra.mxu1 %v3372_v27  ;;  %2219 = vmatprep.subr.bf16.mxu0 %v3065_v38 }
  0x64   :  { %2251 = vmatprep.subr.bf16.mxu1 %v3073_v41 }
 0x118   :  { %v517_v39 = vpop.f32.mrb[0].mxu0 }
 0x119   :  { %v2626_v43 = vadd.f32 %v517_v39, %v3422_v35  ;;  %v588_v45 = vpop.f32.mrb[0].mxu1  ;;  %v519_v46 = vpop.f32.mrb[1].mxu0 }
 0x11a   :  { %v2627_v49 = vadd.f32 %v519_v46, %v3424_v37  ;;  %v590_v51 = vpop.f32.mrb[1].mxu1  ;;  %v2642_v61 = vadd.f32 %v588_v45, %v3428_v55 }
 0x11b   :  { %v1949_v52 = vmul.f32 -1.442695, %v2626_v43  ;;  %v2643_v5 = vadd.f32 %v590_v51, %v3431_v0 }
 0x11c   :  { %v1950_v57 = vmul.f32 -1.442695, %v2627_v49  ;;  %v1951_v1 = vmul.f32 -1.442695, %v2642_v61 }
 0x11d   :  { %2693 = vpow2.f32 %v1949_v52 }
 0x11e   :  { %2695 = vpow2.f32 %v1950_v57 }
 0x11f   :  { %2697 = vpow2.f32 %v1951_v1 }
 0x120   :  { %2699 = vtanh.f32 %v2643_v5 }
 0x127   :  { %v2694_v7 = vpop.eup %2693 }
 0x128   :  { %v606_v8 = vadd.f32 1.0, %v2694_v7  ;;  %v2696_v11 = vpop.eup %2695 }
 0x129   :  { %v607_v12 = vadd.f32 1.0, %v2696_v11  ;;  %v2698_v15 = vpop.eup %2697 }
 0x12a   :  { %2701 = vrcp.f32 %v606_v8  ;;  %v2700_v17 = vpop.eup %2699  ;;  %v608_v28 = vadd.f32 1.0, %v2698_v15 }
 0x12b   :  { %2703 = vrcp.f32 %v607_v12 }
 0x12c   :  { %2705 = vrcp.f32 %v608_v28 }
 0x134   :  { %v2702_v20 = vpop.eup %2701 }
 0x135   :  { %v617_v21 = vmul.f32 %v2702_v20, %v2700_v17  ;;  %v2704_v24 = vpop.eup %2703 }
 0x136   :  { %v616_v30 = vmul.f32 0.0, %v2704_v24  ;;  %v2706_v33 = vpop.eup %2705 }
 0x138   :  { %v3434_v31 = vadd.f32 %v617_v21, %v616_v30 }
 0x13a   :  { %2707 = vtanh.f32 %v3434_v31 }
 0x144   :  { %v2708_v34 = vpop.eup %2707 }
 0x145   :  { %v620_v39 = vmul.f32 %v2708_v34, %v2706_v33 }
 0x147   :  { %691 = vmatmul.mubr.f32.vlgmr.msra.gmra.mrb[2].mxu0 %v620_v39  ;;  %762 = vmatmul.mubr.f32.vlgmr.msra.gmra.mrb[2].mxu1 %v620_v39 }
 0x148   :  { %2221 = vmatpush1.bf16.msra.mxu0 %v3090_v47  ;;  %2253 = vmatpush1.bf16.msra.mxu1 %v3099_v50 }
 0x149   :  { %2223 = vmatprep.subr.bf16.mxu0 %v3108_v53  ;;  %2255 = vmatprep.subr.bf16.mxu1 %v3116_v56 }
 0x14a   :  { %865 = vmatprep.mubr.f32.mxu0 %v2821_v3  ;;  %936 = vmatprep.mubr.f32.mxu1 %v2821_v3 }
 0x14c   :  { %2225 = vmatpush1.bf16.msra.mxu0 %v3128_v60  ;;  %2257 = vmatpush1.bf16.msra.mxu1 %v3138_v63 }
 0x14d   :  { %2227 = vmatprep.subr.bf16.mxu0 %v3148_v2  ;;  %2259 = vmatprep.subr.bf16.mxu1 %v3157_v6 }
 0x150   :  { %2229 = vmatpush1.bf16.msra.mxu0 %v3169_v10  ;;  %2261 = vmatpush1.bf16.msra.mxu1 %v3179_v13 }
 0x151   :  { %2231 = vmatprep.subr.bf16.mxu0 %v3189_v16  ;;  %2263 = vmatprep.subr.bf16.mxu1 %v3198_v19 }
 0x154   :  { %2233 = vmatpush1.bf16.msra.mxu0 %v3210_v23  ;;  %2265 = vmatpush1.bf16.msra.mxu1 %v3220_v26 }
 0x155   :  { %2235 = vmatprep.subr.bf16.mxu0 %v3230_v29  ;;  %2267 = vmatprep.subr.bf16.mxu1 %v3239_v32 }
 0x158   :  { %2237 = vmatpush1.bf16.msra.mxu0 %v3251_v36  ;;  %2269 = vmatpush1.bf16.msra.mxu1 %v3261_v40 }
 0x159   :  { %2239 = vmatprep.subr.bf16.mxu0 %v3271_v44  ;;  %2271 = vmatprep.subr.bf16.mxu1 %v3280_v48 }
 0x15c   :  { %2241 = vmatpush1.bf16.msra.mxu0 %v3292_v54  ;;  %2273 = vmatpush1.bf16.msra.mxu1 %v3302_v58 }
 0x15d   :  { %2243 = vmatprep.subr.bf16.mxu0 %v3312_v62  ;;  %2275 = vmatprep.subr.bf16.mxu1 %v3321_v4 }
 0x160   :  { %2245 = vmatpush1.bf16.msra.mxu0 %v3333_v9  ;;  %2277 = vmatpush1.bf16.msra.mxu1 %v3343_v14 }
 0x161   :  { %2247 = vmatprep.subr.bf16.mxu0 %v3353_v18  ;;  %2279 = vmatprep.subr.bf16.mxu1 %v3362_v22 }
 0x164   :  { %2249 = vmatpush1.bf16.msra.mxu0 %v3368_v25  ;;  %2281 = vmatpush1.bf16.msra.mxu1 %v3372_v27 }
 0x165   :  { %2283 = vmatprep.subr.bf16.mxu0 %v3065_v38  ;;  %2315 = vmatprep.subr.bf16.mxu1 %v3073_v41 }
 0x21a   :  { %v692_v42 = vpop.f32.mrb[2].mxu0  ;;  %v763_v43 = vpop.f32.mrb[2].mxu1 }
 0x21b   :  { %v2628_v45 = vadd.f32 %v692_v42, %v3422_v35  ;;  %v694_v46 = vpop.f32.mrb[3].mxu0  ;;  %v765_v49 = vpop.f32.mrb[3].mxu1  ;;  %v2644_v59 = vadd.f32 %v763_v43, %v3428_v55 }
 0x21c   :  { %v2629_v51 = vadd.f32 %v694_v46, %v3424_v37  ;;  %v2645_v61 = vadd.f32 %v765_v49, %v3431_v0 }
 0x21d   :  { %v1952_v52 = vmul.f32 -1.442695, %v2628_v45  ;;  %v1954_v1 = vmul.f32 -1.442695, %v2644_v59 }
 0x21e   :  { %v1953_v57 = vmul.f32 -1.442695, %v2629_v51 }
 0x21f   :  { %2709 = vpow2.f32 %v1952_v52 }
 0x220   :  { %2711 = vpow2.f32 %v1953_v57 }
 0x221   :  { %2713 = vtanh.f32 %v2645_v61 }
 0x222   :  { %2715 = vpow2.f32 %v1954_v1 }
 0x229   :  { %v2710_v5 = vpop.eup %2709 }
 0x22a   :  { %v781_v7 = vadd.f32 1.0, %v2710_v5  ;;  %v2712_v8 = vpop.eup %2711 }
 0x22b   :  { %v782_v11 = vadd.f32 1.0, %v2712_v8  ;;  %v2714_v12 = vpop.eup %2713 }
 0x22c   :  { %2717 = vrcp.f32 %v781_v7  ;;  %v2716_v15 = vpop.eup %2715 }
 0x22d   :  { %2719 = vrcp.f32 %v782_v11  ;;  %v783_v24 = vadd.f32 1.0, %v2716_v15 }
 0x22f   :  { %2721 = vrcp.f32 %v783_v24 }
 0x236   :  { %v2718_v17 = vpop.eup %2717 }
 0x237   :  { %v792_v20 = vmul.f32 %v2718_v17, %v2714_v12  ;;  %v2720_v21 = vpop.eup %2719 }
 0x238   :  { %v791_v28 = vmul.f32 %v2720_v21, %v3434_v31 }
 0x239   :  { %v2722_v33 = vpop.eup %2721 }
 0x23a   :  { %v3476_v30 = vadd.f32 %v792_v20, %v791_v28 }
 0x23c   :  { %2723 = vtanh.f32 %v3476_v30 }
 0x246   :  { %v2724_v34 = vpop.eup %2723 }
 0x247   :  { %v795_v39 = vmul.f32 %v2724_v34, %v2722_v33 }
 0x249   :  { %866 = vmatmul.mubr.f32.vlgmr.msra.gmra.mrb[4].mxu0 %v795_v39  ;;  %937 = vmatmul.mubr.f32.vlgmr.msra.gmra.mrb[4].mxu1 %v795_v39 }
 0x24a   :  { %2285 = vmatpush1.bf16.msra.mxu0 %v3090_v47  ;;  %2317 = vmatpush1.bf16.msra.mxu1 %v3099_v50 }
 0x24b   :  { %2287 = vmatprep.subr.bf16.mxu0 %v3108_v53  ;;  %2319 = vmatprep.subr.bf16.mxu1 %v3116_v56 }
 0x24c   :  { %1040 = vmatprep.mubr.f32.mxu0 %v2821_v3  ;;  %1111 = vmatprep.mubr.f32.mxu1 %v2821_v3 }
 0x24e   :  { %2289 = vmatpush1.bf16.msra.mxu0 %v3128_v60  ;;  %2321 = vmatpush1.bf16.msra.mxu1 %v3138_v63 }
 0x24f   :  { %2291 = vmatprep.subr.bf16.mxu0 %v3148_v2  ;;  %2323 = vmatprep.subr.bf16.mxu1 %v3157_v6 }
 0x252   :  { %2293 = vmatpush1.bf16.msra.mxu0 %v3169_v10  ;;  %2325 = vmatpush1.bf16.msra.mxu1 %v3179_v13 }
 0x253   :  { %2295 = vmatprep.subr.bf16.mxu0 %v3189_v16  ;;  %2327 = vmatprep.subr.bf16.mxu1 %v3198_v19 }
 0x256   :  { %2297 = vmatpush1.bf16.msra.mxu0 %v3210_v23  ;;  %2329 = vmatpush1.bf16.msra.mxu1 %v3220_v26 }
 0x257   :  { %2299 = vmatprep.subr.bf16.mxu0 %v3230_v29  ;;  %2331 = vmatprep.subr.bf16.mxu1 %v3239_v32 }
 0x25a   :  { %2301 = vmatpush1.bf16.msra.mxu0 %v3251_v36  ;;  %2333 = vmatpush1.bf16.msra.mxu1 %v3261_v40 }
 0x25b   :  { %2303 = vmatprep.subr.bf16.mxu0 %v3271_v44  ;;  %2335 = vmatprep.subr.bf16.mxu1 %v3280_v48 }
 0x25e   :  { %2305 = vmatpush1.bf16.msra.mxu0 %v3292_v54  ;;  %2337 = vmatpush1.bf16.msra.mxu1 %v3302_v58 }
 0x25f   :  { %2307 = vmatprep.subr.bf16.mxu0 %v3312_v62  ;;  %2339 = vmatprep.subr.bf16.mxu1 %v3321_v4 }
 0x262   :  { %2309 = vmatpush1.bf16.msra.mxu0 %v3333_v9  ;;  %2341 = vmatpush1.bf16.msra.mxu1 %v3343_v14 }
 0x263   :  { %2311 = vmatprep.subr.bf16.mxu0 %v3353_v18  ;;  %2343 = vmatprep.subr.bf16.mxu1 %v3362_v22 }
 0x266   :  { %2313 = vmatpush1.bf16.msra.mxu0 %v3368_v25  ;;  %2345 = vmatpush1.bf16.msra.mxu1 %v3372_v27 }
 0x267   :  { %2347 = vmatprep.subr.bf16.mxu0 %v3065_v38  ;;  %2379 = vmatprep.subr.bf16.mxu1 %v3073_v41 }
 0x31c   :  { %v867_v31 = vpop.f32.mrb[4].mxu0  ;;  %v938_v42 = vpop.f32.mrb[4].mxu1 }
 0x31d   :  { %v2630_v43 = vadd.f32 %v867_v31, %v3422_v35  ;;  %v869_v45 = vpop.f32.mrb[5].mxu0  ;;  %v940_v46 = vpop.f32.mrb[5].mxu1  ;;  %v2646_v57 = vadd.f32 %v938_v42, %v3428_v55 }
 0x31e   :  { %v2631_v49 = vadd.f32 %v869_v45, %v3424_v37  ;;  %v2647_v59 = vadd.f32 %v940_v46, %v3431_v0 }
 0x31f   :  { %v1955_v51 = vmul.f32 -1.442695, %v2630_v43  ;;  %v1957_v61 = vmul.f32 -1.442695, %v2646_v57 }
 0x320   :  { %v1956_v52 = vmul.f32 -1.442695, %v2631_v49 }
 0x321   :  { %2725 = vpow2.f32 %v1955_v51 }
 0x322   :  { %2727 = vpow2.f32 %v1956_v52 }
 0x323   :  { %2729 = vtanh.f32 %v2647_v59 }
 0x324   :  { %2731 = vpow2.f32 %v1957_v61 }
 0x32b   :  { %v2726_v1 = vpop.eup %2725 }
 0x32c   :  { %v956_v5 = vadd.f32 1.0, %v2726_v1  ;;  %v2728_v7 = vpop.eup %2727 }
 0x32d   :  { %v957_v8 = vadd.f32 1.0, %v2728_v7  ;;  %v2730_v11 = vpop.eup %2729 }
 0x32e   :  { %2733 = vrcp.f32 %v956_v5  ;;  %v2732_v12 = vpop.eup %2731 }
 0x32f   :  { %2735 = vrcp.f32 %v957_v8  ;;  %v958_v21 = vadd.f32 1.0, %v2732_v12 }
 0x331   :  { %2737 = vrcp.f32 %v958_v21 }
 0x338   :  { %v2734_v15 = vpop.eup %2733 }
 0x339   :  { %v967_v17 = vmul.f32 %v2734_v15, %v2730_v11  ;;  %v2736_v20 = vpop.eup %2735 }
 0x33a   :  { %v966_v24 = vmul.f32 %v2736_v20, %v3476_v30 }
 0x33b   :  { %v2738_v33 = vpop.eup %2737 }
 0x33c   :  { %v3518_v28 = vadd.f32 %v967_v17, %v966_v24 }
 0x33e   :  { %2739 = vtanh.f32 %v3518_v28 }
 0x348   :  { %v2740_v34 = vpop.eup %2739 }
 0x349   :  { %v970_v39 = vmul.f32 %v2740_v34, %v2738_v33 }
 0x34b   :  { %1041 = vmatmul.mubr.f32.vlgmr.msra.gmra.mrb[6].mxu0 %v970_v39  ;;  %1112 = vmatmul.mubr.f32.vlgmr.msra.gmra.mrb[6].mxu1 %v970_v39 }
 0x34c   :  { %2349 = vmatpush1.bf16.msra.mxu0 %v3090_v47  ;;  %2381 = vmatpush1.bf16.msra.mxu1 %v3099_v50 }
 0x34d   :  { %2351 = vmatprep.subr.bf16.mxu0 %v3108_v53  ;;  %2383 = vmatprep.subr.bf16.mxu1 %v3116_v56 }
 0x34e   :  { %1215 = vmatprep.mubr.f32.mxu0 %v2821_v3  ;;  %1286 = vmatprep.mubr.f32.mxu1 %v2821_v3 }
 0x350   :  { %2353 = vmatpush1.bf16.msra.mxu0 %v3128_v60  ;;  %2385 = vmatpush1.bf16.msra.mxu1 %v3138_v63 }
 0x351   :  { %2355 = vmatprep.subr.bf16.mxu0 %v3148_v2  ;;  %2387 = vmatprep.subr.bf16.mxu1 %v3157_v6 }
 0x354   :  { %2357 = vmatpush1.bf16.msra.mxu0 %v3169_v10  ;;  %2389 = vmatpush1.bf16.msra.mxu1 %v3179_v13 }
 0x355   :  { %2359 = vmatprep.subr.bf16.mxu0 %v3189_v16  ;;  %2391 = vmatprep.subr.bf16.mxu1 %v3198_v19 }
 0x358   :  { %2361 = vmatpush1.bf16.msra.mxu0 %v3210_v23  ;;  %2393 = vmatpush1.bf16.msra.mxu1 %v3220_v26 }
 0x359   :  { %2363 = vmatprep.subr.bf16.mxu0 %v3230_v29  ;;  %2395 = vmatprep.subr.bf16.mxu1 %v3239_v32 }
 0x35c   :  { %2365 = vmatpush1.bf16.msra.mxu0 %v3251_v36  ;;  %2397 = vmatpush1.bf16.msra.mxu1 %v3261_v40 }
 0x35d   :  { %2367 = vmatprep.subr.bf16.mxu0 %v3271_v44  ;;  %2399 = vmatprep.subr.bf16.mxu1 %v3280_v48 }
 0x360   :  { %2369 = vmatpush1.bf16.msra.mxu0 %v3292_v54  ;;  %2401 = vmatpush1.bf16.msra.mxu1 %v3302_v58 }
 0x361   :  { %2371 = vmatprep.subr.bf16.mxu0 %v3312_v62  ;;  %2403 = vmatprep.subr.bf16.mxu1 %v3321_v4 }
 0x364   :  { %2373 = vmatpush1.bf16.msra.mxu0 %v3333_v9  ;;  %2405 = vmatpush1.bf16.msra.mxu1 %v3343_v14 }
 0x365   :  { %2375 = vmatprep.subr.bf16.mxu0 %v3353_v18  ;;  %2407 = vmatprep.subr.bf16.mxu1 %v3362_v22 }
 0x368   :  { %2377 = vmatpush1.bf16.msra.mxu0 %v3368_v25  ;;  %2409 = vmatpush1.bf16.msra.mxu1 %v3372_v27 }
 0x369   :  { %2411 = vmatprep.subr.bf16.mxu0 %v3065_v38  ;;  %2443 = vmatprep.subr.bf16.mxu1 %v3073_v41 }
 0x41e   :  { %v1042_v30 = vpop.f32.mrb[6].mxu0  ;;  %v1113_v31 = vpop.f32.mrb[6].mxu1 }
 0x41f   :  { %v2632_v42 = vadd.f32 %v1042_v30, %v3422_v35  ;;  %v1044_v43 = vpop.f32.mrb[7].mxu0  ;;  %v1115_v45 = vpop.f32.mrb[7].mxu1  ;;  %v2648_v52 = vadd.f32 %v1113_v31, %v3428_v55 }
 0x420   :  { %v2633_v46 = vadd.f32 %v1044_v43, %v3424_v37  ;;  %v2649_v57 = vadd.f32 %v1115_v45, %v3431_v0 }
 0x421   :  { %v1958_v49 = vmul.f32 -1.442695, %v2632_v42  ;;  %v1960_v59 = vmul.f32 -1.442695, %v2648_v52 }
 0x422   :  { %v1959_v51 = vmul.f32 -1.442695, %v2633_v46 }
 0x423   :  { %2741 = vpow2.f32 %v1958_v49 }
 0x424   :  { %2743 = vpow2.f32 %v1959_v51 }
 0x425   :  { %2745 = vtanh.f32 %v2649_v57 }
 0x426   :  { %2747 = vpow2.f32 %v1960_v59 }
 0x42d   :  { %v2742_v61 = vpop.eup %2741 }
 0x42e   :  { %v1131_v1 = vadd.f32 1.0, %v2742_v61  ;;  %v2744_v5 = vpop.eup %2743 }
 0x42f   :  { %v1132_v7 = vadd.f32 1.0, %v2744_v5  ;;  %v2746_v8 = vpop.eup %2745 }
 0x430   :  { %2749 = vrcp.f32 %v1131_v1  ;;  %v2748_v11 = vpop.eup %2747 }
 0x431   :  { %2751 = vrcp.f32 %v1132_v7  ;;  %v1133_v20 = vadd.f32 1.0, %v2748_v11 }
 0x433   :  { %2753 = vrcp.f32 %v1133_v20 }
 0x43a   :  { %v2750_v12 = vpop.eup %2749 }
 0x43b   :  { %v1142_v15 = vmul.f32 %v2750_v12, %v2746_v8  ;;  %v2752_v17 = vpop.eup %2751 }
 0x43c   :  { %v1141_v21 = vmul.f32 %v2752_v17, %v3518_v28 }
 0x43d   :  { %v2754_v33 = vpop.eup %2753 }
 0x43e   :  { %v3560_v24 = vadd.f32 %v1142_v15, %v1141_v21 }
 0x440   :  { %2755 = vtanh.f32 %v3560_v24 }
 0x44a   :  { %v2756_v34 = vpop.eup %2755 }
 0x44b   :  { %v1145_v39 = vmul.f32 %v2756_v34, %v2754_v33 }
 0x44d   :  { %1216 = vmatmul.mubr.f32.vlgmr.msra.gmra.mrb[8].mxu0 %v1145_v39  ;;  %1287 = vmatmul.mubr.f32.vlgmr.msra.gmra.mrb[8].mxu1 %v1145_v39 }
 0x44e   :  { %2413 = vmatpush1.bf16.msra.mxu0 %v3090_v47  ;;  %2445 = vmatpush1.bf16.msra.mxu1 %v3099_v50 }
 0x44f   :  { %2415 = vmatprep.subr.bf16.mxu0 %v3108_v53  ;;  %2447 = vmatprep.subr.bf16.mxu1 %v3116_v56 }
 0x450   :  { %1390 = vmatprep.mubr.f32.mxu0 %v2821_v3  ;;  %1461 = vmatprep.mubr.f32.mxu1 %v2821_v3 }
 0x452   :  { %2417 = vmatpush1.bf16.msra.mxu0 %v3128_v60  ;;  %2449 = vmatpush1.bf16.msra.mxu1 %v3138_v63 }
 0x453   :  { %2419 = vmatprep.subr.bf16.mxu0 %v3148_v2  ;;  %2451 = vmatprep.subr.bf16.mxu1 %v3157_v6 }
 0x456   :  { %2421 = vmatpush1.bf16.msra.mxu0 %v3169_v10  ;;  %2453 = vmatpush1.bf16.msra.mxu1 %v3179_v13 }
 0x457   :  { %2423 = vmatprep.subr.bf16.mxu0 %v3189_v16  ;;  %2455 = vmatprep.subr.bf16.mxu1 %v3198_v19 }
 0x45a   :  { %2425 = vmatpush1.bf16.msra.mxu0 %v3210_v23  ;;  %2457 = vmatpush1.bf16.msra.mxu1 %v3220_v26 }
 0x45b   :  { %2427 = vmatprep.subr.bf16.mxu0 %v3230_v29  ;;  %2459 = vmatprep.subr.bf16.mxu1 %v3239_v32 }
 0x45e   :  { %2429 = vmatpush1.bf16.msra.mxu0 %v3251_v36  ;;  %2461 = vmatpush1.bf16.msra.mxu1 %v3261_v40 }
 0x45f   :  { %2431 = vmatprep.subr.bf16.mxu0 %v3271_v44  ;;  %2463 = vmatprep.subr.bf16.mxu1 %v3280_v48 }
 0x462   :  { %2433 = vmatpush1.bf16.msra.mxu0 %v3292_v54  ;;  %2465 = vmatpush1.bf16.msra.mxu1 %v3302_v58 }
 0x463   :  { %2435 = vmatprep.subr.bf16.mxu0 %v3312_v62  ;;  %2467 = vmatprep.subr.bf16.mxu1 %v3321_v4 }
 0x466   :  { %2437 = vmatpush1.bf16.msra.mxu0 %v3333_v9  ;;  %2469 = vmatpush1.bf16.msra.mxu1 %v3343_v14 }
 0x467   :  { %2439 = vmatprep.subr.bf16.mxu0 %v3353_v18  ;;  %2471 = vmatprep.subr.bf16.mxu1 %v3362_v22 }
 0x46a   :  { %2441 = vmatpush1.bf16.msra.mxu0 %v3368_v25  ;;  %2473 = vmatpush1.bf16.msra.mxu1 %v3372_v27 }
 0x46b   :  { %2475 = vmatprep.subr.bf16.mxu0 %v3065_v38  ;;  %2507 = vmatprep.subr.bf16.mxu1 %v3073_v41 }
 0x520   :  { %v1217_v28 = vpop.f32.mrb[8].mxu0  ;;  %v1288_v30 = vpop.f32.mrb[8].mxu1 }
 0x521   :  { %v2634_v31 = vadd.f32 %v1217_v28, %v3422_v35  ;;  %v1219_v42 = vpop.f32.mrb[9].mxu0  ;;  %v1290_v43 = vpop.f32.mrb[9].mxu1  ;;  %v2650_v51 = vadd.f32 %v1288_v30, %v3428_v55 }
 0x522   :  { %v2635_v45 = vadd.f32 %v1219_v42, %v3424_v37  ;;  %v2651_v52 = vadd.f32 %v1290_v43, %v3431_v0 }
 0x523   :  { %v1961_v46 = vmul.f32 -1.442695, %v2634_v31  ;;  %v1963_v57 = vmul.f32 -1.442695, %v2650_v51 }
 0x524   :  { %v1962_v49 = vmul.f32 -1.442695, %v2635_v45 }
 0x525   :  { %2757 = vpow2.f32 %v1961_v46 }
 0x526   :  { %2759 = vpow2.f32 %v1962_v49 }
 0x527   :  { %2761 = vtanh.f32 %v2651_v52 }
 0x528   :  { %2763 = vpow2.f32 %v1963_v57 }
 0x52f   :  { %v2758_v59 = vpop.eup %2757 }
 0x530   :  { %v1306_v61 = vadd.f32 1.0, %v2758_v59  ;;  %v2760_v1 = vpop.eup %2759 }
 0x531   :  { %v1307_v5 = vadd.f32 1.0, %v2760_v1  ;;  %v2762_v7 = vpop.eup %2761 }
 0x532   :  { %2765 = vrcp.f32 %v1306_v61  ;;  %v2764_v8 = vpop.eup %2763 }
 0x533   :  { %2767 = vrcp.f32 %v1307_v5  ;;  %v1308_v17 = vadd.f32 1.0, %v2764_v8 }
 0x535   :  { %2769 = vrcp.f32 %v1308_v17 }
 0x53c   :  { %v2766_v11 = vpop.eup %2765 }
 0x53d   :  { %v1317_v12 = vmul.f32 %v2766_v11, %v2762_v7  ;;  %v2768_v15 = vpop.eup %2767 }
 0x53e   :  { %v1316_v20 = vmul.f32 %v2768_v15, %v3560_v24 }
 0x53f   :  { %v2770_v33 = vpop.eup %2769 }
 0x540   :  { %v3602_v21 = vadd.f32 %v1317_v12, %v1316_v20 }
 0x542   :  { %2771 = vtanh.f32 %v3602_v21 }
 0x54c   :  { %v2772_v34 = vpop.eup %2771 }
 0x54d   :  { %v1320_v39 = vmul.f32 %v2772_v34, %v2770_v33  ;;  %v1854_v34 = vld [vmem:[%s3751_s4 + $0x18] sm:$0xff] }
 0x54f   :  { %1391 = vmatmul.mubr.f32.vlgmr.msra.gmra.mrb[10].mxu0 %v1320_v39  ;;  %1462 = vmatmul.mubr.f32.vlgmr.msra.gmra.mrb[10].mxu1 %v1320_v39 }
 0x550   :  { %2477 = vmatpush1.bf16.msra.mxu0 %v3090_v47  ;;  %2509 = vmatpush1.bf16.msra.mxu1 %v3099_v50 }
 0x551   :  { %2479 = vmatprep.subr.bf16.mxu0 %v3108_v53  ;;  %2511 = vmatprep.subr.bf16.mxu1 %v3116_v56 }
 0x552   :  { %1565 = vmatprep.mubr.f32.mxu0 %v2821_v3  ;;  %1636 = vmatprep.mubr.f32.mxu1 %v2821_v3 }
 0x554   :  { %2481 = vmatpush1.bf16.msra.mxu0 %v3128_v60  ;;  %2513 = vmatpush1.bf16.msra.mxu1 %v3138_v63 }
 0x555   :  { %2483 = vmatprep.subr.bf16.mxu0 %v3148_v2  ;;  %2515 = vmatprep.subr.bf16.mxu1 %v3157_v6 }
 0x558   :  { %2485 = vmatpush1.bf16.msra.mxu0 %v3169_v10  ;;  %2517 = vmatpush1.bf16.msra.mxu1 %v3179_v13 }
 0x559   :  { %2487 = vmatprep.subr.bf16.mxu0 %v3189_v16  ;;  %2519 = vmatprep.subr.bf16.mxu1 %v3198_v19 }
 0x55c   :  { %2489 = vmatpush1.bf16.msra.mxu0 %v3210_v23  ;;  %2521 = vmatpush1.bf16.msra.mxu1 %v3220_v26 }
 0x55d   :  { %2491 = vmatprep.subr.bf16.mxu0 %v3230_v29  ;;  %2523 = vmatprep.subr.bf16.mxu1 %v3239_v32 }
 0x560   :  { %2493 = vmatpush1.bf16.msra.mxu0 %v3251_v36  ;;  %2525 = vmatpush1.bf16.msra.mxu1 %v3261_v40 }
 0x561   :  { %2495 = vmatprep.subr.bf16.mxu0 %v3271_v44  ;;  %2527 = vmatprep.subr.bf16.mxu1 %v3280_v48 }
 0x564   :  { %2497 = vmatpush1.bf16.msra.mxu0 %v3292_v54  ;;  %2529 = vmatpush1.bf16.msra.mxu1 %v3302_v58 }
 0x565   :  { %2499 = vmatprep.subr.bf16.mxu0 %v3312_v62  ;;  %2531 = vmatprep.subr.bf16.mxu1 %v3321_v4 }
 0x568   :  { %2501 = vmatpush1.bf16.msra.mxu0 %v3333_v9  ;;  %2533 = vmatpush1.bf16.msra.mxu1 %v3343_v14 }
 0x569   :  { %2503 = vmatprep.subr.bf16.mxu0 %v3353_v18  ;;  %2535 = vmatprep.subr.bf16.mxu1 %v3362_v22 }
 0x56c   :  { %2505 = vmatpush1.bf16.msra.mxu0 %v3368_v25  ;;  %2537 = vmatpush1.bf16.msra.mxu1 %v3372_v27 }
 0x56d   :  { %2539 = vmatprep.subr.bf16.mxu0 %v3065_v38  ;;  %2571 = vmatprep.subr.bf16.mxu1 %v3073_v41 }
 0x622   :  { %v1392_v24 = vpop.f32.mrb[10].mxu0  ;;  %v1463_v28 = vpop.f32.mrb[10].mxu1 }
 0x623   :  { %v2636_v30 = vadd.f32 %v1392_v24, %v3422_v35  ;;  %v1394_v31 = vpop.f32.mrb[11].mxu0  ;;  %v1465_v42 = vpop.f32.mrb[11].mxu1  ;;  %v2652_v49 = vadd.f32 %v1463_v28, %v3428_v55  ;;  %v1855_v24 = vld [vmem:[%s3751_s4 + $0x20] sm:$0xff]  ;;  %v1856_v28 = vld [vmem:[%s3751_s4 + $0x28] sm:$0xff] }
 0x624   :  { %v2637_v43 = vadd.f32 %v1394_v31, %v3424_v37  ;;  %v2653_v51 = vadd.f32 %v1465_v42, %v3431_v0  ;;  %v1857_v31 = vld [vmem:[%s3751_s4 + $0x30] sm:$0xff]  ;;  %v1858_v42 = vld [vmem:[%s3751_s4 + $0x38] sm:$0xff] }
 0x625   :  { %v1964_v45 = vmul.f32 -1.442695, %v2636_v30  ;;  %v1966_v52 = vmul.f32 -1.442695, %v2652_v49  ;;  %v2609_v30 = vpack.c.bf16 %v1856_v28, %v1855_v24 }
 0x626   :  { %v1965_v46 = vmul.f32 -1.442695, %v2637_v43  ;;  %v2612_v43 = vpack.c.bf16 %v1858_v42, %v1857_v31 }
 0x627   :  { %2773 = vpow2.f32 %v1964_v45  ;;  %v1859_v45 = vld [vmem:[%s3751_s4 + $0x40] sm:$0xff] }
 0x628   :  { %2775 = vpow2.f32 %v1965_v46  ;;  %v1860_v46 = vld [vmem:[%s3751_s4 + $0x48] sm:$0xff] }
 0x629   :  { %2777 = vtanh.f32 %v2653_v51  ;;  %v2615_v49 = vpack.c.bf16 %v1860_v46, %v1859_v45  ;;  %v1861_v51 = vld [vmem:[%s3751_s4 + $0x50] sm:$0xff] }
 0x62a   :  { %2779 = vpow2.f32 %v1966_v52  ;;  %v1862_v52 = vld [vmem:[%s3751_s4 + $0x58] sm:$0xff] }
 0x631   :  { %v2774_v38 = vpop.eup %2773 }
 0x632   :  { %v1481_v57 = vadd.f32 1.0, %v2774_v38  ;;  %v2776_v41 = vpop.eup %2775  ;;  %v2618_v38 = vpack.c.bf16 %v1862_v52, %v1861_v51 }
 0x633   :  { %v1482_v59 = vadd.f32 1.0, %v2776_v41  ;;  %v2778_v61 = vpop.eup %2777  ;;  %v1864_v41 = vld [vmem:[%s3751_s4 + $0x68] sm:$0xff] }
 0x634   :  { %2781 = vrcp.f32 %v1481_v57  ;;  %v2780_v1 = vpop.eup %2779  ;;  %v1863_v57 = vld [vmem:[%s3751_s4 + $0x60] sm:$0xff] }
 0x635   :  { %2783 = vrcp.f32 %v1482_v59  ;;  %v1483_v11 = vadd.f32 1.0, %v2780_v1  ;;  %v2621_v59 = vpack.c.bf16 %v1864_v41, %v1863_v57  ;;  %v1866_v1 = vld [vmem:[%s3751_s4 + $0x78] sm:$0xff] }
 0x637   :  { %2785 = vrcp.f32 %v1483_v11 }
 0x63e   :  { %v2782_v5 = vpop.eup %2781 }
 0x63f   :  { %v1492_v7 = vmul.f32 %v2782_v5, %v2778_v61  ;;  %v2784_v8 = vpop.eup %2783  ;;  %v1865_v61 = vld [vmem:[%s3751_s4 + $0x70] sm:$0xff] }
 0x640   :  { %v1491_v12 = vmul.f32 %v2784_v8, %v3602_v21  ;;  %v1853_v21 = vld [vmem:[%s3751_s4 + $0x10] sm:$0xff]  ;;  %v2624_v5 = vpack.c.bf16 %v1866_v1, %v1865_v61 }
 0x641   :  { %v2786_v17 = vpop.eup %2785  ;;  %v2606_v39 = vpack.c.bf16 %v1854_v34, %v1853_v21 }
 0x642   :  { %v3644_v15 = vadd.f32 %v1492_v7, %v1491_v12 }
 0x644   :  { %2787 = vtanh.f32 %v3644_v15 }
 0x64e   :  { %v2788_v20 = vpop.eup %2787 }
 0x64f   :  { %v1495_v33 = vmul.f32 %v2788_v20, %v2786_v17 }
 0x651   :  { %1566 = vmatmul.mubr.f32.vlgmr.msra.gmra.mrb[12].mxu0 %v1495_v33  ;;  %1637 = vmatmul.mubr.f32.vlgmr.msra.gmra.mrb[12].mxu1 %v1495_v33 }
 0x652   :  { %2541 = vmatpush1.bf16.msra.mxu0 %v3090_v47  ;;  %2573 = vmatpush1.bf16.msra.mxu1 %v3099_v50 }
 0x653   :  { %2543 = vmatprep.subr.bf16.mxu0 %v3108_v53  ;;  %2575 = vmatprep.subr.bf16.mxu1 %v3116_v56 }
 0x654   :  { %1740 = vmatprep.mubr.f32.mxu0 %v2821_v3  ;;  %1811 = vmatprep.mubr.f32.mxu1 %v2821_v3 }
 0x656   :  { %2545 = vmatpush1.bf16.msra.mxu0 %v3128_v60  ;;  %2577 = vmatpush1.bf16.msra.mxu1 %v3138_v63 }
 0x657   :  { %2547 = vmatprep.subr.bf16.mxu0 %v3148_v2  ;;  %2579 = vmatprep.subr.bf16.mxu1 %v3157_v6 }
 0x65a   :  { %2549 = vmatpush1.bf16.msra.mxu0 %v3169_v10  ;;  %2581 = vmatpush1.bf16.msra.mxu1 %v3179_v13 }
 0x65b   :  { %2551 = vmatprep.subr.bf16.mxu0 %v3189_v16  ;;  %2583 = vmatprep.subr.bf16.mxu1 %v3198_v19 }
 0x65e   :  { %2553 = vmatpush1.bf16.msra.mxu0 %v3210_v23  ;;  %2585 = vmatpush1.bf16.msra.mxu1 %v3220_v26 }
 0x65f   :  { %2555 = vmatprep.subr.bf16.mxu0 %v3230_v29  ;;  %2587 = vmatprep.subr.bf16.mxu1 %v3239_v32 }
 0x662   :  { %2557 = vmatpush1.bf16.msra.mxu0 %v3251_v36  ;;  %2589 = vmatpush1.bf16.msra.mxu1 %v3261_v40 }
 0x663   :  { %2559 = vmatprep.subr.bf16.mxu0 %v3271_v44  ;;  %2591 = vmatprep.subr.bf16.mxu1 %v3280_v48 }
 0x666   :  { %2561 = vmatpush1.bf16.msra.mxu0 %v3292_v54  ;;  %2593 = vmatpush1.bf16.msra.mxu1 %v3302_v58 }
 0x667   :  { %2563 = vmatprep.subr.bf16.mxu0 %v3312_v62  ;;  %2595 = vmatprep.subr.bf16.mxu1 %v3321_v4 }
 0x66a   :  { %2565 = vmatpush1.bf16.msra.mxu0 %v3333_v9  ;;  %2597 = vmatpush1.bf16.msra.mxu1 %v3343_v14 }
 0x66b   :  { %2567 = vmatprep.subr.bf16.mxu0 %v3353_v18  ;;  %2599 = vmatprep.subr.bf16.mxu1 %v3362_v22  ;;  %v1851_v18 = vld [vmem:[%s3751_s4] sm:$0xff]  ;;  %v1852_v22 = vld [vmem:[%s3751_s4 + $0x8] sm:$0xff] }
 0x66e   :  { %2569 = vmatpush1.bf16.msra.mxu0 %v3368_v25  ;;  %2601 = vmatpush1.bf16.msra.mxu1 %v3372_v27  ;;  %v2603_v25 = vpack.c.bf16 %v1852_v22, %v1851_v18  ;;  %v2822_v27 = vmov 0.0|0.0  }
 0x66f   :  { %2602 = vmatprep.subr.bf16.mxu0 %v2822_v27 }
 0x724   :  { %v1567_v47 = vpop.f32.mrb[12].mxu0  ;;  %v1638_v50 = vpop.f32.mrb[12].mxu1 }
 0x725   :  { %v2638_v53 = vadd.f32 %v1567_v47, %v3422_v35  ;;  %v1569_v56 = vpop.f32.mrb[13].mxu0  ;;  %v1640_v60 = vpop.f32.mrb[13].mxu1  ;;  %v2654_v10 = vadd.f32 %v1638_v50, %v3428_v55 }
 0x726   :  { %v2639_v63 = vadd.f32 %v1569_v56, %v3424_v37  ;;  %v2655_v13 = vadd.f32 %v1640_v60, %v3431_v0 }
 0x727   :  { %v1967_v2 = vmul.f32 -1.442695, %v2638_v53  ;;  %v1969_v16 = vmul.f32 -1.442695, %v2654_v10 }
 0x728   :  { %v1968_v6 = vmul.f32 -1.442695, %v2639_v63 }
 0x729   :  { %2789 = vpow2.f32 %v1967_v2 }
 0x72a   :  { %2791 = vpow2.f32 %v1968_v6 }
 0x72b   :  { %2793 = vtanh.f32 %v2655_v13 }
 0x72c   :  { %2795 = vpow2.f32 %v1969_v16 }
 0x733   :  { %v2790_v19 = vpop.eup %2789 }
 0x734   :  { %v1656_v23 = vadd.f32 1.0, %v2790_v19  ;;  %v2792_v26 = vpop.eup %2791 }
 0x735   :  { %v1657_v29 = vadd.f32 1.0, %v2792_v26  ;;  %v2794_v32 = vpop.eup %2793  ;;  %v1973_v26 = vld [vmem:[%s3752_s5] ss:$0 sm:$0xff] }
 0x736   :  { %2797 = vrcp.f32 %v1656_v23  ;;  %v2796_v36 = vpop.eup %2795 }
 0x737   :  { %2799 = vrcp.f32 %v1657_v29  ;;  %v1658_v54 = vadd.f32 1.0, %v2796_v36 }
 0x739   :  { %2801 = vrcp.f32 %v1658_v54 }
 0x740   :  { %v2798_v40 = vpop.eup %2797 }
 0x741   :  { %v1667_v44 = vmul.f32 %v2798_v40, %v2794_v32  ;;  %v2800_v48 = vpop.eup %2799 }
 0x742   :  { %v1666_v58 = vmul.f32 %v2800_v48, %v3644_v15 }
 0x743   :  { %v2802_v4 = vpop.eup %2801 }
 0x744   :  { %v3684_v62 = vadd.f32 %v1667_v44, %v1666_v58 }
 0x746   :  { %2803 = vtanh.f32 %v3684_v62 }
 0x750   :  { %v2804_v9 = vpop.eup %2803 }
 0x751   :  { %v1670_v14 = vmul.f32 %v2804_v9, %v2802_v4 }
 0x753   :  { %1741 = vmatmul.mubr.f32.vlgmr.msra.gmra.mrb[14].mxu0 %v1670_v14  ;;  %1812 = vmatmul.mubr.f32.vlgmr.msra.gmra.mrb[14].mxu1 %v1670_v14 }
 0x754   :  { %2604 = vmatpush3.bf16.msra.mxu0 %v2603_v25  ;;  %2023 = vmatprep.mubr.msk.f32.mxu0 %vm2823_vm0, %v2821_v3 }
 0x755   :  { %2605 = vmatprep.subr.bf16.mxu0 %v2822_v27 }
 0x758   :  { %2607 = vmatpush3.bf16.msra.mxu0 %v2606_v39 }
 0x759   :  { %2608 = vmatprep.subr.bf16.mxu0 %v2822_v27 }
 0x75c   :  { %2610 = vmatpush3.bf16.msra.mxu0 %v2609_v30 }
 0x75d   :  { %2611 = vmatprep.subr.bf16.mxu0 %v2822_v27 }
 0x760   :  { %2613 = vmatpush3.bf16.msra.mxu0 %v2612_v43 }
 0x761   :  { %2614 = vmatprep.subr.bf16.mxu0 %v2822_v27 }
 0x764   :  { %2616 = vmatpush3.bf16.msra.mxu0 %v2615_v49 }
 0x765   :  { %2617 = vmatprep.subr.bf16.mxu0 %v2822_v27 }
 0x768   :  { %2619 = vmatpush3.bf16.msra.mxu0 %v2618_v38 }
 0x769   :  { %2620 = vmatprep.subr.bf16.mxu0 %v2822_v27 }
 0x76c   :  { %2622 = vmatpush3.bf16.msra.mxu0 %v2621_v59 }
 0x76d   :  { %2623 = vmatprep.subr.bf16.mxu0 %v2822_v27 }
 0x770   :  { %2625 = vmatpush3.bf16.msra.mxu0 %v2624_v5 }
 0x826   :  { %v1742_v7 = vpop.f32.mrb[14].mxu0  ;;  %v1813_v8 = vpop.f32.mrb[14].mxu1 }
 0x827   :  { %v2640_v11 = vadd.f32 %v1742_v7, %v3422_v35  ;;  %v1744_v3 = vpop.f32.mrb[15].mxu0  ;;  %v1815_v12 = vpop.f32.mrb[15].mxu1  ;;  %v2656_v33 = vadd.f32 %v1813_v8, %v3428_v55 }
 0x828   :  { %v2641_v15 = vadd.f32 %v1744_v3, %v3424_v37  ;;  %v2657_v47 = vadd.f32 %v1815_v12, %v3431_v0 }
 0x829   :  { %v1970_v17 = vmul.f32 -1.442695, %v2640_v11  ;;  %v1972_v50 = vmul.f32 -1.442695, %v2656_v33 }
 0x82a   :  { %v1971_v20 = vmul.f32 -1.442695, %v2641_v15 }
 0x82b   :  { %2805 = vpow2.f32 %v1970_v17 }
 0x82c   :  { %2807 = vpow2.f32 %v1971_v20 }
 0x82d   :  { %2809 = vtanh.f32 %v2657_v47 }
 0x82e   :  { %2811 = vpow2.f32 %v1972_v50 }
 0x835   :  { %v2806_v53 = vpop.eup %2805 }
 0x836   :  { %v1831_v56 = vadd.f32 1.0, %v2806_v53  ;;  %v2808_v60 = vpop.eup %2807 }
 0x837   :  { %v1832_v35 = vadd.f32 1.0, %v2808_v60  ;;  %v2810_v63 = vpop.eup %2809 }
 0x838   :  { %2813 = vrcp.f32 %v1831_v56  ;;  %v2812_v2 = vpop.eup %2811 }
 0x839   :  { %2815 = vrcp.f32 %v1832_v35  ;;  %v1833_v13 = vadd.f32 1.0, %v2812_v2 }
 0x83b   :  { %2817 = vrcp.f32 %v1833_v13 }
 0x842   :  { %v2814_v37 = vpop.eup %2813 }
 0x843   :  { %v1842_v6 = vmul.f32 %v2814_v37, %v2810_v63  ;;  %v2816_v10 = vpop.eup %2815 }
 0x844   :  { %v1841_v16 = vmul.f32 %v2816_v10, %v3684_v62 }
 0x845   :  { %v2818_v0 = vpop.eup %2817 }
 0x846   :  { %v1843_v55 = vadd.f32 %v1842_v6, %v1841_v16 }
 0x848   :  { %2819 = vtanh.f32 %v1843_v55 }
 0x852   :  { %v2820_v19 = vpop.eup %2819 }
 0x853   :  { %v1845_v23 = vmul.f32 %v2820_v19, %v2818_v0 }
 0x855   :  { %2024 = vmatmul.mubr.f32.vlgmr.msra.gmra.mrb[16].mxu0 %v1845_v23 }
 0x928   :  { %v1940_v29 = vpop.f32.mrb[16].mxu0 }
 0x929   :  { %v1941_v32 = vadd.f32 %v1973_v26, %v1940_v29  ;;  %v2025_v36 = vpop.f32.mrb[17].mxu0 }
 0x92b   :  { %1944 = vst [vmem:[%s3753_s6] sm:$0xff] %v1941_v32 }

// kernel: stock_lstm_forward.2
= control target key start
LH: loop header
LB: loop body
LE: loop exit
PB: predicated region body
PF: predicated region fallthrough
CT: control target
= control target key end

     0   :  { %9 = vsyncpa [#allocation6], 0  ;;  %s3770_s0 = inlined_call_operand.vmem [shape: f32[8,8,128], index: 0, kind: input, shape index: {}]   ;;  %s3771_s1 = inlined_call_operand.hbm [shape: f32[128,512], index: 1, kind: input, shape index: {}]   ;;  %s3772_s2 = inlined_call_operand.vmem [shape: f32[1,512], index: 2, kind: input, shape index: {}]   ;;  %s3773_s3 = inlined_call_operand.hbm [shape: f32[128,512], index: 3, kind: input, shape index: {}]   ;;  %s3774_s4 = inlined_call_operand.vmem [shape: f32[8,8,128], index: 4, kind: output, shape index: {}]  }
   0x1   :  { %10 = vsyncpa [#allocation8], 0  ;;  %s3191_s15 = smov [#allocation5]   ;;  %s3143_s19 = scalar_lea.hbm %s3771_s1, 8192 }
   0x2   :  { %s18_s16 = sshll.u32 %s3191_s15, 4  ;;  %p3144_p0 = scmp.ne.s32.totalorder %s3771_s1, %s3143_s19  ;;  %s19_s16 = int_to_ptr.vmem [resolvable:$true] %s18_s16 }
   0x3   :  { %p3147_p1 = scmp.lt.u32.totalorder %s3143_s19, %s3771_s1 }
   0x5   :  { %p3149_p2 = pnand %p3147_p1, %p3144_p0 }
   0x7   :  { %3152 = shalt.err (!%p3149_p2)
}
   0x8   :  { %s3153_s24 = scalar_lea.vmem %s19_s16, 8192  ;;  %p3158_p4 = scmp.lt.s32.totalorder %s19_s16, %s19_s16 }
   0x9   :  { %p3154_p3 = scmp.ne.s32.totalorder %s19_s16, %s3153_s24  ;;  %p3159_p5 = scmp.lt.s32.totalorder %s3153_s24, %s3153_s24 }
   0xb   :  { %p3160_p6 = por %p3159_p5, %p3158_p4 }
   0xd   :  { %p3161_p7 = pnand %p3160_p6, %p3154_p3 }
   0xf   :  { %3164 = shalt.err (!%p3161_p7)
}
  0x10   :  { %s3192_s25 = smov 512   ;;  %s3193_s26 = smov 32  }
  0x11   :  { %24 = dma.hbm_to_vmem [thread:$0]  %s3771_s1, 8192, %s19_s16, [#allocation6], %s3192_s25, %s3192_s25, %s3193_s26  }
  0x12   :  { %s3194_s29 = smov [#allocation7]   ;;  %s3165_s7 = scalar_lea.hbm %s3773_s3, 8192 }
  0x13   :  { %s32_s30 = sshll.u32 %s3194_s29, 4  ;;  %p3166_p8 = scmp.ne.s32.totalorder %s3773_s3, %s3165_s7  ;;  %s33_s30 = int_to_ptr.vmem [resolvable:$true] %s32_s30 }
  0x14   :  { %p3169_p9 = scmp.lt.u32.totalorder %s3165_s7, %s3773_s3 }
  0x16   :  { %p3171_p10 = pnand %p3169_p9, %p3166_p8 }
  0x18   :  { %3174 = shalt.err (!%p3171_p10)
}
  0x19   :  { %s3175_s12 = scalar_lea.vmem %s33_s30, 8192  ;;  %p3180_p12 = scmp.lt.s32.totalorder %s33_s30, %s33_s30 }
  0x1a   :  { %p3176_p11 = scmp.ne.s32.totalorder %s33_s30, %s3175_s12  ;;  %p3181_p13 = scmp.lt.s32.totalorder %s3175_s12, %s3175_s12 }
  0x1c   :  { %p3182_p0 = por %p3181_p13, %p3180_p12 }
  0x1e   :  { %p3183_p1 = pnand %p3182_p0, %p3176_p11 }
  0x20   :  { %3186 = shalt.err (!%p3183_p1)
}
  0x21   :  { %38 = dma.hbm_to_vmem [thread:$0]  %s3773_s3, 8192, %s33_s30, [#allocation8], %s3192_s25, %s3192_s25, %s3193_s26  }
  0x22   :  { %3187 = dma.done.wait [#allocation6], 8192  }
  0x23   :  { %3188 = vsyncadd [#allocation6], 4294959104 }
  0x24   :  { %3189 = dma.done.wait [#allocation8], 8192  }
  0x25   :  { %3190 = vsyncadd [#allocation8], 4294959104  ;;  %v3195_v0 = vmov 0.0   ;;  %v60_v1 = vld [vmem:[#allocation5 + $0x8] sm:$0xff]  ;;  %v62_v3 = vld [vmem:[#allocation5 + $0x18] sm:$0xff] }
  0x26   :  { %209 = vmatprep.mubr.f32.mxu0 %v3195_v0  ;;  %322 = vmatprep.mubr.f32.mxu1 %v3195_v0  ;;  %v64_v2 = vld [vmem:[#allocation5 + $0x28] sm:$0xff]  ;;  %v66_v5 = vld [vmem:[#allocation5 + $0x38] sm:$0xff]  ;;  %v59_v6 = vld [vmem:[#allocation5] sm:$0xff] }
  0x27   :  { %v2370_v4 = vpack.c.bf16 %v64_v2, %v60_v1  ;;  %v63_v7 = vld [vmem:[#allocation5 + $0x20] sm:$0xff]  ;;  %v2402_v8 = vpack.c.bf16 %v66_v5, %v62_v3  ;;  %v61_v10 = vld [vmem:[#allocation5 + $0x10] sm:$0xff]  ;;  %v68_v12 = vld [vmem:[#allocation5 + $0x48] sm:$0xff] }
  0x28   :  { %v2372_v9 = vpack.c.bf16 %v63_v7, %v59_v6  ;;  %v65_v11 = vld [vmem:[#allocation5 + $0x30] sm:$0xff]  ;;  %v72_v14 = vld [vmem:[#allocation5 + $0x68] sm:$0xff]  ;;  %v70_v15 = vld [vmem:[#allocation5 + $0x58] sm:$0xff] }
  0x29   :  { %2371 = vmatprep.subr.bf16.mxu0 %v2370_v4  ;;  %v2404_v13 = vpack.c.bf16 %v65_v11, %v61_v10  ;;  %v74_v16 = vld [vmem:[#allocation5 + $0x78] sm:$0xff]  ;;  %2403 = vmatprep.subr.bf16.mxu1 %v2402_v8  ;;  %v2374_v17 = vpack.c.bf16 %v72_v14, %v68_v12  ;;  %v67_v19 = vld [vmem:[#allocation5 + $0x40] sm:$0xff]  ;;  %v69_v21 = vld [vmem:[#allocation5 + $0x50] sm:$0xff] }
  0x2a   :  { %2373 = vmatpush1.bf16.msra.mxu0 %v2372_v9  ;;  %v2406_v18 = vpack.c.bf16 %v74_v16, %v70_v15  ;;  %v71_v20 = vld [vmem:[#allocation5 + $0x60] sm:$0xff]  ;;  %v73_v23 = vld [vmem:[#allocation5 + $0x70] sm:$0xff]  ;;  %v76_v24 = vld [vmem:[#allocation5 + $0x88] sm:$0xff] }
  0x2b   :  { %2405 = vmatpush1.bf16.msra.mxu1 %v2404_v13  ;;  %v2376_v22 = vpack.c.bf16 %v71_v20, %v67_v19  ;;  %v80_v25 = vld [vmem:[#allocation5 + $0xa8] sm:$0xff]  ;;  %2375 = vmatprep.subr.bf16.mxu0 %v2374_v17  ;;  %v2408_v26 = vpack.c.bf16 %v73_v23, %v69_v21  ;;  %v78_v28 = vld [vmem:[#allocation5 + $0x98] sm:$0xff]  ;;  %v75_v30 = vld [vmem:[#allocation5 + $0x80] sm:$0xff] }
  0x2c   :  { %2407 = vmatprep.subr.bf16.mxu1 %v2406_v18  ;;  %v2378_v27 = vpack.c.bf16 %v80_v25, %v76_v24  ;;  %v82_v29 = vld [vmem:[#allocation5 + $0xb8] sm:$0xff]  ;;  %v79_v32 = vld [vmem:[#allocation5 + $0xa0] sm:$0xff]  ;;  %v77_v33 = vld [vmem:[#allocation5 + $0x90] sm:$0xff] }
  0x2d   :  { %v2410_v31 = vpack.c.bf16 %v82_v29, %v78_v28  ;;  %v81_v34 = vld [vmem:[#allocation5 + $0xb0] sm:$0xff]  ;;  %v2380_v35 = vpack.c.bf16 %v79_v32, %v75_v30  ;;  %v84_v36 = vld [vmem:[#allocation5 + $0xc8] sm:$0xff]  ;;  %v86_v38 = vld [vmem:[#allocation5 + $0xd8] sm:$0xff] }
  0x2e   :  { %2377 = vmatpush1.bf16.msra.mxu0 %v2376_v22  ;;  %v88_v37 = vld [vmem:[#allocation5 + $0xe8] sm:$0xff]  ;;  %v2412_v39 = vpack.c.bf16 %v81_v34, %v77_v33  ;;  %v90_v41 = vld [vmem:[#allocation5 + $0xf8] sm:$0xff]  ;;  %v83_v42 = vld [vmem:[#allocation5 + $0xc0] sm:$0xff] }
  0x2f   :  { %2409 = vmatpush1.bf16.msra.mxu1 %v2408_v26  ;;  %2379 = vmatprep.subr.bf16.mxu0 %v2378_v27  ;;  %v2382_v40 = vpack.c.bf16 %v88_v37, %v84_v36  ;;  %v87_v43 = vld [vmem:[#allocation5 + $0xe0] sm:$0xff]  ;;  %v2414_v44 = vpack.c.bf16 %v90_v41, %v86_v38  ;;  %v85_v45 = vld [vmem:[#allocation5 + $0xd0] sm:$0xff]  ;;  %v92_v47 = vld [vmem:[#allocation5 + $0x108] sm:$0xff] }
  0x30   :  { %2411 = vmatprep.subr.bf16.mxu1 %v2410_v31  ;;  %v89_v46 = vld [vmem:[#allocation5 + $0xf0] sm:$0xff]  ;;  %v96_v48 = vld [vmem:[#allocation5 + $0x128] sm:$0xff]  ;;  %v94_v49 = vld [vmem:[#allocation5 + $0x118] sm:$0xff]  ;;  %v2384_v51 = vpack.c.bf16 %v87_v43, %v83_v42 }
  0x31   :  { %v98_v50 = vld [vmem:[#allocation5 + $0x138] sm:$0xff]  ;;  %v2416_v52 = vpack.c.bf16 %v89_v46, %v85_v45  ;;  %v2386_v53 = vpack.c.bf16 %v96_v48, %v92_v47  ;;  %v91_v54 = vld [vmem:[#allocation5 + $0x100] sm:$0xff]  ;;  %v93_v56 = vld [vmem:[#allocation5 + $0x110] sm:$0xff] }
  0x32   :  { %2381 = vmatpush1.bf16.msra.mxu0 %v2380_v35  ;;  %v95_v55 = vld [vmem:[#allocation5 + $0x120] sm:$0xff]  ;;  %v2418_v57 = vpack.c.bf16 %v98_v50, %v94_v49  ;;  %v97_v58 = vld [vmem:[#allocation5 + $0x130] sm:$0xff]  ;;  %v100_v59 = vld [vmem:[#allocation5 + $0x148] sm:$0xff] }
  0x33   :  { %2413 = vmatpush1.bf16.msra.mxu1 %v2412_v39  ;;  %2383 = vmatprep.subr.bf16.mxu0 %v2382_v40  ;;  %v104_v60 = vld [vmem:[#allocation5 + $0x168] sm:$0xff]  ;;  %v102_v61 = vld [vmem:[#allocation5 + $0x158] sm:$0xff]  ;;  %v2388_v63 = vpack.c.bf16 %v95_v55, %v91_v54  ;;  %v2420_v1 = vpack.c.bf16 %v97_v58, %v93_v56  ;;  %v99_v3 = vld [vmem:[#allocation5 + $0x140] sm:$0xff] }
  0x34   :  { %2415 = vmatprep.subr.bf16.mxu1 %v2414_v44  ;;  %v106_v62 = vld [vmem:[#allocation5 + $0x178] sm:$0xff]  ;;  %v2390_v2 = vpack.c.bf16 %v104_v60, %v100_v59  ;;  %v103_v4 = vld [vmem:[#allocation5 + $0x160] sm:$0xff]  ;;  %v101_v5 = vld [vmem:[#allocation5 + $0x150] sm:$0xff] }
  0x35   :  { %v2422_v6 = vpack.c.bf16 %v106_v62, %v102_v61  ;;  %v105_v7 = vld [vmem:[#allocation5 + $0x170] sm:$0xff]  ;;  %v108_v8 = vld [vmem:[#allocation5 + $0x188] sm:$0xff]  ;;  %v110_v10 = vld [vmem:[#allocation5 + $0x198] sm:$0xff]  ;;  %v2392_v12 = vpack.c.bf16 %v103_v4, %v99_v3 }
  0x36   :  { %2385 = vmatpush1.bf16.msra.mxu0 %v2384_v51  ;;  %v112_v9 = vld [vmem:[#allocation5 + $0x1a8] sm:$0xff]  ;;  %v114_v11 = vld [vmem:[#allocation5 + $0x1b8] sm:$0xff]  ;;  %v2424_v13 = vpack.c.bf16 %v105_v7, %v101_v5  ;;  %v107_v15 = vld [vmem:[#allocation5 + $0x180] sm:$0xff] }
  0x37   :  { %2417 = vmatpush1.bf16.msra.mxu1 %v2416_v52  ;;  %2387 = vmatprep.subr.bf16.mxu0 %v2386_v53  ;;  %v2394_v14 = vpack.c.bf16 %v112_v9, %v108_v8  ;;  %v111_v16 = vld [vmem:[#allocation5 + $0x1a0] sm:$0xff]  ;;  %v109_v17 = vld [vmem:[#allocation5 + $0x190] sm:$0xff]  ;;  %v2426_v18 = vpack.c.bf16 %v114_v11, %v110_v10  ;;  %v116_v20 = vld [vmem:[#allocation5 + $0x1c8] sm:$0xff] }
  0x38   :  { %2419 = vmatprep.subr.bf16.mxu1 %v2418_v57  ;;  %v113_v19 = vld [vmem:[#allocation5 + $0x1b0] sm:$0xff]  ;;  %v120_v21 = vld [vmem:[#allocation5 + $0x1e8] sm:$0xff]  ;;  %v118_v22 = vld [vmem:[#allocation5 + $0x1d8] sm:$0xff]  ;;  %v2396_v24 = vpack.c.bf16 %v111_v16, %v107_v15 }
  0x39   :  { %v122_v23 = vld [vmem:[#allocation5 + $0x1f8] sm:$0xff]  ;;  %v2428_v25 = vpack.c.bf16 %v113_v19, %v109_v17  ;;  %v2398_v26 = vpack.c.bf16 %v120_v21, %v116_v20  ;;  %v115_v27 = vld [vmem:[#allocation5 + $0x1c0] sm:$0xff]  ;;  %v117_v29 = vld [vmem:[#allocation5 + $0x1d0] sm:$0xff] }
  0x3a   :  { %2389 = vmatpush1.bf16.msra.mxu0 %v2388_v63  ;;  %v119_v28 = vld [vmem:[#allocation5 + $0x1e0] sm:$0xff]  ;;  %v2430_v30 = vpack.c.bf16 %v122_v23, %v118_v22  ;;  %v121_v31 = vld [vmem:[#allocation5 + $0x1f0] sm:$0xff]  ;;  %v410_v32 = vld [vmem:[#allocation7 + $0x8] sm:$0xff] }
  0x3b   :  { %2421 = vmatpush1.bf16.msra.mxu1 %v2420_v1  ;;  %2391 = vmatprep.subr.bf16.mxu0 %v2390_v2  ;;  %v414_v33 = vld [vmem:[#allocation7 + $0x28] sm:$0xff]  ;;  %v412_v34 = vld [vmem:[#allocation7 + $0x18] sm:$0xff]  ;;  %v2400_v36 = vpack.c.bf16 %v119_v28, %v115_v27  ;;  %v2432_v37 = vpack.c.bf16 %v121_v31, %v117_v29  ;;  %v409_v39 = vld [vmem:[#allocation7] sm:$0xff] }
  0x3c   :  { %2423 = vmatprep.subr.bf16.mxu1 %v2422_v6  ;;  %v416_v35 = vld [vmem:[#allocation7 + $0x38] sm:$0xff]  ;;  %v3247_v38 = vpack.c.bf16 %v414_v33, %v410_v32  ;;  %v413_v40 = vld [vmem:[#allocation7 + $0x20] sm:$0xff]  ;;  %v411_v42 = vld [vmem:[#allocation7 + $0x10] sm:$0xff] }
  0x3d   :  { %v3249_v41 = vpack.c.bf16 %v416_v35, %v412_v34  ;;  %v415_v43 = vld [vmem:[#allocation7 + $0x30] sm:$0xff]  ;;  %v418_v44 = vld [vmem:[#allocation7 + $0x48] sm:$0xff]  ;;  %v51_v46 = vld [vmem:[%s3770_s0] sm:$0xff]  ;;  %v3254_v47 = vpack.c.bf16 %v413_v40, %v409_v39 }
  0x3e   :  { %2393 = vmatpush1.bf16.msra.mxu0 %v2392_v12  ;;  %v422_v45 = vld [vmem:[#allocation7 + $0x68] sm:$0xff]  ;;  %v420_v48 = vld [vmem:[#allocation7 + $0x58] sm:$0xff]  ;;  %v3257_v50 = vpack.c.bf16 %v415_v43, %v411_v42  ;;  %v417_v51 = vld [vmem:[#allocation7 + $0x40] sm:$0xff] }
  0x3f   :  { %2425 = vmatpush1.bf16.msra.mxu1 %v2424_v13  ;;  %2395 = vmatprep.subr.bf16.mxu0 %v2394_v14  ;;  %v424_v49 = vld [vmem:[#allocation7 + $0x78] sm:$0xff]  ;;  %v421_v52 = vld [vmem:[#allocation7 + $0x60] sm:$0xff]  ;;  %v3260_v53 = vpack.c.bf16 %v422_v45, %v418_v44  ;;  %v419_v54 = vld [vmem:[#allocation7 + $0x50] sm:$0xff] }
  0x40   :  { %2427 = vmatprep.subr.bf16.mxu1 %v2426_v18  ;;  %v423_v55 = vld [vmem:[#allocation7 + $0x70] sm:$0xff]  ;;  %v3262_v56 = vpack.c.bf16 %v424_v49, %v420_v48  ;;  %v426_v57 = vld [vmem:[#allocation7 + $0x88] sm:$0xff]  ;;  %v3268_v60 = vpack.c.bf16 %v421_v52, %v417_v51  ;;  %v428_v61 = vld [vmem:[#allocation7 + $0x98] sm:$0xff] }
  0x41   :  { %v430_v58 = vld [vmem:[#allocation7 + $0xa8] sm:$0xff]  ;;  %v432_v62 = vld [vmem:[#allocation7 + $0xb8] sm:$0xff]  ;;  %v3272_v63 = vpack.c.bf16 %v423_v55, %v419_v54  ;;  %v425_v1 = vld [vmem:[#allocation7 + $0x80] sm:$0xff] }
  0x42   :  { %2397 = vmatpush1.bf16.msra.mxu0 %v2396_v24  ;;  %v52_v59 = vld [vmem:[%s3770_s0 + $0x8] sm:$0xff]  ;;  %v429_v2 = vld [vmem:[#allocation7 + $0xa0] sm:$0xff]  ;;  %v3276_v3 = vpack.c.bf16 %v430_v58, %v426_v57  ;;  %v427_v4 = vld [vmem:[#allocation7 + $0x90] sm:$0xff]  ;;  %v3279_v6 = vpack.c.bf16 %v432_v62, %v428_v61 }
  0x43   :  { %2429 = vmatpush1.bf16.msra.mxu1 %v2428_v25  ;;  %2399 = vmatprep.subr.bf16.mxu0 %v2398_v26  ;;  %v431_v5 = vld [vmem:[#allocation7 + $0xb0] sm:$0xff]  ;;  %v434_v7 = vld [vmem:[#allocation7 + $0xc8] sm:$0xff]  ;;  %v3285_v10 = vpack.c.bf16 %v429_v2, %v425_v1  ;;  %v436_v11 = vld [vmem:[#allocation7 + $0xd8] sm:$0xff] }
  0x44   :  { %2431 = vmatprep.subr.bf16.mxu1 %v2430_v30  ;;  %v438_v8 = vld [vmem:[#allocation7 + $0xe8] sm:$0xff]  ;;  %v53_v9 = vld [vmem:[%s3770_s0 + $0x10] sm:$0xff]  ;;  %v440_v12 = vld [vmem:[#allocation7 + $0xf8] sm:$0xff]  ;;  %v3289_v13 = vpack.c.bf16 %v431_v5, %v427_v4 }
  0x45   :  { %v433_v14 = vld [vmem:[#allocation7 + $0xc0] sm:$0xff]  ;;  %v3293_v16 = vpack.c.bf16 %v438_v8, %v434_v7  ;;  %v435_v17 = vld [vmem:[#allocation7 + $0xd0] sm:$0xff]  ;;  %v3296_v19 = vpack.c.bf16 %v440_v12, %v436_v11  ;;  %v442_v20 = vld [vmem:[#allocation7 + $0x108] sm:$0xff] }
  0x46   :  { %2401 = vmatpush1.bf16.msra.mxu0 %v2400_v36  ;;  %v437_v15 = vld [vmem:[#allocation7 + $0xe0] sm:$0xff]  ;;  %v439_v18 = vld [vmem:[#allocation7 + $0xf0] sm:$0xff]  ;;  %v446_v21 = vld [vmem:[#allocation7 + $0x128] sm:$0xff] }
  0x47   :  { %2433 = vmatpush1.bf16.msra.mxu1 %v2432_v37  ;;  %2435 = vmatprep.subr.bf16.mxu0 %v3247_v38  ;;  %v54_v22 = vld [vmem:[%s3770_s0 + $0x18] sm:$0xff]  ;;  %v3302_v23 = vpack.c.bf16 %v437_v15, %v433_v14  ;;  %v3306_v26 = vpack.c.bf16 %v439_v18, %v435_v17  ;;  %v441_v27 = vld [vmem:[#allocation7 + $0x100] sm:$0xff]  ;;  %v3310_v29 = vpack.c.bf16 %v446_v21, %v442_v20  ;;  %v443_v30 = vld [vmem:[#allocation7 + $0x110] sm:$0xff] }
  0x48   :  { %2467 = vmatprep.subr.bf16.mxu1 %v3249_v41  ;;  %v444_v24 = vld [vmem:[#allocation7 + $0x118] sm:$0xff]  ;;  %v445_v28 = vld [vmem:[#allocation7 + $0x120] sm:$0xff]  ;;  %v447_v31 = vld [vmem:[#allocation7 + $0x130] sm:$0xff] }
  0x49   :  { %210 = vmatmul.mubr.f32.vlgmr.msra.gmra.mrb[0].mxu0 %v51_v46  ;;  %v448_v25 = vld [vmem:[#allocation7 + $0x138] sm:$0xff]  ;;  %v450_v33 = vld [vmem:[#allocation7 + $0x148] sm:$0xff]  ;;  %v55_v35 = vld [vmem:[%s3770_s0 + $0x20] sm:$0xff]  ;;  %v3319_v36 = vpack.c.bf16 %v445_v28, %v441_v27  ;;  %v3323_v40 = vpack.c.bf16 %v447_v31, %v443_v30  ;;  %v125_v28 = vlaneseq }
  0x4a   :  { %323 = vmatmul.mubr.f32.vlgmr.msra.gmra.mrb[0].mxu1 %v51_v46  ;;  %2437 = vmatpush1.bf16.msra.mxu0 %v3254_v47  ;;  %v3313_v32 = vpack.c.bf16 %v448_v25, %v444_v24  ;;  %v454_v34 = vld [vmem:[#allocation7 + $0x168] sm:$0xff]  ;;  %v452_v37 = vld [vmem:[#allocation7 + $0x158] sm:$0xff]  ;;  %v449_v42 = vld [vmem:[#allocation7 + $0x140] sm:$0xff] }
  0x4b   :  { %2469 = vmatpush1.bf16.msra.mxu1 %v3257_v50  ;;  %215 = vmatprep.mubr.f32.mxu0 %v3195_v0  ;;  %v456_v39 = vld [vmem:[#allocation7 + $0x178] sm:$0xff]  ;;  %v453_v43 = vld [vmem:[#allocation7 + $0x160] sm:$0xff]  ;;  %v3327_v44 = vpack.c.bf16 %v454_v34, %v450_v33  ;;  %v451_v45 = vld [vmem:[#allocation7 + $0x150] sm:$0xff]  ;;  %v126_v30 = vshrl.u32 %v125_v28, 7 }
  0x4c   :  { %328 = vmatprep.mubr.f32.mxu1 %v3195_v0  ;;  %2439 = vmatprep.subr.bf16.mxu0 %v3260_v53  ;;  %v455_v46 = vld [vmem:[#allocation7 + $0x170] sm:$0xff]  ;;  %v3330_v48 = vpack.c.bf16 %v456_v39, %v452_v37  ;;  %v458_v49 = vld [vmem:[#allocation7 + $0x188] sm:$0xff]  ;;  %v3336_v54 = vpack.c.bf16 %v453_v43, %v449_v42  ;;  %v460_v55 = vld [vmem:[#allocation7 + $0x198] sm:$0xff] }
  0x4d   :  { %216 = vmatmul.mubr.f32.gmra.mrb[2].mxu0 %v52_v59  ;;  %2471 = vmatprep.subr.bf16.mxu1 %v3262_v56  ;;  %v462_v51 = vld [vmem:[#allocation7 + $0x1a8] sm:$0xff]  ;;  %v464_v57 = vld [vmem:[#allocation7 + $0x1b8] sm:$0xff]  ;;  %v3340_v58 = vpack.c.bf16 %v455_v46, %v451_v45  ;;  %v461_v61 = vld [vmem:[#allocation7 + $0x1a0] sm:$0xff]  ;;  %v127_v31 = vsub.s32 0, %v126_v30  ;;  %v131_v34 = vsub.s32 1, %v126_v30  ;;  %v135_v42 = vsub.s32 2, %v126_v30 }
  0x4e   :  { %329 = vmatmul.mubr.f32.gmra.mrb[2].mxu1 %v52_v59  ;;  %2441 = vmatpush1.bf16.msra.mxu0 %v3268_v60  ;;  %v56_v52 = vld [vmem:[%s3770_s0 + $0x28] sm:$0xff]  ;;  %v457_v59 = vld [vmem:[#allocation7 + $0x180] sm:$0xff]  ;;  %v3344_v62 = vpack.c.bf16 %v462_v51, %v458_v49  ;;  %v459_v1 = vld [vmem:[#allocation7 + $0x190] sm:$0xff]  ;;  %v3347_v4 = vpack.c.bf16 %v464_v57, %v460_v55  ;;  %v139_v55 = vsub.s32 3, %v126_v30 }
  0x4f   :  { %2473 = vmatpush1.bf16.msra.mxu1 %v3272_v63  ;;  %221 = vmatprep.mubr.f32.mxu0 %v3195_v0  ;;  %v463_v2 = vld [vmem:[#allocation7 + $0x1b0] sm:$0xff]  ;;  %v466_v5 = vld [vmem:[#allocation7 + $0x1c8] sm:$0xff]  ;;  %v468_v11 = vld [vmem:[#allocation7 + $0x1d8] sm:$0xff] }
  0x50   :  { %334 = vmatprep.mubr.f32.mxu1 %v3195_v0  ;;  %2443 = vmatprep.subr.bf16.mxu0 %v3276_v3  ;;  %v470_v7 = vld [vmem:[#allocation7 + $0x1e8] sm:$0xff]  ;;  %v57_v8 = vld [vmem:[%s3770_s0 + $0x30] sm:$0xff]  ;;  %v472_v12 = vld [vmem:[#allocation7 + $0x1f8] sm:$0xff]  ;;  %v3357_v14 = vpack.c.bf16 %v463_v2, %v459_v1 }
  0x51   :  { %222 = vmatmul.mubr.f32.gmra.mrb[4].mxu0 %v53_v9  ;;  %2475 = vmatprep.subr.bf16.mxu1 %v3279_v6  ;;  %v465_v15 = vld [vmem:[#allocation7 + $0x1c0] sm:$0xff]  ;;  %v3361_v18 = vpack.c.bf16 %v470_v7, %v466_v5  ;;  %v467_v20 = vld [vmem:[#allocation7 + $0x1d0] sm:$0xff]  ;;  %v58_v24 = vld [vmem:[%s3770_s0 + $0x38] sm:$0xff] }
  0x52   :  { %335 = vmatmul.mubr.f32.gmra.mrb[4].mxu1 %v53_v9  ;;  %2445 = vmatpush1.bf16.msra.mxu0 %v3285_v10  ;;  %v3353_v9 = vpack.c.bf16 %v461_v61, %v457_v59  ;;  %v469_v17 = vld [vmem:[#allocation7 + $0x1e0] sm:$0xff]  ;;  %v471_v21 = vld [vmem:[#allocation7 + $0x1f0] sm:$0xff] }
  0x53   :  { %2477 = vmatpush1.bf16.msra.mxu1 %v3289_v13  ;;  %227 = vmatprep.mubr.f32.mxu0 %v3195_v0  ;;  %v3370_v25 = vpack.c.bf16 %v469_v17, %v465_v15  ;;  %v3374_v27 = vpack.c.bf16 %v471_v21, %v467_v20  ;;  %v123_v33 = vld [vmem:[%s3772_s2] sm:$0xf] }
  0x54   :  { %340 = vmatprep.mubr.f32.mxu1 %v3195_v0  ;;  %2447 = vmatprep.subr.bf16.mxu0 %v3293_v16  ;;  %v3426_v37 = vrot.slane %v123_v33, %v131_v34  ;;  %v3430_v51 = vrot.slane %v123_v33, %v135_v42  ;;  %v3433_v59 = vrot.slane %v123_v33, %v139_v55 }
  0x55   :  { %228 = vmatmul.mubr.f32.gmra.mrb[6].mxu0 %v54_v22  ;;  %2479 = vmatprep.subr.bf16.mxu1 %v3296_v19 }
  0x56   :  { %341 = vmatmul.mubr.f32.gmra.mrb[6].mxu1 %v54_v22  ;;  %2449 = vmatpush1.bf16.msra.mxu0 %v3302_v23  ;;  %v3364_v22 = vpack.c.bf16 %v472_v12, %v468_v11 }
  0x57   :  { %2481 = vmatpush1.bf16.msra.mxu1 %v3306_v26  ;;  %233 = vmatprep.mubr.f32.mxu0 %v3195_v0 }
  0x58   :  { %346 = vmatprep.mubr.f32.mxu1 %v3195_v0  ;;  %2451 = vmatprep.subr.bf16.mxu0 %v3310_v29 }
  0x59   :  { %234 = vmatmul.mubr.f32.gmra.mrb[8].mxu0 %v55_v35  ;;  %2483 = vmatprep.subr.bf16.mxu1 %v3313_v32 }
  0x5a   :  { %347 = vmatmul.mubr.f32.gmra.mrb[8].mxu1 %v55_v35  ;;  %2453 = vmatpush1.bf16.msra.mxu0 %v3319_v36  ;;  %v3424_v35 = vrot.slane %v123_v33, %v127_v31 }
  0x5b   :  { %2485 = vmatpush1.bf16.msra.mxu1 %v3323_v40  ;;  %239 = vmatprep.mubr.f32.mxu0 %v3195_v0 }
  0x5c   :  { %352 = vmatprep.mubr.f32.mxu1 %v3195_v0  ;;  %2455 = vmatprep.subr.bf16.mxu0 %v3327_v44 }
  0x5d   :  { %240 = vmatmul.mubr.f32.gmra.mrb[10].mxu0 %v56_v52  ;;  %2487 = vmatprep.subr.bf16.mxu1 %v3330_v48 }
  0x5e   :  { %353 = vmatmul.mubr.f32.gmra.mrb[10].mxu1 %v56_v52  ;;  %2457 = vmatpush1.bf16.msra.mxu0 %v3336_v54 }
  0x5f   :  { %2489 = vmatpush1.bf16.msra.mxu1 %v3340_v58  ;;  %245 = vmatprep.mubr.f32.mxu0 %v3195_v0 }
  0x60   :  { %358 = vmatprep.mubr.f32.mxu1 %v3195_v0  ;;  %2459 = vmatprep.subr.bf16.mxu0 %v3344_v62 }
  0x61   :  { %246 = vmatmul.mubr.f32.gmra.mrb[12].mxu0 %v57_v8  ;;  %2491 = vmatprep.subr.bf16.mxu1 %v3347_v4 }
  0x62   :  { %359 = vmatmul.mubr.f32.gmra.mrb[12].mxu1 %v57_v8  ;;  %2461 = vmatpush1.bf16.msra.mxu0 %v3353_v9 }
  0x63   :  { %2493 = vmatpush1.bf16.msra.mxu1 %v3357_v14  ;;  %251 = vmatprep.mubr.f32.mxu0 %v3195_v0 }
  0x64   :  { %364 = vmatprep.mubr.f32.mxu1 %v3195_v0  ;;  %2463 = vmatprep.subr.bf16.mxu0 %v3361_v18 }
  0x65   :  { %252 = vmatmul.mubr.f32.gmra.mrb[14].mxu0 %v58_v24  ;;  %2495 = vmatprep.subr.bf16.mxu1 %v3364_v22 }
  0x66   :  { %365 = vmatmul.mubr.f32.gmra.mrb[14].mxu1 %v58_v24  ;;  %2465 = vmatpush1.bf16.msra.mxu0 %v3370_v25 }
  0x67   :  { %2497 = vmatpush1.bf16.msra.mxu1 %v3374_v27  ;;  %537 = vmatprep.mubr.f32.mxu0 %v3195_v0 }
  0x68   :  { %608 = vmatprep.mubr.f32.mxu1 %v3195_v0  ;;  %2499 = vmatprep.subr.bf16.mxu0 %v3247_v38 }
  0x69   :  { %538 = vmatmul.mubr.f32.vlgmr.msra.gmra.mrb[0].mxu0 %v3195_v0  ;;  %2531 = vmatprep.subr.bf16.mxu1 %v3249_v41 }
  0x6a   :  { %609 = vmatmul.mubr.f32.vlgmr.msra.gmra.mrb[0].mxu1 %v3195_v0  ;;  %2501 = vmatpush1.bf16.msra.mxu0 %v3254_v47 }
  0x6b   :  { %2533 = vmatpush1.bf16.msra.mxu1 %v3257_v50  ;;  %2503 = vmatprep.subr.bf16.mxu0 %v3260_v53 }
  0x6c   :  { %2535 = vmatprep.subr.bf16.mxu1 %v3262_v56  ;;  %777 = vmatprep.mubr.f32.mxu0 %v3195_v0 }
  0x6d   :  { %848 = vmatprep.mubr.f32.mxu1 %v3195_v0 }
  0x6e   :  { %2505 = vmatpush1.bf16.msra.mxu0 %v3268_v60 }
  0x6f   :  { %2537 = vmatpush1.bf16.msra.mxu1 %v3272_v63  ;;  %2507 = vmatprep.subr.bf16.mxu0 %v3276_v3 }
  0x70   :  { %2539 = vmatprep.subr.bf16.mxu1 %v3279_v6 }
  0x72   :  { %2509 = vmatpush1.bf16.msra.mxu0 %v3285_v10 }
  0x73   :  { %2541 = vmatpush1.bf16.msra.mxu1 %v3289_v13  ;;  %2511 = vmatprep.subr.bf16.mxu0 %v3293_v16 }
  0x74   :  { %2543 = vmatprep.subr.bf16.mxu1 %v3296_v19 }
  0x76   :  { %2513 = vmatpush1.bf16.msra.mxu0 %v3302_v23 }
  0x77   :  { %2545 = vmatpush1.bf16.msra.mxu1 %v3306_v26  ;;  %2515 = vmatprep.subr.bf16.mxu0 %v3310_v29 }
  0x78   :  { %2547 = vmatprep.subr.bf16.mxu1 %v3313_v32 }
  0x7a   :  { %2517 = vmatpush1.bf16.msra.mxu0 %v3319_v36 }
  0x7b   :  { %2549 = vmatpush1.bf16.msra.mxu1 %v3323_v40  ;;  %2519 = vmatprep.subr.bf16.mxu0 %v3327_v44 }
  0x7c   :  { %2551 = vmatprep.subr.bf16.mxu1 %v3330_v48 }
  0x7e   :  { %2521 = vmatpush1.bf16.msra.mxu0 %v3336_v54 }
  0x7f   :  { %2553 = vmatpush1.bf16.msra.mxu1 %v3340_v58  ;;  %2523 = vmatprep.subr.bf16.mxu0 %v3344_v62 }
  0x80   :  { %2555 = vmatprep.subr.bf16.mxu1 %v3347_v4 }
  0x82   :  { %2525 = vmatpush1.bf16.msra.mxu0 %v3353_v9 }
  0x83   :  { %2557 = vmatpush1.bf16.msra.mxu1 %v3357_v14  ;;  %2527 = vmatprep.subr.bf16.mxu0 %v3361_v18 }
  0x84   :  { %2559 = vmatprep.subr.bf16.mxu1 %v3364_v22 }
  0x86   :  { %2529 = vmatpush1.bf16.msra.mxu0 %v3370_v25 }
  0x87   :  { %2561 = vmatpush1.bf16.msra.mxu1 %v3374_v27  ;;  %2563 = vmatprep.subr.bf16.mxu0 %v3247_v38 }
  0x88   :  { %2595 = vmatprep.subr.bf16.mxu1 %v3249_v41 }
 0x13c   :  { %v539_v39 = vpop.f32.mrb[0].mxu0 }
 0x13d   :  { %v2946_v43 = vadd.f32 %v539_v39, %v3424_v35  ;;  %v610_v45 = vpop.f32.mrb[0].mxu1  ;;  %v541_v38 = vpop.f32.mrb[1].mxu0 }
 0x13e   :  { %v2947_v41 = vadd.f32 %v541_v38, %v3426_v37  ;;  %v612_v46 = vpop.f32.mrb[1].mxu1  ;;  %v2962_v57 = vadd.f32 %v610_v45, %v3430_v51 }
 0x13f   :  { %v2339_v49 = vmul.f32 -1.442695, %v2946_v43  ;;  %v2963_v1 = vadd.f32 %v612_v46, %v3433_v59 }
 0x140   :  { %v2340_v52 = vmul.f32 -1.442695, %v2947_v41  ;;  %v2341_v61 = vmul.f32 -1.442695, %v2962_v57 }
 0x141   :  { %3015 = vpow2.f32 %v2339_v49 }
 0x142   :  { %3017 = vpow2.f32 %v2340_v52 }
 0x143   :  { %3019 = vpow2.f32 %v2341_v61 }
 0x144   :  { %3021 = vtanh.f32 %v2963_v1 }
 0x14b   :  { %v3016_v2 = vpop.eup %3015 }
 0x14c   :  { %v628_v5 = vadd.f32 1.0, %v3016_v2  ;;  %v3018_v7 = vpop.eup %3017 }
 0x14d   :  { %v629_v8 = vadd.f32 1.0, %v3018_v7  ;;  %v3020_v11 = vpop.eup %3019 }
 0x14e   :  { %3023 = vrcp.f32 %v628_v5  ;;  %v3022_v12 = vpop.eup %3021  ;;  %v630_v21 = vadd.f32 1.0, %v3020_v11 }
 0x14f   :  { %3025 = vrcp.f32 %v629_v8 }
 0x150   :  { %3027 = vrcp.f32 %v630_v21 }
 0x158   :  { %v3024_v15 = vpop.eup %3023 }
 0x159   :  { %v639_v17 = vmul.f32 %v3024_v15, %v3022_v12  ;;  %v3026_v20 = vpop.eup %3025  ;;  %v1132_v15 = vld [vmem:[#allocation7 + $0x8] sm:$0xff] }
 0x15a   :  { %v638_v24 = vmul.f32 0.0, %v3026_v20  ;;  %v3028_v30 = vpop.eup %3027  ;;  %v1134_v20 = vld [vmem:[#allocation7 + $0x18] sm:$0xff] }
 0x15c   :  { %v3436_v28 = vadd.f32 %v639_v17, %v638_v24  ;;  %v1136_v17 = vld [vmem:[#allocation7 + $0x28] sm:$0xff]  ;;  %v1138_v24 = vld [vmem:[#allocation7 + $0x38] sm:$0xff] }
 0x15d   :  { %v3487_v21 = vpack.c.bf16 %v1136_v17, %v1132_v15  ;;  %v1390_v15 = vld [vmem:[#allocation7 + $0x90] sm:$0xff] }
 0x15e   :  { %3029 = vtanh.f32 %v3436_v28  ;;  %v1394_v17 = vld [vmem:[#allocation7 + $0xb0] sm:$0xff] }
 0x168   :  { %v3030_v31 = vpop.eup %3029 }
 0x169   :  { %v642_v33 = vmul.f32 %v3030_v31, %v3028_v30  ;;  %v1135_v30 = vld [vmem:[#allocation7 + $0x20] sm:$0xff]  ;;  %v3489_v31 = vpack.c.bf16 %v1138_v24, %v1134_v20  ;;  %v3563_v20 = vpack.c.bf16 %v1394_v17, %v1390_v15  ;;  %v1397_v24 = vld [vmem:[#allocation7 + $0xc8] sm:$0xff]  ;;  %v1422_v15 = vld [vmem:[#allocation7 + $0x190] sm:$0xff] }
 0x16b   :  { %643 = vst [vmem:[%s3774_s4] sm:$0xff] %v642_v33  ;;  %778 = vmatmul.mubr.f32.vlgmr.msra.gmra.mrb[2].mxu0 %v642_v33  ;;  %849 = vmatmul.mubr.f32.vlgmr.msra.gmra.mrb[2].mxu1 %v642_v33 }
 0x16c   :  { %2565 = vmatpush1.bf16.msra.mxu0 %v3254_v47  ;;  %2597 = vmatpush1.bf16.msra.mxu1 %v3257_v50 }
 0x16d   :  { %2567 = vmatprep.subr.bf16.mxu0 %v3260_v53  ;;  %2599 = vmatprep.subr.bf16.mxu1 %v3262_v56 }
 0x16e   :  { %1018 = vmatprep.mubr.f32.mxu0 %v3195_v0  ;;  %1089 = vmatprep.mubr.f32.mxu1 %v3195_v0 }
 0x170   :  { %2569 = vmatpush1.bf16.msra.mxu0 %v3268_v60  ;;  %2601 = vmatpush1.bf16.msra.mxu1 %v3272_v63 }
 0x171   :  { %2571 = vmatprep.subr.bf16.mxu0 %v3276_v3  ;;  %2603 = vmatprep.subr.bf16.mxu1 %v3279_v6 }
 0x174   :  { %2573 = vmatpush1.bf16.msra.mxu0 %v3285_v10  ;;  %2605 = vmatpush1.bf16.msra.mxu1 %v3289_v13 }
 0x175   :  { %2575 = vmatprep.subr.bf16.mxu0 %v3293_v16  ;;  %2607 = vmatprep.subr.bf16.mxu1 %v3296_v19 }
 0x178   :  { %2577 = vmatpush1.bf16.msra.mxu0 %v3302_v23  ;;  %2609 = vmatpush1.bf16.msra.mxu1 %v3306_v26 }
 0x179   :  { %2579 = vmatprep.subr.bf16.mxu0 %v3310_v29  ;;  %2611 = vmatprep.subr.bf16.mxu1 %v3313_v32 }
 0x17c   :  { %2581 = vmatpush1.bf16.msra.mxu0 %v3319_v36  ;;  %2613 = vmatpush1.bf16.msra.mxu1 %v3323_v40 }
 0x17d   :  { %2583 = vmatprep.subr.bf16.mxu0 %v3327_v44  ;;  %2615 = vmatprep.subr.bf16.mxu1 %v3330_v48 }
 0x180   :  { %2585 = vmatpush1.bf16.msra.mxu0 %v3336_v54  ;;  %2617 = vmatpush1.bf16.msra.mxu1 %v3340_v58 }
 0x181   :  { %2587 = vmatprep.subr.bf16.mxu0 %v3344_v62  ;;  %2619 = vmatprep.subr.bf16.mxu1 %v3347_v4 }
 0x184   :  { %2589 = vmatpush1.bf16.msra.mxu0 %v3353_v9  ;;  %2621 = vmatpush1.bf16.msra.mxu1 %v3357_v14 }
 0x185   :  { %2591 = vmatprep.subr.bf16.mxu0 %v3361_v18  ;;  %2623 = vmatprep.subr.bf16.mxu1 %v3364_v22 }
 0x188   :  { %2593 = vmatpush1.bf16.msra.mxu0 %v3370_v25  ;;  %2625 = vmatpush1.bf16.msra.mxu1 %v3374_v27 }
 0x189   :  { %2627 = vmatprep.subr.bf16.mxu0 %v3487_v21  ;;  %2659 = vmatprep.subr.bf16.mxu1 %v3489_v31 }
 0x23e   :  { %v779_v47 = vpop.f32.mrb[2].mxu0  ;;  %v850_v50 = vpop.f32.mrb[2].mxu1 }
 0x23f   :  { %v2948_v53 = vadd.f32 %v779_v47, %v3424_v35  ;;  %v781_v56 = vpop.f32.mrb[3].mxu0  ;;  %v852_v60 = vpop.f32.mrb[3].mxu1  ;;  %v2964_v42 = vadd.f32 %v850_v50, %v3430_v51  ;;  %v1133_v47 = vld [vmem:[#allocation7 + $0x10] sm:$0xff] }
 0x240   :  { %v2949_v63 = vadd.f32 %v781_v56, %v3426_v37  ;;  %v2965_v43 = vadd.f32 %v852_v60, %v3433_v59  ;;  %v1137_v50 = vld [vmem:[#allocation7 + $0x30] sm:$0xff]  ;;  %v1140_v56 = vld [vmem:[#allocation7 + $0x48] sm:$0xff] }
 0x241   :  { %v2342_v34 = vmul.f32 -1.442695, %v2948_v53  ;;  %v2344_v45 = vmul.f32 -1.442695, %v2964_v42  ;;  %v3494_v53 = vpack.c.bf16 %v1137_v50, %v1133_v47  ;;  %v1144_v60 = vld [vmem:[#allocation7 + $0x68] sm:$0xff]  ;;  %v1139_v42 = vld [vmem:[#allocation7 + $0x40] sm:$0xff] }
 0x242   :  { %v2343_v39 = vmul.f32 -1.442695, %v2949_v63  ;;  %v1142_v63 = vld [vmem:[#allocation7 + $0x58] sm:$0xff] }
 0x243   :  { %3031 = vpow2.f32 %v2342_v34  ;;  %v3499_v34 = vpack.c.bf16 %v1144_v60, %v1140_v56  ;;  %v1403_v50 = vld [vmem:[#allocation7 + $0xf8] sm:$0xff]  ;;  %v1396_v56 = vld [vmem:[#allocation7 + $0xc0] sm:$0xff] }
 0x244   :  { %3033 = vpow2.f32 %v2343_v39  ;;  %v1146_v39 = vld [vmem:[#allocation7 + $0x78] sm:$0xff]  ;;  %v1400_v60 = vld [vmem:[#allocation7 + $0xe0] sm:$0xff] }
 0x245   :  { %3035 = vtanh.f32 %v2965_v43  ;;  %v1143_v43 = vld [vmem:[#allocation7 + $0x60] sm:$0xff] }
 0x246   :  { %3037 = vpow2.f32 %v2344_v45  ;;  %v3501_v45 = vpack.c.bf16 %v1146_v39, %v1142_v63  ;;  %v3572_v39 = vpack.c.bf16 %v1400_v60, %v1396_v56  ;;  %v1431_v60 = vld [vmem:[#allocation7 + $0x1d8] sm:$0xff] }
 0x24d   :  { %v3032_v38 = vpop.eup %3031 }
 0x24e   :  { %v868_v41 = vadd.f32 1.0, %v3032_v38  ;;  %v3034_v46 = vpop.eup %3033  ;;  %v3503_v38 = vpack.c.bf16 %v1143_v43, %v1139_v42  ;;  %v1398_v42 = vld [vmem:[#allocation7 + $0xd0] sm:$0xff] }
 0x24f   :  { %v869_v49 = vadd.f32 1.0, %v3034_v46  ;;  %v3036_v52 = vpop.eup %3035  ;;  %v1145_v46 = vld [vmem:[#allocation7 + $0x70] sm:$0xff] }
 0x250   :  { %3039 = vrcp.f32 %v868_v41  ;;  %v3038_v55 = vpop.eup %3037  ;;  %v1141_v41 = vld [vmem:[#allocation7 + $0x50] sm:$0xff] }
 0x251   :  { %3041 = vrcp.f32 %v869_v49  ;;  %v870_v2 = vadd.f32 1.0, %v3038_v55  ;;  %v3506_v49 = vpack.c.bf16 %v1145_v46, %v1141_v41  ;;  %v1402_v43 = vld [vmem:[#allocation7 + $0xf0] sm:$0xff]  ;;  %v1405_v46 = vld [vmem:[#allocation7 + $0x108] sm:$0xff] }
 0x252   :  { %v3575_v41 = vpack.c.bf16 %v1402_v43, %v1398_v42  ;;  %v1435_v42 = vld [vmem:[#allocation7 + $0x1f8] sm:$0xff]  ;;  %v1428_v43 = vld [vmem:[#allocation7 + $0x1c0] sm:$0xff] }
 0x253   :  { %3043 = vrcp.f32 %v870_v2 }
 0x25a   :  { %v3040_v57 = vpop.eup %3039 }
 0x25b   :  { %v879_v61 = vmul.f32 %v3040_v57, %v3036_v52  ;;  %v3042_v1 = vpop.eup %3041  ;;  %v1389_v57 = vld [vmem:[#allocation7 + $0x88] sm:$0xff] }
 0x25c   :  { %v878_v5 = vmul.f32 %v3042_v1, %v3436_v28  ;;  %v1131_v28 = vld [vmem:[#allocation7] sm:$0xff]  ;;  %v1391_v1 = vld [vmem:[#allocation7 + $0x98] sm:$0xff] }
 0x25d   :  { %v3044_v8 = vpop.eup %3043  ;;  %v3491_v33 = vpack.c.bf16 %v1135_v30, %v1131_v28  ;;  %v1401_v28 = vld [vmem:[#allocation7 + $0xe8] sm:$0xff]  ;;  %v1399_v30 = vld [vmem:[#allocation7 + $0xd8] sm:$0xff] }
 0x25e   :  { %v3479_v7 = vadd.f32 %v879_v61, %v878_v5  ;;  %v1393_v61 = vld [vmem:[#allocation7 + $0xa8] sm:$0xff]  ;;  %v1395_v5 = vld [vmem:[#allocation7 + $0xb8] sm:$0xff]  ;;  %v3568_v47 = vpack.c.bf16 %v1401_v28, %v1397_v24  ;;  %v3570_v63 = vpack.c.bf16 %v1403_v50, %v1399_v30  ;;  %v1426_v24 = vld [vmem:[#allocation7 + $0x1b0] sm:$0xff] }
 0x25f   :  { %v3556_v2 = vpack.c.bf16 %v1393_v61, %v1389_v57  ;;  %v1423_v57 = vld [vmem:[#allocation7 + $0x198] sm:$0xff]  ;;  %v1429_v28 = vld [vmem:[#allocation7 + $0x1c8] sm:$0xff]  ;;  %v3612_v50 = vpack.c.bf16 %v1426_v24, %v1422_v15 }
 0x260   :  { %3045 = vtanh.f32 %v3479_v7  ;;  %v1427_v61 = vld [vmem:[#allocation7 + $0x1b8] sm:$0xff]  ;;  %v1433_v30 = vld [vmem:[#allocation7 + $0x1e8] sm:$0xff] }
 0x261   :  { %v3614_v56 = vpack.c.bf16 %v1433_v30, %v1429_v28 }
 0x26a   :  { %v3046_v11 = vpop.eup %3045 }
 0x26b   :  { %v882_v12 = vmul.f32 %v3046_v11, %v3044_v8  ;;  %v1392_v8 = vld [vmem:[#allocation7 + $0xa0] sm:$0xff]  ;;  %v3558_v11 = vpack.c.bf16 %v1395_v5, %v1391_v1  ;;  %v3605_v5 = vpack.c.bf16 %v1427_v61, %v1423_v57 }
 0x26d   :  { %2345 = vst [vmem:[%s3774_s4 + $0x8] sm:$0xff] %v882_v12  ;;  %1019 = vmatmul.mubr.f32.vlgmr.msra.gmra.mrb[4].mxu0 %v882_v12  ;;  %1090 = vmatmul.mubr.f32.vlgmr.msra.gmra.mrb[4].mxu1 %v882_v12 }
 0x26e   :  { %1259 = vmatprep.mubr.f32.mxu0 %v3195_v0  ;;  %1330 = vmatprep.mubr.f32.mxu1 %v3195_v0 }
 0x26f   :  { %2629 = vmatpush1.bf16.msra.mxu0 %v3491_v33  ;;  %2661 = vmatpush1.bf16.msra.mxu1 %v3494_v53 }
 0x270   :  { %2631 = vmatprep.subr.bf16.mxu0 %v3499_v34  ;;  %2663 = vmatprep.subr.bf16.mxu1 %v3501_v45 }
 0x273   :  { %2633 = vmatpush1.bf16.msra.mxu0 %v3503_v38  ;;  %2665 = vmatpush1.bf16.msra.mxu1 %v3506_v49 }
 0x274   :  { %2635 = vmatprep.subr.bf16.mxu0 %v3276_v3  ;;  %2667 = vmatprep.subr.bf16.mxu1 %v3279_v6 }
 0x277   :  { %2637 = vmatpush1.bf16.msra.mxu0 %v3285_v10  ;;  %2669 = vmatpush1.bf16.msra.mxu1 %v3289_v13 }
 0x278   :  { %2639 = vmatprep.subr.bf16.mxu0 %v3293_v16  ;;  %2671 = vmatprep.subr.bf16.mxu1 %v3296_v19 }
 0x27b   :  { %2641 = vmatpush1.bf16.msra.mxu0 %v3302_v23  ;;  %2673 = vmatpush1.bf16.msra.mxu1 %v3306_v26 }
 0x27c   :  { %2643 = vmatprep.subr.bf16.mxu0 %v3310_v29  ;;  %2675 = vmatprep.subr.bf16.mxu1 %v3313_v32 }
 0x27f   :  { %2645 = vmatpush1.bf16.msra.mxu0 %v3319_v36  ;;  %2677 = vmatpush1.bf16.msra.mxu1 %v3323_v40 }
 0x280   :  { %2647 = vmatprep.subr.bf16.mxu0 %v3327_v44  ;;  %2679 = vmatprep.subr.bf16.mxu1 %v3330_v48 }
 0x283   :  { %2649 = vmatpush1.bf16.msra.mxu0 %v3336_v54  ;;  %2681 = vmatpush1.bf16.msra.mxu1 %v3340_v58 }
 0x284   :  { %2651 = vmatprep.subr.bf16.mxu0 %v3344_v62  ;;  %2683 = vmatprep.subr.bf16.mxu1 %v3347_v4 }
 0x287   :  { %2653 = vmatpush1.bf16.msra.mxu0 %v3353_v9  ;;  %2685 = vmatpush1.bf16.msra.mxu1 %v3357_v14 }
 0x288   :  { %2655 = vmatprep.subr.bf16.mxu0 %v3361_v18  ;;  %2687 = vmatprep.subr.bf16.mxu1 %v3364_v22 }
 0x28b   :  { %2657 = vmatpush1.bf16.msra.mxu0 %v3370_v25  ;;  %2689 = vmatpush1.bf16.msra.mxu1 %v3374_v27 }
 0x28c   :  { %2691 = vmatprep.subr.bf16.mxu0 %v3487_v21  ;;  %2723 = vmatprep.subr.bf16.mxu1 %v3489_v31 }
 0x340   :  { %v1020_v3 = vpop.f32.mrb[4].mxu0  ;;  %v1091_v6 = vpop.f32.mrb[4].mxu1 }
 0x341   :  { %v2950_v10 = vadd.f32 %v1020_v3, %v3424_v35  ;;  %v1022_v13 = vpop.f32.mrb[5].mxu0  ;;  %v1093_v16 = vpop.f32.mrb[5].mxu1  ;;  %v2966_v29 = vadd.f32 %v1091_v6, %v3430_v51  ;;  %v1409_v3 = vld [vmem:[#allocation7 + $0x128] sm:$0xff]  ;;  %v1407_v6 = vld [vmem:[#allocation7 + $0x118] sm:$0xff] }
 0x342   :  { %v2951_v19 = vadd.f32 %v1022_v13, %v3426_v37  ;;  %v2967_v32 = vadd.f32 %v1093_v16, %v3433_v59  ;;  %v1411_v13 = vld [vmem:[#allocation7 + $0x138] sm:$0xff]  ;;  %v1404_v16 = vld [vmem:[#allocation7 + $0x100] sm:$0xff] }
 0x343   :  { %v2346_v23 = vmul.f32 -1.442695, %v2950_v10  ;;  %v2348_v36 = vmul.f32 -1.442695, %v2966_v29  ;;  %v3580_v10 = vpack.c.bf16 %v1409_v3, %v1405_v46  ;;  %v1406_v29 = vld [vmem:[#allocation7 + $0x110] sm:$0xff]  ;;  %v3616_v46 = vpack.c.bf16 %v1435_v42, %v1431_v60  ;;  %v1432_v3 = vld [vmem:[#allocation7 + $0x1e0] sm:$0xff] }
 0x344   :  { %v2347_v26 = vmul.f32 -1.442695, %v2951_v19  ;;  %v1408_v19 = vld [vmem:[#allocation7 + $0x120] sm:$0xff] }
 0x345   :  { %3047 = vpow2.f32 %v2346_v23  ;;  %v3582_v23 = vpack.c.bf16 %v1411_v13, %v1407_v6  ;;  %v1430_v6 = vld [vmem:[#allocation7 + $0x1d0] sm:$0xff] }
 0x346   :  { %3049 = vpow2.f32 %v2347_v26  ;;  %v3584_v26 = vpack.c.bf16 %v1408_v19, %v1404_v16  ;;  %v1434_v13 = vld [vmem:[#allocation7 + $0x1f0] sm:$0xff]  ;;  %v3619_v16 = vpack.c.bf16 %v1432_v3, %v1428_v43 }
 0x347   :  { %3051 = vtanh.f32 %v2967_v32  ;;  %v1410_v32 = vld [vmem:[#allocation7 + $0x130] sm:$0xff]  ;;  %v3623_v19 = vpack.c.bf16 %v1434_v13, %v1430_v6 }
 0x348   :  { %3053 = vpow2.f32 %v2348_v36  ;;  %v3587_v36 = vpack.c.bf16 %v1410_v32, %v1406_v29 }
 0x34f   :  { %v3048_v40 = vpop.eup %3047 }
 0x350   :  { %v1109_v44 = vadd.f32 1.0, %v3048_v40  ;;  %v3050_v48 = vpop.eup %3049  ;;  %v1413_v40 = vld [vmem:[#allocation7 + $0x148] sm:$0xff] }
 0x351   :  { %v1110_v54 = vadd.f32 1.0, %v3050_v48  ;;  %v3052_v58 = vpop.eup %3051  ;;  %v1415_v48 = vld [vmem:[#allocation7 + $0x158] sm:$0xff] }
 0x352   :  { %3055 = vrcp.f32 %v1109_v44  ;;  %v3054_v62 = vpop.eup %3053  ;;  %v1417_v44 = vld [vmem:[#allocation7 + $0x168] sm:$0xff] }
 0x353   :  { %3057 = vrcp.f32 %v1110_v54  ;;  %v1111_v18 = vadd.f32 1.0, %v3054_v62  ;;  %v3592_v54 = vpack.c.bf16 %v1417_v44, %v1413_v40  ;;  %v1412_v62 = vld [vmem:[#allocation7 + $0x140] sm:$0xff] }
 0x355   :  { %3059 = vrcp.f32 %v1111_v18  ;;  %v1414_v18 = vld [vmem:[#allocation7 + $0x150] sm:$0xff] }
 0x35c   :  { %v3056_v4 = vpop.eup %3055 }
 0x35d   :  { %v1120_v9 = vmul.f32 %v3056_v4, %v3052_v58  ;;  %v3058_v14 = vpop.eup %3057  ;;  %v1419_v58 = vld [vmem:[#allocation7 + $0x178] sm:$0xff]  ;;  %v1416_v4 = vld [vmem:[#allocation7 + $0x160] sm:$0xff] }
 0x35e   :  { %v1119_v22 = vmul.f32 %v3058_v14, %v3479_v7  ;;  %v1388_v7 = vld [vmem:[#allocation7 + $0x80] sm:$0xff]  ;;  %v3596_v14 = vpack.c.bf16 %v1416_v4, %v1412_v62 }
 0x35f   :  { %v3060_v27 = vpop.eup %3059  ;;  %v3560_v12 = vpack.c.bf16 %v1392_v8, %v1388_v7  ;;  %v1420_v7 = vld [vmem:[#allocation7 + $0x180] sm:$0xff] }
 0x360   :  { %v3542_v25 = vadd.f32 %v1120_v9, %v1119_v22  ;;  %v3594_v9 = vpack.c.bf16 %v1419_v58, %v1415_v48  ;;  %v1418_v22 = vld [vmem:[#allocation7 + $0x170] sm:$0xff]  ;;  %v1424_v8 = vld [vmem:[#allocation7 + $0x1a0] sm:$0xff] }
 0x361   :  { %v3608_v17 = vpack.c.bf16 %v1424_v8, %v1420_v7 }
 0x362   :  { %3061 = vtanh.f32 %v3542_v25 }
 0x36c   :  { %v3062_v52 = vpop.eup %3061 }
 0x36d   :  { %v1123_v55 = vmul.f32 %v3062_v52, %v3060_v27  ;;  %v1421_v27 = vld [vmem:[#allocation7 + $0x188] sm:$0xff]  ;;  %v3599_v52 = vpack.c.bf16 %v1418_v22, %v1414_v18 }
 0x36f   :  { %2349 = vst [vmem:[%s3774_s4 + $0x10] sm:$0xff] %v1123_v55  ;;  %1260 = vmatmul.mubr.f32.vlgmr.msra.gmra.mrb[6].mxu0 %v1123_v55  ;;  %1331 = vmatmul.mubr.f32.vlgmr.msra.gmra.mrb[6].mxu1 %v1123_v55  ;;  %v1425_v55 = vld [vmem:[#allocation7 + $0x1a8] sm:$0xff] }
 0x370   :  { %2693 = vmatpush1.bf16.msra.mxu0 %v3491_v33  ;;  %2725 = vmatpush1.bf16.msra.mxu1 %v3494_v53  ;;  %v3603_v1 = vpack.c.bf16 %v1425_v55, %v1421_v27 }
 0x371   :  { %2695 = vmatprep.subr.bf16.mxu0 %v3499_v34  ;;  %2727 = vmatprep.subr.bf16.mxu1 %v3501_v45 }
 0x372   :  { %1500 = vmatprep.mubr.f32.mxu0 %v3195_v0  ;;  %1571 = vmatprep.mubr.f32.mxu1 %v3195_v0 }
 0x374   :  { %2697 = vmatpush1.bf16.msra.mxu0 %v3503_v38  ;;  %2729 = vmatpush1.bf16.msra.mxu1 %v3506_v49 }
 0x375   :  { %2699 = vmatprep.subr.bf16.mxu0 %v3556_v2  ;;  %2731 = vmatprep.subr.bf16.mxu1 %v3558_v11 }
 0x378   :  { %2701 = vmatpush1.bf16.msra.mxu0 %v3560_v12  ;;  %2733 = vmatpush1.bf16.msra.mxu1 %v3563_v20 }
 0x379   :  { %2703 = vmatprep.subr.bf16.mxu0 %v3568_v47  ;;  %2735 = vmatprep.subr.bf16.mxu1 %v3570_v63 }
 0x37c   :  { %2705 = vmatpush1.bf16.msra.mxu0 %v3572_v39  ;;  %2737 = vmatpush1.bf16.msra.mxu1 %v3575_v41 }
 0x37d   :  { %2707 = vmatprep.subr.bf16.mxu0 %v3580_v10  ;;  %2739 = vmatprep.subr.bf16.mxu1 %v3582_v23 }
 0x380   :  { %2709 = vmatpush1.bf16.msra.mxu0 %v3584_v26  ;;  %2741 = vmatpush1.bf16.msra.mxu1 %v3587_v36 }
 0x381   :  { %2711 = vmatprep.subr.bf16.mxu0 %v3592_v54  ;;  %2743 = vmatprep.subr.bf16.mxu1 %v3594_v9 }
 0x384   :  { %2713 = vmatpush1.bf16.msra.mxu0 %v3596_v14  ;;  %2745 = vmatpush1.bf16.msra.mxu1 %v3599_v52 }
 0x385   :  { %2715 = vmatprep.subr.bf16.mxu0 %v3603_v1  ;;  %2747 = vmatprep.subr.bf16.mxu1 %v3605_v5 }
 0x388   :  { %2717 = vmatpush1.bf16.msra.mxu0 %v3608_v17  ;;  %2749 = vmatpush1.bf16.msra.mxu1 %v3612_v50 }
 0x389   :  { %2719 = vmatprep.subr.bf16.mxu0 %v3614_v56  ;;  %2751 = vmatprep.subr.bf16.mxu1 %v3616_v46 }
 0x38c   :  { %2721 = vmatpush1.bf16.msra.mxu0 %v3619_v16  ;;  %2753 = vmatpush1.bf16.msra.mxu1 %v3623_v19 }
 0x38d   :  { %2755 = vmatprep.subr.bf16.mxu0 %v3487_v21  ;;  %2787 = vmatprep.subr.bf16.mxu1 %v3489_v31 }
 0x442   :  { %v1261_v29 = vpop.f32.mrb[6].mxu0  ;;  %v1332_v32 = vpop.f32.mrb[6].mxu1 }
 0x443   :  { %v2952_v40 = vadd.f32 %v1261_v29, %v3424_v35  ;;  %v1263_v44 = vpop.f32.mrb[7].mxu0  ;;  %v1334_v48 = vpop.f32.mrb[7].mxu1  ;;  %v2968_v18 = vadd.f32 %v1332_v32, %v3430_v51 }
 0x444   :  { %v2953_v58 = vadd.f32 %v1263_v44, %v3426_v37  ;;  %v2969_v22 = vadd.f32 %v1334_v48, %v3433_v59 }
 0x445   :  { %v2350_v62 = vmul.f32 -1.442695, %v2952_v40  ;;  %v2352_v27 = vmul.f32 -1.442695, %v2968_v18 }
 0x446   :  { %v2351_v4 = vmul.f32 -1.442695, %v2953_v58 }
 0x447   :  { %3063 = vpow2.f32 %v2350_v62 }
 0x448   :  { %3065 = vpow2.f32 %v2351_v4 }
 0x449   :  { %3067 = vtanh.f32 %v2969_v22 }
 0x44a   :  { %3069 = vpow2.f32 %v2352_v27 }
 0x451   :  { %v3064_v55 = vpop.eup %3063 }
 0x452   :  { %v1350_v57 = vadd.f32 1.0, %v3064_v55  ;;  %v3066_v61 = vpop.eup %3065 }
 0x453   :  { %v1351_v7 = vadd.f32 1.0, %v3066_v61  ;;  %v3068_v8 = vpop.eup %3067 }
 0x454   :  { %3071 = vrcp.f32 %v1350_v57  ;;  %v3070_v15 = vpop.eup %3069 }
 0x455   :  { %3073 = vrcp.f32 %v1351_v7  ;;  %v1352_v60 = vadd.f32 1.0, %v3070_v15 }
 0x457   :  { %3075 = vrcp.f32 %v1352_v60 }
 0x45e   :  { %v3072_v24 = vpop.eup %3071 }
 0x45f   :  { %v1361_v28 = vmul.f32 %v3072_v24, %v3068_v8  ;;  %v3074_v30 = vpop.eup %3073 }
 0x460   :  { %v1360_v42 = vmul.f32 %v3074_v30, %v3542_v25 }
 0x461   :  { %v3076_v3 = vpop.eup %3075 }
 0x462   :  { %v3635_v43 = vadd.f32 %v1361_v28, %v1360_v42 }
 0x464   :  { %3077 = vtanh.f32 %v3635_v43 }
 0x46e   :  { %v3078_v6 = vpop.eup %3077 }
 0x46f   :  { %v1364_v13 = vmul.f32 %v3078_v6, %v3076_v3 }
 0x471   :  { %2353 = vst [vmem:[%s3774_s4 + $0x18] sm:$0xff] %v1364_v13  ;;  %1501 = vmatmul.mubr.f32.vlgmr.msra.gmra.mrb[8].mxu0 %v1364_v13  ;;  %1572 = vmatmul.mubr.f32.vlgmr.msra.gmra.mrb[8].mxu1 %v1364_v13 }
 0x472   :  { %2757 = vmatpush1.bf16.msra.mxu0 %v3491_v33  ;;  %2789 = vmatpush1.bf16.msra.mxu1 %v3494_v53 }
 0x473   :  { %2759 = vmatprep.subr.bf16.mxu0 %v3499_v34  ;;  %2791 = vmatprep.subr.bf16.mxu1 %v3501_v45 }
 0x474   :  { %1741 = vmatprep.mubr.f32.mxu0 %v3195_v0  ;;  %1812 = vmatprep.mubr.f32.mxu1 %v3195_v0 }
 0x476   :  { %2761 = vmatpush1.bf16.msra.mxu0 %v3503_v38  ;;  %2793 = vmatpush1.bf16.msra.mxu1 %v3506_v49 }
 0x477   :  { %2763 = vmatprep.subr.bf16.mxu0 %v3556_v2  ;;  %2795 = vmatprep.subr.bf16.mxu1 %v3558_v11 }
 0x47a   :  { %2765 = vmatpush1.bf16.msra.mxu0 %v3560_v12  ;;  %2797 = vmatpush1.bf16.msra.mxu1 %v3563_v20 }
 0x47b   :  { %2767 = vmatprep.subr.bf16.mxu0 %v3568_v47  ;;  %2799 = vmatprep.subr.bf16.mxu1 %v3570_v63 }
 0x47e   :  { %2769 = vmatpush1.bf16.msra.mxu0 %v3572_v39  ;;  %2801 = vmatpush1.bf16.msra.mxu1 %v3575_v41 }
 0x47f   :  { %2771 = vmatprep.subr.bf16.mxu0 %v3580_v10  ;;  %2803 = vmatprep.subr.bf16.mxu1 %v3582_v23 }
 0x482   :  { %2773 = vmatpush1.bf16.msra.mxu0 %v3584_v26  ;;  %2805 = vmatpush1.bf16.msra.mxu1 %v3587_v36 }
 0x483   :  { %2775 = vmatprep.subr.bf16.mxu0 %v3592_v54  ;;  %2807 = vmatprep.subr.bf16.mxu1 %v3594_v9 }
 0x486   :  { %2777 = vmatpush1.bf16.msra.mxu0 %v3596_v14  ;;  %2809 = vmatpush1.bf16.msra.mxu1 %v3599_v52 }
 0x487   :  { %2779 = vmatprep.subr.bf16.mxu0 %v3603_v1  ;;  %2811 = vmatprep.subr.bf16.mxu1 %v3605_v5 }
 0x48a   :  { %2781 = vmatpush1.bf16.msra.mxu0 %v3608_v17  ;;  %2813 = vmatpush1.bf16.msra.mxu1 %v3612_v50 }
 0x48b   :  { %2783 = vmatprep.subr.bf16.mxu0 %v3614_v56  ;;  %2815 = vmatprep.subr.bf16.mxu1 %v3616_v46 }
 0x48e   :  { %2785 = vmatpush1.bf16.msra.mxu0 %v3619_v16  ;;  %2817 = vmatpush1.bf16.msra.mxu1 %v3623_v19 }
 0x48f   :  { %2819 = vmatprep.subr.bf16.mxu0 %v3487_v21  ;;  %2851 = vmatprep.subr.bf16.mxu1 %v3489_v31 }
 0x544   :  { %v1502_v25 = vpop.f32.mrb[8].mxu0  ;;  %v1573_v29 = vpop.f32.mrb[8].mxu1 }
 0x545   :  { %v2954_v32 = vadd.f32 %v1502_v25, %v3424_v35  ;;  %v1504_v40 = vpop.f32.mrb[9].mxu0  ;;  %v1575_v44 = vpop.f32.mrb[9].mxu1  ;;  %v2970_v4 = vadd.f32 %v1573_v29, %v3430_v51 }
 0x546   :  { %v2955_v48 = vadd.f32 %v1504_v40, %v3426_v37  ;;  %v2971_v18 = vadd.f32 %v1575_v44, %v3433_v59 }
 0x547   :  { %v2354_v58 = vmul.f32 -1.442695, %v2954_v32  ;;  %v2356_v22 = vmul.f32 -1.442695, %v2970_v4 }
 0x548   :  { %v2355_v62 = vmul.f32 -1.442695, %v2955_v48 }
 0x549   :  { %3079 = vpow2.f32 %v2354_v58 }
 0x54a   :  { %3081 = vpow2.f32 %v2355_v62 }
 0x54b   :  { %3083 = vtanh.f32 %v2971_v18 }
 0x54c   :  { %3085 = vpow2.f32 %v2356_v22 }
 0x553   :  { %v3080_v21 = vpop.eup %3079 }
 0x554   :  { %v1591_v27 = vadd.f32 1.0, %v3080_v21  ;;  %v3082_v31 = vpop.eup %3081 }
 0x555   :  { %v1592_v55 = vadd.f32 1.0, %v3082_v31  ;;  %v3084_v57 = vpop.eup %3083 }
 0x556   :  { %3087 = vrcp.f32 %v1591_v27  ;;  %v3086_v61 = vpop.eup %3085 }
 0x557   :  { %3089 = vrcp.f32 %v1592_v55  ;;  %v1593_v24 = vadd.f32 1.0, %v3086_v61 }
 0x559   :  { %3091 = vrcp.f32 %v1593_v24 }
 0x560   :  { %v3088_v7 = vpop.eup %3087 }
 0x561   :  { %v1602_v8 = vmul.f32 %v3088_v7, %v3084_v57  ;;  %v3090_v15 = vpop.eup %3089  ;;  %v2096_v7 = vld [vmem:[#allocation7 + $0x8] sm:$0xff] }
 0x562   :  { %v1601_v28 = vmul.f32 %v3090_v15, %v3635_v43  ;;  %v2098_v15 = vld [vmem:[#allocation7 + $0x18] sm:$0xff] }
 0x563   :  { %v3092_v60 = vpop.eup %3091 }
 0x564   :  { %v3680_v30 = vadd.f32 %v1602_v8, %v1601_v28  ;;  %v2100_v8 = vld [vmem:[#allocation7 + $0x28] sm:$0xff]  ;;  %v2102_v28 = vld [vmem:[#allocation7 + $0x38] sm:$0xff] }
 0x565   :  { %v2882_v24 = vpack.c.bf16 %v2100_v8, %v2096_v7 }
 0x566   :  { %3093 = vtanh.f32 %v3680_v30 }
 0x570   :  { %v3094_v42 = vpop.eup %3093 }
 0x571   :  { %v1605_v3 = vmul.f32 %v3094_v42, %v3092_v60  ;;  %v2099_v60 = vld [vmem:[#allocation7 + $0x20] sm:$0xff]  ;;  %v2914_v42 = vpack.c.bf16 %v2102_v28, %v2098_v15 }
 0x573   :  { %2357 = vst [vmem:[%s3774_s4 + $0x20] sm:$0xff] %v1605_v3  ;;  %1742 = vmatmul.mubr.f32.vlgmr.msra.gmra.mrb[10].mxu0 %v1605_v3  ;;  %1813 = vmatmul.mubr.f32.vlgmr.msra.gmra.mrb[10].mxu1 %v1605_v3 }
 0x574   :  { %2821 = vmatpush1.bf16.msra.mxu0 %v3491_v33  ;;  %2853 = vmatpush1.bf16.msra.mxu1 %v3494_v53 }
 0x575   :  { %2823 = vmatprep.subr.bf16.mxu0 %v3499_v34  ;;  %2855 = vmatprep.subr.bf16.mxu1 %v3501_v45 }
 0x576   :  { %1982 = vmatprep.mubr.f32.mxu0 %v3195_v0  ;;  %2053 = vmatprep.mubr.f32.mxu1 %v3195_v0 }
 0x578   :  { %2825 = vmatpush1.bf16.msra.mxu0 %v3503_v38  ;;  %2857 = vmatpush1.bf16.msra.mxu1 %v3506_v49 }
 0x579   :  { %2827 = vmatprep.subr.bf16.mxu0 %v3556_v2  ;;  %2859 = vmatprep.subr.bf16.mxu1 %v3558_v11 }
 0x57c   :  { %2829 = vmatpush1.bf16.msra.mxu0 %v3560_v12  ;;  %2861 = vmatpush1.bf16.msra.mxu1 %v3563_v20 }
 0x57d   :  { %2831 = vmatprep.subr.bf16.mxu0 %v3568_v47  ;;  %2863 = vmatprep.subr.bf16.mxu1 %v3570_v63 }
 0x580   :  { %2833 = vmatpush1.bf16.msra.mxu0 %v3572_v39  ;;  %2865 = vmatpush1.bf16.msra.mxu1 %v3575_v41 }
 0x581   :  { %2835 = vmatprep.subr.bf16.mxu0 %v3580_v10  ;;  %2867 = vmatprep.subr.bf16.mxu1 %v3582_v23 }
 0x584   :  { %2837 = vmatpush1.bf16.msra.mxu0 %v3584_v26  ;;  %2869 = vmatpush1.bf16.msra.mxu1 %v3587_v36 }
 0x585   :  { %2839 = vmatprep.subr.bf16.mxu0 %v3592_v54  ;;  %2871 = vmatprep.subr.bf16.mxu1 %v3594_v9 }
 0x588   :  { %2841 = vmatpush1.bf16.msra.mxu0 %v3596_v14  ;;  %2873 = vmatpush1.bf16.msra.mxu1 %v3599_v52 }
 0x589   :  { %2843 = vmatprep.subr.bf16.mxu0 %v3603_v1  ;;  %2875 = vmatprep.subr.bf16.mxu1 %v3605_v5 }
 0x58c   :  { %2845 = vmatpush1.bf16.msra.mxu0 %v3608_v17  ;;  %2877 = vmatpush1.bf16.msra.mxu1 %v3612_v50 }
 0x58d   :  { %2847 = vmatprep.subr.bf16.mxu0 %v3614_v56  ;;  %2879 = vmatprep.subr.bf16.mxu1 %v3616_v46 }
 0x590   :  { %2849 = vmatpush1.bf16.msra.mxu0 %v3619_v16  ;;  %2881 = vmatpush1.bf16.msra.mxu1 %v3623_v19 }
 0x591   :  { %2883 = vmatprep.subr.bf16.mxu0 %v2882_v24  ;;  %2915 = vmatprep.subr.bf16.mxu1 %v2914_v42 }
 0x646   :  { %v1743_v33 = vpop.f32.mrb[10].mxu0  ;;  %v1814_v53 = vpop.f32.mrb[10].mxu1 }
 0x647   :  { %v2956_v34 = vadd.f32 %v1743_v33, %v3424_v35  ;;  %v1745_v45 = vpop.f32.mrb[11].mxu0  ;;  %v1816_v38 = vpop.f32.mrb[11].mxu1  ;;  %v2972_v13 = vadd.f32 %v1814_v53, %v3430_v51  ;;  %v2097_v33 = vld [vmem:[#allocation7 + $0x10] sm:$0xff] }
 0x648   :  { %v2957_v49 = vadd.f32 %v1745_v45, %v3426_v37  ;;  %v2973_v25 = vadd.f32 %v1816_v38, %v3433_v59  ;;  %v2101_v53 = vld [vmem:[#allocation7 + $0x30] sm:$0xff]  ;;  %v2104_v45 = vld [vmem:[#allocation7 + $0x48] sm:$0xff] }
 0x649   :  { %v2358_v43 = vmul.f32 -1.442695, %v2956_v34  ;;  %v2360_v29 = vmul.f32 -1.442695, %v2972_v13  ;;  %v2916_v34 = vpack.c.bf16 %v2101_v53, %v2097_v33  ;;  %v2108_v38 = vld [vmem:[#allocation7 + $0x68] sm:$0xff]  ;;  %v2107_v13 = vld [vmem:[#allocation7 + $0x60] sm:$0xff] }
 0x64a   :  { %v2359_v6 = vmul.f32 -1.442695, %v2957_v49  ;;  %v2106_v49 = vld [vmem:[#allocation7 + $0x58] sm:$0xff] }
 0x64b   :  { %3095 = vpow2.f32 %v2358_v43  ;;  %v2110_v43 = vld [vmem:[#allocation7 + $0x78] sm:$0xff] }
 0x64c   :  { %3097 = vpow2.f32 %v2359_v6  ;;  %v2103_v6 = vld [vmem:[#allocation7 + $0x40] sm:$0xff] }
 0x64d   :  { %3099 = vtanh.f32 %v2973_v25  ;;  %v2918_v25 = vpack.c.bf16 %v2110_v43, %v2106_v49 }
 0x64e   :  { %3101 = vpow2.f32 %v2360_v29  ;;  %v2888_v29 = vpack.c.bf16 %v2107_v13, %v2103_v6 }
 0x655   :  { %v3096_v32 = vpop.eup %3095 }
 0x656   :  { %v1832_v40 = vadd.f32 1.0, %v3096_v32  ;;  %v3098_v44 = vpop.eup %3097  ;;  %v2105_v32 = vld [vmem:[#allocation7 + $0x50] sm:$0xff] }
 0x657   :  { %v1833_v48 = vadd.f32 1.0, %v3098_v44  ;;  %v3100_v58 = vpop.eup %3099 }
 0x658   :  { %3103 = vrcp.f32 %v1832_v40  ;;  %v3102_v62 = vpop.eup %3101  ;;  %v2109_v40 = vld [vmem:[#allocation7 + $0x70] sm:$0xff] }
 0x659   :  { %3105 = vrcp.f32 %v1833_v48  ;;  %v1834_v21 = vadd.f32 1.0, %v3102_v62  ;;  %v2920_v44 = vpack.c.bf16 %v2109_v40, %v2105_v32 }
 0x65b   :  { %3107 = vrcp.f32 %v1834_v21 }
 0x662   :  { %v3104_v4 = vpop.eup %3103 }
 0x663   :  { %v1843_v18 = vmul.f32 %v3104_v4, %v3100_v58  ;;  %v3106_v22 = vpop.eup %3105 }
 0x664   :  { %v1842_v27 = vmul.f32 %v3106_v22, %v3680_v30  ;;  %v2095_v30 = vld [vmem:[#allocation7] sm:$0xff] }
 0x665   :  { %v3108_v55 = vpop.eup %3107  ;;  %v2884_v3 = vpack.c.bf16 %v2099_v60, %v2095_v30 }
 0x666   :  { %v3723_v31 = vadd.f32 %v1843_v18, %v1842_v27 }
 0x668   :  { %3109 = vtanh.f32 %v3723_v31 }
 0x672   :  { %v3110_v57 = vpop.eup %3109 }
 0x673   :  { %v1846_v61 = vmul.f32 %v3110_v57, %v3108_v55 }
 0x675   :  { %2361 = vst [vmem:[%s3774_s4 + $0x28] sm:$0xff] %v1846_v61  ;;  %1983 = vmatmul.mubr.f32.vlgmr.msra.gmra.mrb[12].mxu0 %v1846_v61  ;;  %2054 = vmatmul.mubr.f32.vlgmr.msra.gmra.mrb[12].mxu1 %v1846_v61 }
 0x676   :  { %2223 = vmatprep.mubr.f32.mxu0 %v3195_v0  ;;  %2294 = vmatprep.mubr.f32.mxu1 %v3195_v0  ;;  %v2886_v0 = vpack.c.bf16 %v2108_v38, %v2104_v45 }
 0x677   :  { %2885 = vmatpush1.bf16.msra.mxu0 %v2884_v3  ;;  %2917 = vmatpush1.bf16.msra.mxu1 %v2916_v34 }
 0x678   :  { %2887 = vmatprep.subr.bf16.mxu0 %v2886_v0  ;;  %2919 = vmatprep.subr.bf16.mxu1 %v2918_v25 }
 0x67b   :  { %2889 = vmatpush1.bf16.msra.mxu0 %v2888_v29  ;;  %2921 = vmatpush1.bf16.msra.mxu1 %v2920_v44 }
 0x67c   :  { %2891 = vmatprep.subr.bf16.mxu0 %v3556_v2  ;;  %2923 = vmatprep.subr.bf16.mxu1 %v3558_v11 }
 0x67f   :  { %2893 = vmatpush1.bf16.msra.mxu0 %v3560_v12  ;;  %2925 = vmatpush1.bf16.msra.mxu1 %v3563_v20 }
 0x680   :  { %2895 = vmatprep.subr.bf16.mxu0 %v3568_v47  ;;  %2927 = vmatprep.subr.bf16.mxu1 %v3570_v63 }
 0x683   :  { %2897 = vmatpush1.bf16.msra.mxu0 %v3572_v39  ;;  %2929 = vmatpush1.bf16.msra.mxu1 %v3575_v41 }
 0x684   :  { %2899 = vmatprep.subr.bf16.mxu0 %v3580_v10  ;;  %2931 = vmatprep.subr.bf16.mxu1 %v3582_v23 }
 0x687   :  { %2901 = vmatpush1.bf16.msra.mxu0 %v3584_v26  ;;  %2933 = vmatpush1.bf16.msra.mxu1 %v3587_v36 }
 0x688   :  { %2903 = vmatprep.subr.bf16.mxu0 %v3592_v54  ;;  %2935 = vmatprep.subr.bf16.mxu1 %v3594_v9 }
 0x68b   :  { %2905 = vmatpush1.bf16.msra.mxu0 %v3596_v14  ;;  %2937 = vmatpush1.bf16.msra.mxu1 %v3599_v52 }
 0x68c   :  { %2907 = vmatprep.subr.bf16.mxu0 %v3603_v1  ;;  %2939 = vmatprep.subr.bf16.mxu1 %v3605_v5 }
 0x68f   :  { %2909 = vmatpush1.bf16.msra.mxu0 %v3608_v17  ;;  %2941 = vmatpush1.bf16.msra.mxu1 %v3612_v50 }
 0x690   :  { %2911 = vmatprep.subr.bf16.mxu0 %v3614_v56  ;;  %2943 = vmatprep.subr.bf16.mxu1 %v3616_v46 }
 0x693   :  { %2913 = vmatpush1.bf16.msra.mxu0 %v3619_v16  ;;  %2945 = vmatpush1.bf16.msra.mxu1 %v3623_v19 }
 0x748   :  { %v1984_v2 = vpop.f32.mrb[12].mxu0  ;;  %v2055_v11 = vpop.f32.mrb[12].mxu1 }
 0x749   :  { %v2958_v12 = vadd.f32 %v1984_v2, %v3424_v35  ;;  %v1986_v20 = vpop.f32.mrb[13].mxu0  ;;  %v2057_v47 = vpop.f32.mrb[13].mxu1  ;;  %v2974_v10 = vadd.f32 %v2055_v11, %v3430_v51 }
 0x74a   :  { %v2959_v63 = vadd.f32 %v1986_v20, %v3426_v37  ;;  %v2975_v23 = vadd.f32 %v2057_v47, %v3433_v59 }
 0x74b   :  { %v2362_v39 = vmul.f32 -1.442695, %v2958_v12  ;;  %v2364_v26 = vmul.f32 -1.442695, %v2974_v10 }
 0x74c   :  { %v2363_v41 = vmul.f32 -1.442695, %v2959_v63 }
 0x74d   :  { %3111 = vpow2.f32 %v2362_v39 }
 0x74e   :  { %3113 = vpow2.f32 %v2363_v41 }
 0x74f   :  { %3115 = vtanh.f32 %v2975_v23 }
 0x750   :  { %3117 = vpow2.f32 %v2364_v26 }
 0x757   :  { %v3112_v36 = vpop.eup %3111 }
 0x758   :  { %v2073_v54 = vadd.f32 1.0, %v3112_v36  ;;  %v3114_v9 = vpop.eup %3113 }
 0x759   :  { %v2074_v14 = vadd.f32 1.0, %v3114_v9  ;;  %v3116_v52 = vpop.eup %3115 }
 0x75a   :  { %3119 = vrcp.f32 %v2073_v54  ;;  %v3118_v1 = vpop.eup %3117 }
 0x75b   :  { %3121 = vrcp.f32 %v2074_v14  ;;  %v2075_v56 = vadd.f32 1.0, %v3118_v1 }
 0x75d   :  { %3123 = vrcp.f32 %v2075_v56 }
 0x764   :  { %v3120_v5 = vpop.eup %3119 }
 0x765   :  { %v2084_v17 = vmul.f32 %v3120_v5, %v3116_v52  ;;  %v3122_v50 = vpop.eup %3121 }
 0x766   :  { %v2083_v46 = vmul.f32 %v3122_v50, %v3723_v31 }
 0x767   :  { %v3124_v19 = vpop.eup %3123 }
 0x768   :  { %v2085_v16 = vadd.f32 %v2084_v17, %v2083_v46 }
 0x76a   :  { %3125 = vtanh.f32 %v2085_v16 }
 0x774   :  { %v3126_v48 = vpop.eup %3125 }
 0x775   :  { %v2087_v58 = vmul.f32 %v3126_v48, %v3124_v19 }
 0x777   :  { %2365 = vst [vmem:[%s3774_s4 + $0x30] sm:$0xff] %v2087_v58  ;;  %2224 = vmatmul.mubr.f32.vlgmr.msra.gmra.mrb[14].mxu0 %v2087_v58  ;;  %2295 = vmatmul.mubr.f32.vlgmr.msra.gmra.mrb[14].mxu1 %v2087_v58 }
 0x84a   :  { %v2225_v62 = vpop.f32.mrb[14].mxu0  ;;  %v2296_v4 = vpop.f32.mrb[14].mxu1 }
 0x84b   :  { %v2960_v18 = vadd.f32 %v2225_v62, %v3424_v35  ;;  %v2227_v22 = vpop.f32.mrb[15].mxu0  ;;  %v2298_v21 = vpop.f32.mrb[15].mxu1  ;;  %v2976_v57 = vadd.f32 %v2296_v4, %v3430_v51 }
 0x84c   :  { %v2961_v27 = vadd.f32 %v2227_v22, %v3426_v37  ;;  %v2977_v61 = vadd.f32 %v2298_v21, %v3433_v59 }
 0x84d   :  { %v2366_v31 = vmul.f32 -1.442695, %v2960_v18  ;;  %v2368_v7 = vmul.f32 -1.442695, %v2976_v57 }
 0x84e   :  { %v2367_v55 = vmul.f32 -1.442695, %v2961_v27 }
 0x84f   :  { %3127 = vpow2.f32 %v2366_v31 }
 0x850   :  { %3129 = vpow2.f32 %v2367_v55 }
 0x851   :  { %3131 = vtanh.f32 %v2977_v61 }
 0x852   :  { %3133 = vpow2.f32 %v2368_v7 }
 0x859   :  { %v3128_v8 = vpop.eup %3127 }
 0x85a   :  { %v2314_v15 = vadd.f32 1.0, %v3128_v8  ;;  %v3130_v24 = vpop.eup %3129 }
 0x85b   :  { %v2315_v35 = vadd.f32 1.0, %v3130_v24  ;;  %v3132_v28 = vpop.eup %3131 }
 0x85c   :  { %3135 = vrcp.f32 %v2314_v15  ;;  %v3134_v30 = vpop.eup %3133 }
 0x85d   :  { %3137 = vrcp.f32 %v2315_v35  ;;  %v2316_v3 = vadd.f32 1.0, %v3134_v30 }
 0x85f   :  { %3139 = vrcp.f32 %v2316_v3 }
 0x866   :  { %v3136_v37 = vpop.eup %3135 }
 0x867   :  { %v2325_v60 = vmul.f32 %v3136_v37, %v3132_v28  ;;  %v3138_v42 = vpop.eup %3137 }
 0x868   :  { %v2324_v33 = vmul.f32 %v3138_v42, %v2085_v16 }
 0x869   :  { %v3140_v51 = vpop.eup %3139 }
 0x86a   :  { %v2326_v53 = vadd.f32 %v2325_v60, %v2324_v33 }
 0x86c   :  { %3141 = vtanh.f32 %v2326_v53 }
 0x876   :  { %v3142_v59 = vpop.eup %3141 }
 0x877   :  { %v2328_v34 = vmul.f32 %v3142_v59, %v3140_v51 }
 0x879   :  { %2369 = vst [vmem:[%s3774_s4 + $0x38] sm:$0xff] %v2328_v34 }
 0x87a   :  { %2337 = vsyncpa [#allocation6], 1 }
 0x87b   :  { %2338 = vsyncpa [#allocation8], 1 }

</bundles_post_ra>
